<compile_context>
chip_gen: v5e
topology: v5e:2x2
jax: 0.10.0
libtpu: 0.0.40
codegen_flags: <defaults>
</compile_context>

<pallas_src>
import jax
import jax.numpy as jnp
from jax.experimental import pallas as pl
from jax.experimental.pallas import tpu as pltpu


# ----------------------------- fused Pallas kernel -------------------------

def _lenet5_kernel(x_ref,
                   w1b_ref, b1_ref, sh1e_ref, sh1o_ref, sw1e_ref, sw1o_ref,
                   w2b_ref, b2_ref, sh2e_ref, sh2o_ref, sw2e_ref, sw2o_ref,
                   w5_ref, b5_ref, w6_ref, b6_ref, w7_ref, b7_ref,
                   o_ref):
    f32 = jnp.float32
    x = x_ref[0]                                    # (32, 32) zero-padded image

    # conv1 + ReLU: rows = out_channel*28 + i, lanes = j  ->  (168, 28)
    a1 = b1_ref[...]
    for kj in range(5):
        a1 = a1 + jnp.dot(w1b_ref[kj], x[:, kj:kj + 28],
                          preferred_element_type=f32)
    a1 = jnp.maximum(a1, 0.0)

    # 2x2 maxpool -> (84, 14): even/odd selection matmuls + elementwise max
    r1 = jnp.maximum(jnp.dot(sh1e_ref[...], a1, preferred_element_type=f32),
                     jnp.dot(sh1o_ref[...], a1, preferred_element_type=f32))
    u1 = jnp.maximum(jnp.dot(r1, sw1e_ref[...], preferred_element_type=f32),
                     jnp.dot(r1, sw1o_ref[...], preferred_element_type=f32))

    # conv3 + ReLU: rows = out_channel*10 + i  ->  (160, 10)
    a3 = b2_ref[...]
    for kj in range(5):
        a3 = a3 + jnp.dot(w2b_ref[kj], u1[:, kj:kj + 10],
                          preferred_element_type=f32)
    a3 = jnp.maximum(a3, 0.0)

    # 2x2 maxpool -> (80, 5)
    r2 = jnp.maximum(jnp.dot(sh2e_ref[...], a3, preferred_element_type=f32),
                     jnp.dot(sh2o_ref[...], a3, preferred_element_type=f32))
    p2 = jnp.maximum(jnp.dot(r2, sw2e_ref[...], preferred_element_type=f32),
                     jnp.dot(r2, sw2o_ref[...], preferred_element_type=f32))

    # fc5 (400 -> 120): contract over both dims of p2 -- no flatten/reshape.
    acc = p2[:, 0:1] * w5_ref[0]
    for q in range(1, 5):
        acc = acc + p2[:, q:q + 1] * w5_ref[q]       # (80, 120)
    ones_row = jnp.ones((1, 80), f32)
    h1 = jnp.dot(ones_row, acc, preferred_element_type=f32) + b5_ref[...]
    h1 = jnp.maximum(h1, 0.0)                        # (1, 120)

    # fc6 (120 -> 84) + ReLU, fc7 (84 -> 10)
    h2 = jnp.maximum(
        jnp.dot(h1, w6_ref[...], preferred_element_type=f32) + b6_ref[...], 0.0)
    logits = jnp.dot(h2, w7_ref[...], preferred_element_type=f32) + b7_ref[...]

    # softmax over the 10 classes (dim=1 in the PyTorch module)
    m = jnp.max(logits, axis=1, keepdims=True)
    e = jnp.exp(logits - m)
    s = jnp.sum(e, axis=1, keepdims=True)
    o_ref[0] = e * pl.reciprocal(s, approx=True)


# -------------------- one-time weight folding (plain JAX) ------------------

def prepare_params(params):
    """Fold PyTorch-layout weights into the matrices the fused kernel consumes.
    Weight-only work; do it once outside the per-example forward."""
    f32 = jnp.float32
    w1 = params["conv1_w"].astype(f32).reshape(6, 5, 5)       # [o, ki, kj]
    w3 = params["conv3_w"].astype(f32)                         # [o, c, ki, kj]

    # conv1: 5 banded matrices, w1b[kj, o*28+i, r] = w1[o, r-i, kj]
    band1 = (jnp.arange(32)[None, None, :]
             == jnp.arange(28)[:, None, None] + jnp.arange(5)[None, :, None]
             ).astype(f32)                                     # (28, 5, 32)
    w1b = jnp.einsum("oab,iar->boir", w1, band1).reshape(5, 6 * 28, 32)
    b1r = jnp.repeat(params["conv1_b"].astype(f32), 28).reshape(6 * 28, 1)

    # conv3: 5 banded matrices, w2b[kj, o*10+i, c*14+h] = w3[o, c, h-i, kj]
    band3 = (jnp.arange(14)[None, None, :]
             == jnp.arange(10)[:, None, None] + jnp.arange(5)[None, :, None]
             ).astype(f32)                                     # (10, 5, 14)
    w2b = jnp.einsum("ocab,iah->boich", w3, band3).reshape(5, 16 * 10, 6 * 14)
    b2r = jnp.repeat(params["conv3_b"].astype(f32), 10).reshape(16 * 10, 1)

    # even/odd selection matrices for the two 2x2 max-pools
    def row_sel(n_ch, h, off):                 # (n_ch*h/2, n_ch*h)
        r = jnp.arange(n_ch * (h // 2))
        src = (r // (h // 2)) * h + 2 * (r % (h // 2)) + off
        return jax.nn.one_hot(src, n_ch * h, dtype=f32)

    def col_sel(w, off):                       # (w, w/2)
        return jax.nn.one_hot(jnp.arange(w // 2) * 2 + off, w, dtype=f32).T

    sh1e, sh1o = row_sel(6, 28, 0), row_sel(6, 28, 1)          # (84, 168)
    sw1e, sw1o = col_sel(28, 0), col_sel(28, 1)                # (28, 14)
    sh2e, sh2o = row_sel(16, 10, 0), row_sel(16, 10, 1)        # (80, 160)
    sw2e, sw2o = col_sel(10, 0), col_sel(10, 1)                # (10, 5)

    # fc5 regrouped so the (16,5,5)->400 flatten never materializes:
    # w5t[q, r, n] = fc5_w[r*5 + q, n]  with r = channel*5 + row, q = col.
    w5t = params["fc5_w"].astype(f32).reshape(80, 5, 120).transpose(1, 0, 2)
    b5r = params["fc5_b"].astype(f32).reshape(1, 120)
    w6 = params["fc6_w"].astype(f32)
    b6r = params["fc6_b"].astype(f32).reshape(1, 84)
    w7 = params["fc7_w"].astype(f32)
    b7r = params["fc7_b"].astype(f32).reshape(1, 10)

    return (w1b, b1r, sh1e, sh1o, sw1e, sw1o,
            w2b, b2r, sh2e, sh2o, sw2e, sw2o,
            w5t, b5r, w6, b6r, w7, b7r)


# ------------------------------ forward wrappers ----------------------------

def lenet5_apply(prep, img):
    B = img.shape[0]
    x = img.astype(jnp.float32).reshape(B, 28, 28)
    x = jnp.pad(x, ((0, 0), (2, 2), (2, 2)))       # conv1 padding=2 -> (B,32,32)

    def const_spec(a):
        nd = a.ndim
        return pl.BlockSpec(a.shape, lambda b, _nd=nd: (0,) * _nd)

    in_specs = [pl.BlockSpec((1, 32, 32), lambda b: (b, 0, 0))]
    in_specs += [const_spec(w) for w in prep]

    flops_per_img = 2 * (5 * 168 * 32 * 28 + 2 * 84 * 168 * 28 + 2 * 84 * 28 * 14
                         + 5 * 160 * 84 * 10 + 2 * 80 * 160 * 10 + 2 * 80 * 10 * 5
                         + 5 * 80 * 120 + 80 * 120 + 120 * 84 + 84 * 10)
    bytes_accessed = 4 * (int(x.size) + sum(int(w.size) for w in prep) + B * 10)

    out = pl.pallas_call(
        _lenet5_kernel,
        out_shape=jax.ShapeDtypeStruct((B, 1, 10), jnp.float32),
        grid=(B,),
        in_specs=in_specs,
        out_specs=pl.BlockSpec((1, 1, 10), lambda b: (b, 0, 0)),
        compiler_params=pltpu.CompilerParams(
            dimension_semantics=("parallel",)),
        cost_estimate=pl.CostEstimate(
            flops=int(B) * flops_per_img,
            transcendentals=10 * int(B),
            bytes_accessed=int(bytes_accessed)),
    )(x, *prep)
    return out.reshape(B, 10)


def lenet5_forward(params, img):
    """PyTorch-equivalent forward: class probabilities of shape (B, 10)."""
    return lenet5_apply(prepare_params(params), img)


# ------------------------------ pure-JAX reference --------------------------

def lenet5_reference(params, img):
    x = img.astype(jnp.float32)
    y = jax.lax.conv_general_dilated(
        x, params["conv1_w"], window_strides=(1, 1), padding=((2, 2), (2, 2)),
        dimension_numbers=("NCHW", "OIHW", "NCHW"))
    y = jax.nn.relu(y + params["conv1_b"].reshape(1, 6, 1, 1))
    y = jax.lax.reduce_window(y, -jnp.inf, jax.lax.max,
                              (1, 1, 2, 2), (1, 1, 2, 2), "VALID")
    y = jax.lax.conv_general_dilated(
        y, params["conv3_w"], window_strides=(1, 1), padding="VALID",
        dimension_numbers=("NCHW", "OIHW", "NCHW"))
    y = jax.nn.relu(y + params["conv3_b"].reshape(1, 16, 1, 1))
    y = jax.lax.reduce_window(y, -jnp.inf, jax.lax.max,
                              (1, 1, 2, 2), (1, 1, 2, 2), "VALID")
    y = y.reshape(y.shape[0], 16 * 5 * 5)
    y = jax.nn.relu(y @ params["fc5_w"] + params["fc5_b"])
    y = jax.nn.relu(y @ params["fc6_w"] + params["fc6_b"])
    y = y @ params["fc7_w"] + params["fc7_b"]
    return jax.nn.softmax(y, axis=1)


# ---------------------------------- init ------------------------------------

def init_params(key):
    # Deterministic init mimicking PyTorch defaults: U(-1/sqrt(fan_in), ...)
    def u(k, shape, fan_in):
        bound = 1.0 / (fan_in ** 0.5)
        return jax.random.uniform(k, shape, jnp.float32, -bound, bound)

    ks = jax.random.split(key, 10)
    return {
        "conv1_w": u(ks[0], (6, 1, 5, 5), 1 * 5 * 5),
        "conv1_b": u(ks[1], (6,), 1 * 5 * 5),
        "conv3_w": u(ks[2], (16, 6, 5, 5), 6 * 5 * 5),
        "conv3_b": u(ks[3], (16,), 6 * 5 * 5),
        "fc5_w":   u(ks[4], (400, 120), 400),
        "fc5_b":   u(ks[5], (120,), 400),
        "fc6_w":   u(ks[6], (120, 84), 120),
        "fc6_b":   u(ks[7], (84,), 120),
        "fc7_w":   u(ks[8], (84, 10), 84),
        "fc7_b":   u(ks[9], (10,), 84),
    }


if __name__ == "__main__":
    key = jax.random.PRNGKey(0)
    pkey, xkey = jax.random.split(key)
    params = init_params(pkey)
    img = jax.random.normal(xkey, (2, 1, 28, 28), jnp.float32)   # MNIST-shaped batch

    prep = jax.block_until_ready(prepare_params(params))  # weight folding, once
    out = jax.block_until_ready(jax.jit(lenet5_apply)(prep, img))

    assert out.shape == (2, 10)
    assert bool(jnp.all(jnp.isfinite(out)))

    ref = jax.block_until_ready(jax.jit(lenet5_reference)(params, img))
    assert float(jnp.max(jnp.abs(out - ref))) < 2e-2, "kernel/reference mismatch"
    assert float(jnp.max(jnp.abs(jnp.sum(out, axis=1) - 1.0))) < 1e-3

    print("KERNEL_OK")
</pallas_src>

<mosaic_0001>
module attributes {stable_mosaic.version = 11 : i64} {
  func.func @_lenet5_kernel(%arg0: i32, %arg1: memref<1x32x32xf32, #tpu.memory_space<vmem>>, %arg2: memref<5x168x32xf32, #tpu.memory_space<vmem>>, %arg3: memref<168x1xf32, #tpu.memory_space<vmem>>, %arg4: memref<84x168xf32, #tpu.memory_space<vmem>>, %arg5: memref<84x168xf32, #tpu.memory_space<vmem>>, %arg6: memref<28x14xf32, #tpu.memory_space<vmem>>, %arg7: memref<28x14xf32, #tpu.memory_space<vmem>>, %arg8: memref<5x160x84xf32, #tpu.memory_space<vmem>>, %arg9: memref<160x1xf32, #tpu.memory_space<vmem>>, %arg10: memref<80x160xf32, #tpu.memory_space<vmem>>, %arg11: memref<80x160xf32, #tpu.memory_space<vmem>>, %arg12: memref<10x5xf32, #tpu.memory_space<vmem>>, %arg13: memref<10x5xf32, #tpu.memory_space<vmem>>, %arg14: memref<5x80x120xf32, #tpu.memory_space<vmem>>, %arg15: memref<1x120xf32, #tpu.memory_space<vmem>>, %arg16: memref<120x84xf32, #tpu.memory_space<vmem>>, %arg17: memref<1x84xf32, #tpu.memory_space<vmem>>, %arg18: memref<84x10xf32, #tpu.memory_space<vmem>>, %arg19: memref<1x10xf32, #tpu.memory_space<vmem>>, %arg20: memref<1x1x10xf32, #tpu.memory_space<vmem>>) attributes {dimension_semantics = [#tpu.dimension_semantics<parallel>], iteration_bounds = array<i64: 2>, scalar_prefetch = 0 : i64, scratch_operands = 0 : i64, tpu.core_type = #tpu.core_type<tc>, window_params = [{transform_indices = @transform_0, window_bounds = array<i64: 1, 32, 32>}, {pipeline_mode = #tpu.pipeline_mode<synchronous>, transform_indices = @transform_1, window_bounds = array<i64: 5, 168, 32>}, {pipeline_mode = #tpu.pipeline_mode<synchronous>, transform_indices = @transform_2, window_bounds = array<i64: 168, 1>}, {pipeline_mode = #tpu.pipeline_mode<synchronous>, transform_indices = @transform_3, window_bounds = array<i64: 84, 168>}, {pipeline_mode = #tpu.pipeline_mode<synchronous>, transform_indices = @transform_4, window_bounds = array<i64: 84, 168>}, {pipeline_mode = #tpu.pipeline_mode<synchronous>, transform_indices = @transform_5, window_bounds = array<i64: 28, 14>}, {pipeline_mode = #tpu.pipeline_mode<synchronous>, transform_indices = @transform_6, window_bounds = array<i64: 28, 14>}, {pipeline_mode = #tpu.pipeline_mode<synchronous>, transform_indices = @transform_7, window_bounds = array<i64: 5, 160, 84>}, {pipeline_mode = #tpu.pipeline_mode<synchronous>, transform_indices = @transform_8, window_bounds = array<i64: 160, 1>}, {pipeline_mode = #tpu.pipeline_mode<synchronous>, transform_indices = @transform_9, window_bounds = array<i64: 80, 160>}, {pipeline_mode = #tpu.pipeline_mode<synchronous>, transform_indices = @transform_10, window_bounds = array<i64: 80, 160>}, {pipeline_mode = #tpu.pipeline_mode<synchronous>, transform_indices = @transform_11, window_bounds = array<i64: 10, 5>}, {pipeline_mode = #tpu.pipeline_mode<synchronous>, transform_indices = @transform_12, window_bounds = array<i64: 10, 5>}, {pipeline_mode = #tpu.pipeline_mode<synchronous>, transform_indices = @transform_13, window_bounds = array<i64: 5, 80, 120>}, {pipeline_mode = #tpu.pipeline_mode<synchronous>, transform_indices = @transform_14, window_bounds = array<i64: 1, 120>}, {pipeline_mode = #tpu.pipeline_mode<synchronous>, transform_indices = @transform_15, window_bounds = array<i64: 120, 84>}, {pipeline_mode = #tpu.pipeline_mode<synchronous>, transform_indices = @transform_16, window_bounds = array<i64: 1, 84>}, {pipeline_mode = #tpu.pipeline_mode<synchronous>, transform_indices = @transform_17, window_bounds = array<i64: 84, 10>}, {pipeline_mode = #tpu.pipeline_mode<synchronous>, transform_indices = @transform_18, window_bounds = array<i64: 1, 10>}, {transform_indices = @transform_19, window_bounds = array<i64: 1, 1, 10>}]} {
    %c0 = arith.constant 0 : index
    %c0_0 = arith.constant 0 : index
    %c0_1 = arith.constant 0 : index
    %0 = vector.load %arg1[%c0, %c0_0, %c0_1] : memref<1x32x32xf32, #tpu.memory_space<vmem>>, vector<1x32x32xf32>
    %1 = vector.shape_cast %0 : vector<1x32x32xf32> to vector<32x32xf32>
    %c0_2 = arith.constant 0 : index
    %c0_3 = arith.constant 0 : index
    %2 = vector.load %arg3[%c0_2, %c0_3] : memref<168x1xf32, #tpu.memory_space<vmem>>, vector<168x1xf32>
    %c0_4 = arith.constant 0 : index
    %c0_5 = arith.constant 0 : index
    %c0_6 = arith.constant 0 : index
    %3 = vector.load %arg2[%c0_4, %c0_5, %c0_6] : memref<5x168x32xf32, #tpu.memory_space<vmem>>, vector<1x168x32xf32>
    %4 = vector.shape_cast %3 : vector<1x168x32xf32> to vector<168x32xf32>
    %5 = vector.extract_strided_slice %1 {offsets = [0, 0], sizes = [32, 28], strides = [1, 1]} : vector<32x32xf32> to vector<32x28xf32>
    %cst = arith.constant dense<0.000000e+00> : vector<168x28xf32>
    %6 = tpu.matmul %4, %5, %cst {dimension_numbers = #tpu.dot_dimension_numbers<[1], [0], [0], [1], [0, 0, 1, 1], [], []>} : vector<168x32xf32>, vector<32x28xf32>, vector<168x28xf32> -> vector<168x28xf32>
    %7 = vector.broadcast %2 : vector<168x1xf32> to vector<168x28xf32>
    %8 = arith.addf %7, %6 : vector<168x28xf32>
    %c1 = arith.constant 1 : index
    %c0_7 = arith.constant 0 : index
    %c0_8 = arith.constant 0 : index
    %9 = vector.load %arg2[%c1, %c0_7, %c0_8] : memref<5x168x32xf32, #tpu.memory_space<vmem>>, vector<1x168x32xf32>
    %10 = vector.shape_cast %9 : vector<1x168x32xf32> to vector<168x32xf32>
    %11 = vector.extract_strided_slice %1 {offsets = [0, 1], sizes = [32, 28], strides = [1, 1]} : vector<32x32xf32> to vector<32x28xf32>
    %cst_9 = arith.constant dense<0.000000e+00> : vector<168x28xf32>
    %12 = tpu.matmul %10, %11, %cst_9 {dimension_numbers = #tpu.dot_dimension_numbers<[1], [0], [0], [1], [0, 0, 1, 1], [], []>} : vector<168x32xf32>, vector<32x28xf32>, vector<168x28xf32> -> vector<168x28xf32>
    %13 = arith.addf %8, %12 : vector<168x28xf32>
    %c2 = arith.constant 2 : index
    %c0_10 = arith.constant 0 : index
    %c0_11 = arith.constant 0 : index
    %14 = vector.load %arg2[%c2, %c0_10, %c0_11] : memref<5x168x32xf32, #tpu.memory_space<vmem>>, vector<1x168x32xf32>
    %15 = vector.shape_cast %14 : vector<1x168x32xf32> to vector<168x32xf32>
    %16 = vector.extract_strided_slice %1 {offsets = [0, 2], sizes = [32, 28], strides = [1, 1]} : vector<32x32xf32> to vector<32x28xf32>
    %cst_12 = arith.constant dense<0.000000e+00> : vector<168x28xf32>
    %17 = tpu.matmul %15, %16, %cst_12 {dimension_numbers = #tpu.dot_dimension_numbers<[1], [0], [0], [1], [0, 0, 1, 1], [], []>} : vector<168x32xf32>, vector<32x28xf32>, vector<168x28xf32> -> vector<168x28xf32>
    %18 = arith.addf %13, %17 : vector<168x28xf32>
    %c3 = arith.constant 3 : index
    %c0_13 = arith.constant 0 : index
    %c0_14 = arith.constant 0 : index
    %19 = vector.load %arg2[%c3, %c0_13, %c0_14] : memref<5x168x32xf32, #tpu.memory_space<vmem>>, vector<1x168x32xf32>
    %20 = vector.shape_cast %19 : vector<1x168x32xf32> to vector<168x32xf32>
    %21 = vector.extract_strided_slice %1 {offsets = [0, 3], sizes = [32, 28], strides = [1, 1]} : vector<32x32xf32> to vector<32x28xf32>
    %cst_15 = arith.constant dense<0.000000e+00> : vector<168x28xf32>
    %22 = tpu.matmul %20, %21, %cst_15 {dimension_numbers = #tpu.dot_dimension_numbers<[1], [0], [0], [1], [0, 0, 1, 1], [], []>} : vector<168x32xf32>, vector<32x28xf32>, vector<168x28xf32> -> vector<168x28xf32>
    %23 = arith.addf %18, %22 : vector<168x28xf32>
    %c4 = arith.constant 4 : index
    %c0_16 = arith.constant 0 : index
    %c0_17 = arith.constant 0 : index
    %24 = vector.load %arg2[%c4, %c0_16, %c0_17] : memref<5x168x32xf32, #tpu.memory_space<vmem>>, vector<1x168x32xf32>
    %25 = vector.shape_cast %24 : vector<1x168x32xf32> to vector<168x32xf32>
    %26 = vector.extract_strided_slice %1 {offsets = [0, 4], sizes = [32, 28], strides = [1, 1]} : vector<32x32xf32> to vector<32x28xf32>
    %cst_18 = arith.constant dense<0.000000e+00> : vector<168x28xf32>
    %27 = tpu.matmul %25, %26, %cst_18 {dimension_numbers = #tpu.dot_dimension_numbers<[1], [0], [0], [1], [0, 0, 1, 1], [], []>} : vector<168x32xf32>, vector<32x28xf32>, vector<168x28xf32> -> vector<168x28xf32>
    %28 = arith.addf %23, %27 : vector<168x28xf32>
    %cst_19 = arith.constant 0.000000e+00 : f32
    %29 = vector.broadcast %cst_19 : f32 to vector<168x28xf32>
    %30 = arith.maximumf %28, %29 : vector<168x28xf32>
    %c0_20 = arith.constant 0 : index
    %c0_21 = arith.constant 0 : index
    %31 = vector.load %arg4[%c0_20, %c0_21] : memref<84x168xf32, #tpu.memory_space<vmem>>, vector<84x168xf32>
    %cst_22 = arith.constant dense<0.000000e+00> : vector<84x28xf32>
    %32 = tpu.matmul %31, %30, %cst_22 {dimension_numbers = #tpu.dot_dimension_numbers<[1], [0], [0], [1], [0, 0, 1, 1], [], []>} : vector<84x168xf32>, vector<168x28xf32>, vector<84x28xf32> -> vector<84x28xf32>
    %c0_23 = arith.constant 0 : index
    %c0_24 = arith.constant 0 : index
    %33 = vector.load %arg5[%c0_23, %c0_24] : memref<84x168xf32, #tpu.memory_space<vmem>>, vector<84x168xf32>
    %cst_25 = arith.constant dense<0.000000e+00> : vector<84x28xf32>
    %34 = tpu.matmul %33, %30, %cst_25 {dimension_numbers = #tpu.dot_dimension_numbers<[1], [0], [0], [1], [0, 0, 1, 1], [], []>} : vector<84x168xf32>, vector<168x28xf32>, vector<84x28xf32> -> vector<84x28xf32>
    %35 = arith.maximumf %32, %34 : vector<84x28xf32>
    %c0_26 = arith.constant 0 : index
    %c0_27 = arith.constant 0 : index
    %36 = vector.load %arg6[%c0_26, %c0_27] : memref<28x14xf32, #tpu.memory_space<vmem>>, vector<28x14xf32>
    %cst_28 = arith.constant dense<0.000000e+00> : vector<84x14xf32>
    %37 = tpu.matmul %35, %36, %cst_28 {dimension_numbers = #tpu.dot_dimension_numbers<[1], [0], [0], [1], [0, 0, 1, 1], [], []>} : vector<84x28xf32>, vector<28x14xf32>, vector<84x14xf32> -> vector<84x14xf32>
    %c0_29 = arith.constant 0 : index
    %c0_30 = arith.constant 0 : index
    %38 = vector.load %arg7[%c0_29, %c0_30] : memref<28x14xf32, #tpu.memory_space<vmem>>, vector<28x14xf32>
    %cst_31 = arith.constant dense<0.000000e+00> : vector<84x14xf32>
    %39 = tpu.matmul %35, %38, %cst_31 {dimension_numbers = #tpu.dot_dimension_numbers<[1], [0], [0], [1], [0, 0, 1, 1], [], []>} : vector<84x28xf32>, vector<28x14xf32>, vector<84x14xf32> -> vector<84x14xf32>
    %40 = arith.maximumf %37, %39 : vector<84x14xf32>
    %c0_32 = arith.constant 0 : index
    %c0_33 = arith.constant 0 : index
    %41 = vector.load %arg9[%c0_32, %c0_33] : memref<160x1xf32, #tpu.memory_space<vmem>>, vector<160x1xf32>
    %c0_34 = arith.constant 0 : index
    %c0_35 = arith.constant 0 : index
    %c0_36 = arith.constant 0 : index
    %42 = vector.load %arg8[%c0_34, %c0_35, %c0_36] : memref<5x160x84xf32, #tpu.memory_space<vmem>>, vector<1x160x84xf32>
    %43 = vector.shape_cast %42 : vector<1x160x84xf32> to vector<160x84xf32>
    %44 = vector.extract_strided_slice %40 {offsets = [0, 0], sizes = [84, 10], strides = [1, 1]} : vector<84x14xf32> to vector<84x10xf32>
    %cst_37 = arith.constant dense<0.000000e+00> : vector<160x10xf32>
    %45 = tpu.matmul %43, %44, %cst_37 {dimension_numbers = #tpu.dot_dimension_numbers<[1], [0], [0], [1], [0, 0, 1, 1], [], []>} : vector<160x84xf32>, vector<84x10xf32>, vector<160x10xf32> -> vector<160x10xf32>
    %46 = vector.broadcast %41 : vector<160x1xf32> to vector<160x10xf32>
    %47 = arith.addf %46, %45 : vector<160x10xf32>
    %c1_38 = arith.constant 1 : index
    %c0_39 = arith.constant 0 : index
    %c0_40 = arith.constant 0 : index
    %48 = vector.load %arg8[%c1_38, %c0_39, %c0_40] : memref<5x160x84xf32, #tpu.memory_space<vmem>>, vector<1x160x84xf32>
    %49 = vector.shape_cast %48 : vector<1x160x84xf32> to vector<160x84xf32>
    %50 = vector.extract_strided_slice %40 {offsets = [0, 1], sizes = [84, 10], strides = [1, 1]} : vector<84x14xf32> to vector<84x10xf32>
    %cst_41 = arith.constant dense<0.000000e+00> : vector<160x10xf32>
    %51 = tpu.matmul %49, %50, %cst_41 {dimension_numbers = #tpu.dot_dimension_numbers<[1], [0], [0], [1], [0, 0, 1, 1], [], []>} : vector<160x84xf32>, vector<84x10xf32>, vector<160x10xf32> -> vector<160x10xf32>
    %52 = arith.addf %47, %51 : vector<160x10xf32>
    %c2_42 = arith.constant 2 : index
    %c0_43 = arith.constant 0 : index
    %c0_44 = arith.constant 0 : index
    %53 = vector.load %arg8[%c2_42, %c0_43, %c0_44] : memref<5x160x84xf32, #tpu.memory_space<vmem>>, vector<1x160x84xf32>
    %54 = vector.shape_cast %53 : vector<1x160x84xf32> to vector<160x84xf32>
    %55 = vector.extract_strided_slice %40 {offsets = [0, 2], sizes = [84, 10], strides = [1, 1]} : vector<84x14xf32> to vector<84x10xf32>
    %cst_45 = arith.constant dense<0.000000e+00> : vector<160x10xf32>
    %56 = tpu.matmul %54, %55, %cst_45 {dimension_numbers = #tpu.dot_dimension_numbers<[1], [0], [0], [1], [0, 0, 1, 1], [], []>} : vector<160x84xf32>, vector<84x10xf32>, vector<160x10xf32> -> vector<160x10xf32>
    %57 = arith.addf %52, %56 : vector<160x10xf32>
    %c3_46 = arith.constant 3 : index
    %c0_47 = arith.constant 0 : index
    %c0_48 = arith.constant 0 : index
    %58 = vector.load %arg8[%c3_46, %c0_47, %c0_48] : memref<5x160x84xf32, #tpu.memory_space<vmem>>, vector<1x160x84xf32>
    %59 = vector.shape_cast %58 : vector<1x160x84xf32> to vector<160x84xf32>
    %60 = vector.extract_strided_slice %40 {offsets = [0, 3], sizes = [84, 10], strides = [1, 1]} : vector<84x14xf32> to vector<84x10xf32>
    %cst_49 = arith.constant dense<0.000000e+00> : vector<160x10xf32>
    %61 = tpu.matmul %59, %60, %cst_49 {dimension_numbers = #tpu.dot_dimension_numbers<[1], [0], [0], [1], [0, 0, 1, 1], [], []>} : vector<160x84xf32>, vector<84x10xf32>, vector<160x10xf32> -> vector<160x10xf32>
    %62 = arith.addf %57, %61 : vector<160x10xf32>
    %c4_50 = arith.constant 4 : index
    %c0_51 = arith.constant 0 : index
    %c0_52 = arith.constant 0 : index
    %63 = vector.load %arg8[%c4_50, %c0_51, %c0_52] : memref<5x160x84xf32, #tpu.memory_space<vmem>>, vector<1x160x84xf32>
    %64 = vector.shape_cast %63 : vector<1x160x84xf32> to vector<160x84xf32>
    %65 = vector.extract_strided_slice %40 {offsets = [0, 4], sizes = [84, 10], strides = [1, 1]} : vector<84x14xf32> to vector<84x10xf32>
    %cst_53 = arith.constant dense<0.000000e+00> : vector<160x10xf32>
    %66 = tpu.matmul %64, %65, %cst_53 {dimension_numbers = #tpu.dot_dimension_numbers<[1], [0], [0], [1], [0, 0, 1, 1], [], []>} : vector<160x84xf32>, vector<84x10xf32>, vector<160x10xf32> -> vector<160x10xf32>
    %67 = arith.addf %62, %66 : vector<160x10xf32>
    %cst_54 = arith.constant 0.000000e+00 : f32
    %68 = vector.broadcast %cst_54 : f32 to vector<160x10xf32>
    %69 = arith.maximumf %67, %68 : vector<160x10xf32>
    %c0_55 = arith.constant 0 : index
    %c0_56 = arith.constant 0 : index
    %70 = vector.load %arg10[%c0_55, %c0_56] : memref<80x160xf32, #tpu.memory_space<vmem>>, vector<80x160xf32>
    %cst_57 = arith.constant dense<0.000000e+00> : vector<80x10xf32>
    %71 = tpu.matmul %70, %69, %cst_57 {dimension_numbers = #tpu.dot_dimension_numbers<[1], [0], [0], [1], [0, 0, 1, 1], [], []>} : vector<80x160xf32>, vector<160x10xf32>, vector<80x10xf32> -> vector<80x10xf32>
    %c0_58 = arith.constant 0 : index
    %c0_59 = arith.constant 0 : index
    %72 = vector.load %arg11[%c0_58, %c0_59] : memref<80x160xf32, #tpu.memory_space<vmem>>, vector<80x160xf32>
    %cst_60 = arith.constant dense<0.000000e+00> : vector<80x10xf32>
    %73 = tpu.matmul %72, %69, %cst_60 {dimension_numbers = #tpu.dot_dimension_numbers<[1], [0], [0], [1], [0, 0, 1, 1], [], []>} : vector<80x160xf32>, vector<160x10xf32>, vector<80x10xf32> -> vector<80x10xf32>
    %74 = arith.maximumf %71, %73 : vector<80x10xf32>
    %c0_61 = arith.constant 0 : index
    %c0_62 = arith.constant 0 : index
    %75 = vector.load %arg12[%c0_61, %c0_62] : memref<10x5xf32, #tpu.memory_space<vmem>>, vector<10x5xf32>
    %cst_63 = arith.constant dense<0.000000e+00> : vector<80x5xf32>
    %76 = tpu.matmul %74, %75, %cst_63 {dimension_numbers = #tpu.dot_dimension_numbers<[1], [0], [0], [1], [0, 0, 1, 1], [], []>} : vector<80x10xf32>, vector<10x5xf32>, vector<80x5xf32> -> vector<80x5xf32>
    %c0_64 = arith.constant 0 : index
    %c0_65 = arith.constant 0 : index
    %77 = vector.load %arg13[%c0_64, %c0_65] : memref<10x5xf32, #tpu.memory_space<vmem>>, vector<10x5xf32>
    %cst_66 = arith.constant dense<0.000000e+00> : vector<80x5xf32>
    %78 = tpu.matmul %74, %77, %cst_66 {dimension_numbers = #tpu.dot_dimension_numbers<[1], [0], [0], [1], [0, 0, 1, 1], [], []>} : vector<80x10xf32>, vector<10x5xf32>, vector<80x5xf32> -> vector<80x5xf32>
    %79 = arith.maximumf %76, %78 : vector<80x5xf32>
    %80 = vector.extract_strided_slice %79 {offsets = [0, 0], sizes = [80, 1], strides = [1, 1]} : vector<80x5xf32> to vector<80x1xf32>
    %c0_67 = arith.constant 0 : index
    %c0_68 = arith.constant 0 : index
    %c0_69 = arith.constant 0 : index
    %81 = vector.load %arg14[%c0_67, %c0_68, %c0_69] : memref<5x80x120xf32, #tpu.memory_space<vmem>>, vector<1x80x120xf32>
    %82 = vector.shape_cast %81 : vector<1x80x120xf32> to vector<80x120xf32>
    %83 = vector.broadcast %80 : vector<80x1xf32> to vector<80x120xf32>
    %84 = arith.mulf %83, %82 : vector<80x120xf32>
    %85 = vector.extract_strided_slice %79 {offsets = [0, 1], sizes = [80, 1], strides = [1, 1]} : vector<80x5xf32> to vector<80x1xf32>
    %c1_70 = arith.constant 1 : index
    %c0_71 = arith.constant 0 : index
    %c0_72 = arith.constant 0 : index
    %86 = vector.load %arg14[%c1_70, %c0_71, %c0_72] : memref<5x80x120xf32, #tpu.memory_space<vmem>>, vector<1x80x120xf32>
    %87 = vector.shape_cast %86 : vector<1x80x120xf32> to vector<80x120xf32>
    %88 = vector.broadcast %85 : vector<80x1xf32> to vector<80x120xf32>
    %89 = arith.mulf %88, %87 : vector<80x120xf32>
    %90 = arith.addf %84, %89 : vector<80x120xf32>
    %91 = vector.extract_strided_slice %79 {offsets = [0, 2], sizes = [80, 1], strides = [1, 1]} : vector<80x5xf32> to vector<80x1xf32>
    %c2_73 = arith.constant 2 : index
    %c0_74 = arith.constant 0 : index
    %c0_75 = arith.constant 0 : index
    %92 = vector.load %arg14[%c2_73, %c0_74, %c0_75] : memref<5x80x120xf32, #tpu.memory_space<vmem>>, vector<1x80x120xf32>
    %93 = vector.shape_cast %92 : vector<1x80x120xf32> to vector<80x120xf32>
    %94 = vector.broadcast %91 : vector<80x1xf32> to vector<80x120xf32>
    %95 = arith.mulf %94, %93 : vector<80x120xf32>
    %96 = arith.addf %90, %95 : vector<80x120xf32>
    %97 = vector.extract_strided_slice %79 {offsets = [0, 3], sizes = [80, 1], strides = [1, 1]} : vector<80x5xf32> to vector<80x1xf32>
    %c3_76 = arith.constant 3 : index
    %c0_77 = arith.constant 0 : index
    %c0_78 = arith.constant 0 : index
    %98 = vector.load %arg14[%c3_76, %c0_77, %c0_78] : memref<5x80x120xf32, #tpu.memory_space<vmem>>, vector<1x80x120xf32>
    %99 = vector.shape_cast %98 : vector<1x80x120xf32> to vector<80x120xf32>
    %100 = vector.broadcast %97 : vector<80x1xf32> to vector<80x120xf32>
    %101 = arith.mulf %100, %99 : vector<80x120xf32>
    %102 = arith.addf %96, %101 : vector<80x120xf32>
    %103 = vector.extract_strided_slice %79 {offsets = [0, 4], sizes = [80, 1], strides = [1, 1]} : vector<80x5xf32> to vector<80x1xf32>
    %c4_79 = arith.constant 4 : index
    %c0_80 = arith.constant 0 : index
    %c0_81 = arith.constant 0 : index
    %104 = vector.load %arg14[%c4_79, %c0_80, %c0_81] : memref<5x80x120xf32, #tpu.memory_space<vmem>>, vector<1x80x120xf32>
    %105 = vector.shape_cast %104 : vector<1x80x120xf32> to vector<80x120xf32>
    %106 = vector.broadcast %103 : vector<80x1xf32> to vector<80x120xf32>
    %107 = arith.mulf %106, %105 : vector<80x120xf32>
    %108 = arith.addf %102, %107 : vector<80x120xf32>
    %cst_82 = arith.constant 1.000000e+00 : f32
    %109 = vector.broadcast %cst_82 : f32 to vector<1x80xf32>
    %cst_83 = arith.constant dense<0.000000e+00> : vector<1x120xf32>
    %110 = tpu.matmul %109, %108, %cst_83 {dimension_numbers = #tpu.dot_dimension_numbers<[1], [0], [0], [1], [0, 0, 1, 1], [], []>} : vector<1x80xf32>, vector<80x120xf32>, vector<1x120xf32> -> vector<1x120xf32>
    %c0_84 = arith.constant 0 : index
    %c0_85 = arith.constant 0 : index
    %111 = vector.load %arg15[%c0_84, %c0_85] : memref<1x120xf32, #tpu.memory_space<vmem>>, vector<1x120xf32>
    %112 = arith.addf %110, %111 : vector<1x120xf32>
    %cst_86 = arith.constant 0.000000e+00 : f32
    %113 = vector.broadcast %cst_86 : f32 to vector<1x120xf32>
    %114 = arith.maximumf %112, %113 : vector<1x120xf32>
    %c0_87 = arith.constant 0 : index
    %c0_88 = arith.constant 0 : index
    %115 = vector.load %arg16[%c0_87, %c0_88] : memref<120x84xf32, #tpu.memory_space<vmem>>, vector<120x84xf32>
    %cst_89 = arith.constant dense<0.000000e+00> : vector<1x84xf32>
    %116 = tpu.matmul %114, %115, %cst_89 {dimension_numbers = #tpu.dot_dimension_numbers<[1], [0], [0], [1], [0, 0, 1, 1], [], []>} : vector<1x120xf32>, vector<120x84xf32>, vector<1x84xf32> -> vector<1x84xf32>
    %c0_90 = arith.constant 0 : index
    %c0_91 = arith.constant 0 : index
    %117 = vector.load %arg17[%c0_90, %c0_91] : memref<1x84xf32, #tpu.memory_space<vmem>>, vector<1x84xf32>
    %118 = arith.addf %116, %117 : vector<1x84xf32>
    %cst_92 = arith.constant 0.000000e+00 : f32
    %119 = vector.broadcast %cst_92 : f32 to vector<1x84xf32>
    %120 = arith.maximumf %118, %119 : vector<1x84xf32>
    %c0_93 = arith.constant 0 : index
    %c0_94 = arith.constant 0 : index
    %121 = vector.load %arg18[%c0_93, %c0_94] : memref<84x10xf32, #tpu.memory_space<vmem>>, vector<84x10xf32>
    %cst_95 = arith.constant dense<0.000000e+00> : vector<1x10xf32>
    %122 = tpu.matmul %120, %121, %cst_95 {dimension_numbers = #tpu.dot_dimension_numbers<[1], [0], [0], [1], [0, 0, 1, 1], [], []>} : vector<1x84xf32>, vector<84x10xf32>, vector<1x10xf32> -> vector<1x10xf32>
    %c0_96 = arith.constant 0 : index
    %c0_97 = arith.constant 0 : index
    %123 = vector.load %arg19[%c0_96, %c0_97] : memref<1x10xf32, #tpu.memory_space<vmem>>, vector<1x10xf32>
    %124 = arith.addf %122, %123 : vector<1x10xf32>
    %cst_98 = arith.constant dense<0xFF800000> : vector<1xf32>
    %125 = vector.multi_reduction <maximumf>, %124, %cst_98 [1] : vector<1x10xf32> to vector<1xf32>
    %126 = vector.shape_cast %125 : vector<1xf32> to vector<1x1xf32>
    %127 = vector.broadcast %126 : vector<1x1xf32> to vector<1x10xf32>
    %128 = arith.subf %124, %127 : vector<1x10xf32>
    %129 = math.exp %128 : vector<1x10xf32>
    %cst_99 = arith.constant dense<0.000000e+00> : vector<1xf32>
    %130 = vector.multi_reduction <add>, %129, %cst_99 [1] : vector<1x10xf32> to vector<1xf32>
    %131 = vector.shape_cast %130 : vector<1xf32> to vector<1x1xf32>
    %132 = tpu.reciprocal %131 {approx = true} : vector<1x1xf32> -> vector<1x1xf32>
    %133 = vector.broadcast %132 : vector<1x1xf32> to vector<1x10xf32>
    %134 = arith.mulf %129, %133 : vector<1x10xf32>
    %c0_100 = arith.constant 0 : index
    %c0_101 = arith.constant 0 : index
    %c0_102 = arith.constant 0 : index
    %135 = vector.load %arg20[%c0_100, %c0_101, %c0_102] : memref<1x1x10xf32, #tpu.memory_space<vmem>>, vector<1x1x10xf32>
    %136 = vector.shape_cast %135 : vector<1x1x10xf32> to vector<1x10xf32>
    %137 = vector.shape_cast %134 : vector<1x10xf32> to vector<1x1x10xf32>
    tpu.vector_store %arg20[%c0_100, %c0_101, %c0_102], %137 {strides = array<i32>} : memref<1x1x10xf32, #tpu.memory_space<vmem>>, vector<1x1x10xf32>,
    return
  }
  func.func @transform_0(%arg0: i32) -> (i32, i32, i32) {
    %c0_i32 = arith.constant 0 : i32
    %c0_i32_0 = arith.constant 0 : i32
    %c0_i32_1 = arith.constant 0 : i32
    return %arg0, %c0_i32, %c0_i32_0 : i32, i32, i32
  }
  func.func @transform_1(%arg0: i32) -> (i32, i32, i32) {
    %c0_i32 = arith.constant 0 : i32
    %c0_i32_0 = arith.constant 0 : i32
    %c0_i32_1 = arith.constant 0 : i32
    %c0_i32_2 = arith.constant 0 : i32
    return %c0_i32, %c0_i32_0, %c0_i32_1 : i32, i32, i32
  }
  func.func @transform_2(%arg0: i32) -> (i32, i32) {
    %c0_i32 = arith.constant 0 : i32
    %c0_i32_0 = arith.constant 0 : i32
    %c0_i32_1 = arith.constant 0 : i32
    return %c0_i32, %c0_i32_0 : i32, i32
  }
  func.func @transform_3(%arg0: i32) -> (i32, i32) {
    %c0_i32 = arith.constant 0 : i32
    %c0_i32_0 = arith.constant 0 : i32
    %c0_i32_1 = arith.constant 0 : i32
    return %c0_i32, %c0_i32_0 : i32, i32
  }
  func.func @transform_4(%arg0: i32) -> (i32, i32) {
    %c0_i32 = arith.constant 0 : i32
    %c0_i32_0 = arith.constant 0 : i32
    %c0_i32_1 = arith.constant 0 : i32
    return %c0_i32, %c0_i32_0 : i32, i32
  }
  func.func @transform_5(%arg0: i32) -> (i32, i32) {
    %c0_i32 = arith.constant 0 : i32
    %c0_i32_0 = arith.constant 0 : i32
    %c0_i32_1 = arith.constant 0 : i32
    return %c0_i32, %c0_i32_0 : i32, i32
  }
  func.func @transform_6(%arg0: i32) -> (i32, i32) {
    %c0_i32 = arith.constant 0 : i32
    %c0_i32_0 = arith.constant 0 : i32
    %c0_i32_1 = arith.constant 0 : i32
    return %c0_i32, %c0_i32_0 : i32, i32
  }
  func.func @transform_7(%arg0: i32) -> (i32, i32, i32) {
    %c0_i32 = arith.constant 0 : i32
    %c0_i32_0 = arith.constant 0 : i32
    %c0_i32_1 = arith.constant 0 : i32
    %c0_i32_2 = arith.constant 0 : i32
    return %c0_i32, %c0_i32_0, %c0_i32_1 : i32, i32, i32
  }
  func.func @transform_8(%arg0: i32) -> (i32, i32) {
    %c0_i32 = arith.constant 0 : i32
    %c0_i32_0 = arith.constant 0 : i32
    %c0_i32_1 = arith.constant 0 : i32
    return %c0_i32, %c0_i32_0 : i32, i32
  }
  func.func @transform_9(%arg0: i32) -> (i32, i32) {
    %c0_i32 = arith.constant 0 : i32
    %c0_i32_0 = arith.constant 0 : i32
    %c0_i32_1 = arith.constant 0 : i32
    return %c0_i32, %c0_i32_0 : i32, i32
  }
  func.func @transform_10(%arg0: i32) -> (i32, i32) {
    %c0_i32 = arith.constant 0 : i32
    %c0_i32_0 = arith.constant 0 : i32
    %c0_i32_1 = arith.constant 0 : i32
    return %c0_i32, %c0_i32_0 : i32, i32
  }
  func.func @transform_11(%arg0: i32) -> (i32, i32) {
    %c0_i32 = arith.constant 0 : i32
    %c0_i32_0 = arith.constant 0 : i32
    %c0_i32_1 = arith.constant 0 : i32
    return %c0_i32, %c0_i32_0 : i32, i32
  }
  func.func @transform_12(%arg0: i32) -> (i32, i32) {
    %c0_i32 = arith.constant 0 : i32
    %c0_i32_0 = arith.constant 0 : i32
    %c0_i32_1 = arith.constant 0 : i32
    return %c0_i32, %c0_i32_0 : i32, i32
  }
  func.func @transform_13(%arg0: i32) -> (i32, i32, i32) {
    %c0_i32 = arith.constant 0 : i32
    %c0_i32_0 = arith.constant 0 : i32
    %c0_i32_1 = arith.constant 0 : i32
    %c0_i32_2 = arith.constant 0 : i32
    return %c0_i32, %c0_i32_0, %c0_i32_1 : i32, i32, i32
  }
  func.func @transform_14(%arg0: i32) -> (i32, i32) {
    %c0_i32 = arith.constant 0 : i32
    %c0_i32_0 = arith.constant 0 : i32
    %c0_i32_1 = arith.constant 0 : i32
    return %c0_i32, %c0_i32_0 : i32, i32
  }
  func.func @transform_15(%arg0: i32) -> (i32, i32) {
    %c0_i32 = arith.constant 0 : i32
    %c0_i32_0 = arith.constant 0 : i32
    %c0_i32_1 = arith.constant 0 : i32
    return %c0_i32, %c0_i32_0 : i32, i32
  }
  func.func @transform_16(%arg0: i32) -> (i32, i32) {
    %c0_i32 = arith.constant 0 : i32
    %c0_i32_0 = arith.constant 0 : i32
    %c0_i32_1 = arith.constant 0 : i32
    return %c0_i32, %c0_i32_0 : i32, i32
  }
  func.func @transform_17(%arg0: i32) -> (i32, i32) {
    %c0_i32 = arith.constant 0 : i32
    %c0_i32_0 = arith.constant 0 : i32
    %c0_i32_1 = arith.constant 0 : i32
    return %c0_i32, %c0_i32_0 : i32, i32
  }
  func.func @transform_18(%arg0: i32) -> (i32, i32) {
    %c0_i32 = arith.constant 0 : i32
    %c0_i32_0 = arith.constant 0 : i32
    %c0_i32_1 = arith.constant 0 : i32
    return %c0_i32, %c0_i32_0 : i32, i32
  }
  func.func @transform_19(%arg0: i32) -> (i32, i32, i32) {
    %c0_i32 = arith.constant 0 : i32
    %c0_i32_0 = arith.constant 0 : i32
    %c0_i32_1 = arith.constant 0 : i32
    return %arg0, %c0_i32, %c0_i32_0 : i32, i32, i32
  }
}

</mosaic_0001>

<bundles_post_ra>
// kernel: lenet5_apply.1
= control target key start
LH: loop header
LB: loop body
LE: loop exit
PB: predicated region body
PF: predicated region fallthrough
CT: control target
= control target key end

     0   :  { %s7589_s0 = inlined_call_operand.vmem [shape: f32[2,32,32], index: 0, kind: input, shape index: {}]   ;;  %s7590_s1 = inlined_call_operand.vmem [shape: f32[5,168,32], index: 1, kind: input, shape index: {}]   ;;  %s7591_s2 = inlined_call_operand.vmem [shape: f32[168,1], index: 2, kind: input, shape index: {}]   ;;  %s7592_s3 = inlined_call_operand.vmem [shape: f32[84,168], index: 3, kind: input, shape index: {}]   ;;  %s7593_s4 = inlined_call_operand.vmem [shape: f32[84,168], index: 4, kind: input, shape index: {}]   ;;  %s7594_s5 = inlined_call_operand.vmem [shape: f32[28,14], index: 5, kind: input, shape index: {}]   ;;  %s7595_s6 = inlined_call_operand.vmem [shape: f32[28,14], index: 6, kind: input, shape index: {}]   ;;  %s7596_s7 = inlined_call_operand.vmem [shape: f32[5,160,84], index: 7, kind: input, shape index: {}]   ;;  %s7597_s8 = inlined_call_operand.vmem [shape: f32[160,1], index: 8, kind: input, shape index: {}]   ;;  %s7598_s9 = inlined_call_operand.vmem [shape: f32[80,160], index: 9, kind: input, shape index: {}]   ;;  %s7599_s10 = inlined_call_operand.vmem [shape: f32[80,160], index: 10, kind: input, shape index: {}]   ;;  %s7600_s11 = inlined_call_operand.vmem [shape: f32[10,5], index: 11, kind: input, shape index: {}]   ;;  %s7601_s12 = inlined_call_operand.vmem [shape: f32[10,5], index: 12, kind: input, shape index: {}]   ;;  %s7602_s13 = inlined_call_operand.vmem [shape: f32[5,80,120], index: 13, kind: input, shape index: {}]   ;;  %s7603_s14 = inlined_call_operand.vmem [shape: f32[1,120], index: 14, kind: input, shape index: {}]   ;;  %s7604_s15 = inlined_call_operand.vmem [shape: f32[120,84], index: 15, kind: input, shape index: {}]   ;;  %s7605_s16 = inlined_call_operand.vmem [shape: f32[1,84], index: 16, kind: input, shape index: {}]   ;;  %s7606_s17 = inlined_call_operand.vmem [shape: f32[84,10], index: 17, kind: input, shape index: {}]   ;;  %s7607_s18 = inlined_call_operand.vmem [shape: f32[1,10], index: 18, kind: input, shape index: {}]   ;;  %s7608_s19 = inlined_call_operand.hbm [shape: f32[2,1,10], index: 19, kind: output, shape index: {}]  }
   0x1   :  { %7629 = sst [smem:[#allocation55_spill]] %s7589_s0 }
   0x2   :  { %7630 = sst [smem:[#allocation56_spill]] %s7590_s1 }
   0x3   :  { %7631 = sst [smem:[#allocation57_spill]] %s7591_s2 }
   0x4   :  { %7632 = sst [smem:[#allocation58_spill]] %s7592_s3 }
   0x5   :  { %7633 = sst [smem:[#allocation59_spill]] %s7593_s4 }
   0x6   :  { %7634 = sst [smem:[#allocation60_spill]] %s7594_s5 }
   0x7   :  { %24 = vsyncpa [#allocation3], 0 }
   0x8   :  { %26 = vsyncpa [#allocation3 + $0x1], 0  ;;  %s5303_s0 = smov 0   ;;  %s5305_s30 = smov 0  }
   0x9   :  { %s5307_s20 = smov 0   ;;  %s5309_s21 = smov 0  }
   0xa LB: > { %7635 = sst [smem:[#allocation5_spill]] %s5179_s0  ;;  %s5324_s1 = sadd.s32 4294967295, %s5191_s21   ;;  %s5191_s21 = sphi %s5309_s21, %s7797_s21   ;;  %s5187_s20 = sphi %s5307_s20, %s7799_s20   ;;  %s5183_s30 = sphi %s5305_s30, %s7801_s30   ;;  %s5179_s0 = sphi %s5303_s0, %s7800_s0  }
   0xb   : > { %7636 = sst [smem:[#allocation6_spill]] %s5187_s20  ;;  %s4378_s22 = sadd.s32 4294967294, %s5191_s21  }
   0xc   : > { %s5328_s2 = sadd.s32 1, %s5191_s21   ;;  %s443_s23 = sadd.s32 1, %s5187_s20 }
   0xd   : > { %7637 = sst [smem:[#allocation7_spill]] %s5328_s2  ;;  %s440_s24 = ssub.s32 %s5191_s21, %s5328_s2 }
   0xe   : > { %p453_p0 = scmp.ne.s32.totalorder %s5187_s20, %s5183_s30  ;;  %p441_p1 = scmp.eq.s32.totalorder %s440_s24, 0 }
   0xf   : > { %p454_p2 = scmp.eq.s32.totalorder %s5324_s1, 1  ;;  %p459_p3 = scmp.ne.s32.totalorder %s5183_s30, %s5179_s0 }
  0x10   : > { %p460_p4 = scmp.eq.s32.totalorder %s4378_s22, 1  ;;  %p4381_p7 = scmp.ge.s32.totalorder %s5191_s21, 1 }
  0x11   : > { %s5339_s25 = scalar_select %p441_p1, %s5187_s20, %s443_s23  }
  0x12   : > { %p5341_p5 = por %p454_p2, %p453_p0  ;;  %p5345_p6 = por %p460_p4, %p459_p3 }
  0x13   : > { %7638 = sst [smem:[#allocation8_spill]] %s5339_s25  ;;  %p540_p8 = scmp.lt.s32.totalorder %s5191_s21, 3 }
  0x14   : > { %s7640_s26 = scalar_select %p5345_p6, 1, 0 }
  0x15   : > { %p541_p9 = pnand %p4381_p7, %p540_p8 }
  0x16   : > { %7641 = sst [smem:[#allocation9_spill]] %s7640_s26 }
  0x17   : > { %544 = sbr.rel (%p541_p9) target bundleno = 2661 (0xa65), region = 96 }
  0x1c   : > { %p595_p10 = scmp.lt.s32.totalorder %s5324_s1, 1  ;;  %v7625_v0 = vmov 0   ;;  %s7642_s23 = sld [smem:[#allocation55_spill]]  ;;  %vm646_vm0 = vcmask 261120   ;;  %vm1755_vm1 = vcmask 326656   ;;  %vm2093_vm2 = vcmask 1043456  }
  0x1d   : > { %4982 = vset.pattern.permute.xlu2 %v7625_v0  ;;  %4984 = vset.pattern.permute.xlu1 %v7625_v0  ;;  %s7620_s25 = smov 127   ;;  %s7618_s20 = smov 126   ;;  %vm2059_vm3 = vcmask 228352   ;;  %vm2255_vm4 = vcmask 687104   ;;  %vm3725_vm5 = vcmask 1041408   ;;  %vm3694_vm6 = vcmask 80896  }
  0x1e   : > { %s596_s27 = scalar_select %p595_p10, %s5324_s1, 1  ;;  %4983 = vset.pattern.permute.xlu0 %v7625_v0  ;;  %vm4193_vm7 = vcmask 654336   ;;  %vm4234_vm8 = vcmask 982016   ;;  %vm4297_vm9 = vcmask 73728  }
  0x1f   : > { %s7616_s2 = smov 125   ;;  %s7643_s29 = sld [smem:[#allocation56_spill]] }
  0x20   : > { %s4892_s28 = sshll.u32 %s596_s27, 5  ;;  %s7644_s27 = sld [smem:[#allocation57_spill]] }
  0x21   : > { %s7736_s4 = sld [smem:[#allocation59_spill]]  ;;  %s7739_s0 = smov 125  }
  0x22   : > { %s599_s24 = scalar_lea.vmem %s7642_s23, %s4892_s28  ;;  %s7623_s28 = smov 124  }
  0x23   : > { %v603_v1 = vld [vmem:[%s599_s24 + $0x18] sm:$0xff]  ;;  %v602_v2 = vld [vmem:[%s599_s24 + $0x10] sm:$0xff]  ;;  %v600_v3 = vld [vmem:[%s599_s24] sm:$0xff]  ;;  %s7730_s23 = sld [smem:[#allocation58_spill]]  ;;  %s7741_s22 = smov 124  }
  0x24   : > { %722 = vmatpush.msra.mxu0 %v603_v1  ;;  %v4952_v4 = vpack.i.bf16 %v602_v2, %v603_v1  ;;  %v601_v5 = vld [vmem:[%s599_s24 + $0x8] sm:$0xff]  ;;  %s7737_s5 = sld [smem:[#allocation60_spill]]  ;;  %s4319_s24 = scalar_lea.hbm %s7608_s19, %s5324_s1 }
  0x25   : > { %v4962_v6 = vpack.i.bf16 %v600_v3, %v601_v5  ;;  %v625_v7 = vld [vmem:[%s7643_s29] sm:$0xff]  ;;  %v626_v8 = vld [vmem:[%s7643_s29 + $0x8] sm:$0xff]  ;;  %v627_v10 = vld [vmem:[%s7643_s29 + $0x10] sm:$0xff]  ;;  %s5149_s1 = scalar_lea.hbm %s7608_s19, 2 }
  0x26   : > { %4953 = vrot.lane.b32.xlu1 %v4952_v4, %s7620_s25  ;;  %4943 = vrot.lane.b32.xlu0 %v4952_v4, %s7618_s20  ;;  %v619_v9 = vld [vmem:[%s7644_s27 + $0x78] sm:$0xff]  ;;  %v618_v11 = vld [vmem:[%s7644_s27 + $0x70] sm:$0xff] }
  0x27   : > { %723 = vmatpush.msra.mxu0 %v602_v2  ;;  %4963 = vrot.lane.b32.xlu2 %v4962_v6, %s7616_s2  ;;  %v617_v12 = vld [vmem:[%s7644_s27 + $0x68] sm:$0xff]  ;;  %v616_v13 = vld [vmem:[%s7644_s27 + $0x60] sm:$0xff]  ;;  %v628_v14 = vld [vmem:[%s7643_s29 + $0x18] sm:$0xff] }
  0x28   : > { %v613_v15 = vld [vmem:[%s7644_s27 + $0x48] sm:$0xff]  ;;  %v615_v16 = vld [vmem:[%s7644_s27 + $0x58] sm:$0xff]  ;;  %v614_v17 = vld [vmem:[%s7644_s27 + $0x50] sm:$0xff] }
  0x29   : > { %724 = vmatpush.msra.mxu0 %v601_v5  ;;  %v629_v18 = vld [vmem:[%s7643_s29 + $0x20] sm:$0xff]  ;;  %v610_v19 = vld [vmem:[%s7644_s27 + $0x30] sm:$0xff]  ;;  %v611_v21 = vld [vmem:[%s7644_s27 + $0x38] sm:$0xff] }
  0x2a   : > { %v612_v20 = vld [vmem:[%s7644_s27 + $0x40] sm:$0xff]  ;;  %v630_v22 = vld [vmem:[%s7643_s29 + $0x28] sm:$0xff]  ;;  %v607_v23 = vld [vmem:[%s7644_s27 + $0x18] sm:$0xff] }
  0x2b   : > { %725 = vmatpush.msra.mxu0 %v600_v3  ;;  %v609_v24 = vld [vmem:[%s7644_s27 + $0x28] sm:$0xff]  ;;  %v608_v25 = vld [vmem:[%s7644_s27 + $0x20] sm:$0xff]  ;;  %v631_v26 = vld [vmem:[%s7643_s29 + $0x30] sm:$0xff] }
  0x2c   : > { %4384 = vmatmul.msk.f32.vlgmr.msra.gmra.mxu0 %vm646_vm0, %v625_v7  ;;  %v604_v27 = vld [vmem:[%s7644_s27] sm:$0xff]  ;;  %v606_v28 = vld [vmem:[%s7644_s27 + $0x10] sm:$0xff]  ;;  %v605_v29 = vld [vmem:[%s7644_s27 + $0x8] sm:$0xff] }
  0x2d   : > { %v632_v30 = vld [vmem:[%s7643_s29 + $0x38] sm:$0xff]  ;;  %v633_v31 = vld [vmem:[%s7643_s29 + $0x40] sm:$0xff]  ;;  %v634_v32 = vld [vmem:[%s7643_s29 + $0x48] sm:$0xff] }
  0x2e   : > { %4948 = vrot.lane.b32.xlu0 %v4952_v4, %s7616_s2  ;;  %4958 = vrot.lane.b32.xlu1 %v4962_v6, %s7618_s20  ;;  %v635_v33 = vld [vmem:[%s7643_s29 + $0x50] sm:$0xff]  ;;  %v636_v34 = vld [vmem:[%s7643_s29 + $0x58] sm:$0xff]  ;;  %s7738_s2 = smov 127  }
  0x2f   : > { %4968 = vrot.lane.b32.xlu2 %v4962_v6, %s7620_s25  ;;  %v637_v35 = vld [vmem:[%s7643_s29 + $0x60] sm:$0xff]  ;;  %v638_v37 = vld [vmem:[%s7643_s29 + $0x68] sm:$0xff]  ;;  %v639_v41 = vld [vmem:[%s7643_s29 + $0x70] sm:$0xff]  ;;  %s7740_s25 = smov 126  }
  0x30   : > { %v624_v38 = vld [vmem:[%s7644_s27 + $0xa0] sm:$0xff]  ;;  %v621_v48 = vld [vmem:[%s7644_s27 + $0x88] sm:$0xff]  ;;  %v640_v53 = vld [vmem:[%s7643_s29 + $0x78] sm:$0xff] }
  0x31   : > { %v4405_v50 = vld [vmem:[%s7643_s29 + $0xa8] sm:$0xff]  ;;  %v4447_v58 = vld [vmem:[%s7643_s29 + $0x150] sm:$0xff]  ;;  %v623_v61 = vld [vmem:[%s7644_s27 + $0x98] sm:$0xff] }
  0x32   : > { %v622_v60 = vld [vmem:[%s7644_s27 + $0x90] sm:$0xff]  ;;  %v4489_v1 = vld [vmem:[%s7643_s29 + $0x1f8] sm:$0xff] }
  0x33   : > { %v4406_v63 = vld [vmem:[%s7643_s29 + $0xb0] sm:$0xff]  ;;  %v4448_v7 = vld [vmem:[%s7643_s29 + $0x158] sm:$0xff] }
  0x34   : > { %4385 = vmatmul.msk.f32.gmra.mxu0 %vm646_vm0, %v626_v8 }
  0x36   : > { %4973 = vrot.lane.b32.xlu0 %v4952_v4, %s7623_s28  ;;  %4978 = vrot.lane.b32.xlu1 %v4962_v6, %s7623_s28  ;;  %v641_v4 = vld [vmem:[%s7643_s29 + $0x80] sm:$0xff] }
  0x37   : > { %867 = vperm.xlu2 %4982, %v619_v9   ;;  %v620_v9 = vld [vmem:[%s7644_s27 + $0x80] sm:$0xff] }
  0x3c   : > { %4386 = vmatmul.msk.f32.gmra.mxu0 %vm646_vm0, %v627_v10 }
  0x3e   : > { %862 = vperm.xlu0 %4983, %v618_v11   ;;  %857 = vperm.xlu1 %4984, %v617_v12   ;;  %v4407_v11 = vld [vmem:[%s7643_s29 + $0xb8] sm:$0xff]  ;;  %v4490_v12 = vld [vmem:[%s7643_s29 + $0x200] sm:$0xff] }
  0x3f   : > { %852 = vperm.xlu2 %4982, %v616_v13  }
  0x44   : > { %4387 = vmatmul.msk.f32.gmra.mxu0 %vm646_vm0, %v628_v14 }
  0x46   : > { %837 = vperm.xlu0 %4983, %v613_v15   ;;  %847 = vperm.xlu1 %4984, %v615_v16   ;;  %v642_v15 = vld [vmem:[%s7643_s29 + $0x88] sm:$0xff]  ;;  %v4449_v16 = vld [vmem:[%s7643_s29 + $0x160] sm:$0xff] }
  0x47   : > { %842 = vperm.xlu2 %4982, %v614_v17   ;;  %v4408_v17 = vld [vmem:[%s7643_s29 + $0xc0] sm:$0xff] }
  0x4c   : > { %4388 = vmatmul.msk.f32.gmra.mxu0 %vm646_vm0, %v629_v18  ;;  %v4491_v18 = vld [vmem:[%s7643_s29 + $0x208] sm:$0xff] }
  0x4e   : > { %822 = vperm.xlu0 %4983, %v610_v19   ;;  %832 = vperm.xlu1 %4984, %v612_v20   ;;  %v643_v20 = vld [vmem:[%s7643_s29 + $0x90] sm:$0xff] }
  0x4f   : > { %827 = vperm.xlu2 %4982, %v611_v21   ;;  %v4450_v21 = vld [vmem:[%s7643_s29 + $0x168] sm:$0xff] }
  0x54   : > { %4389 = vmatmul.msk.f32.gmra.mxu0 %vm646_vm0, %v630_v22  ;;  %v4409_v22 = vld [vmem:[%s7643_s29 + $0xc8] sm:$0xff] }
  0x56   : > { %807 = vperm.xlu0 %4983, %v607_v23   ;;  %817 = vperm.xlu1 %4984, %v609_v24   ;;  %v4492_v23 = vld [vmem:[%s7643_s29 + $0x210] sm:$0xff] }
  0x57   : > { %812 = vperm.xlu2 %4982, %v608_v25   ;;  %v644_v25 = vld [vmem:[%s7643_s29 + $0x98] sm:$0xff] }
  0x5c   : > { %4390 = vmatmul.msk.f32.gmra.mxu0 %vm646_vm0, %v631_v26  ;;  %v4451_v26 = vld [vmem:[%s7643_s29 + $0x170] sm:$0xff] }
  0x5e   : > { %792 = vperm.xlu0 %4983, %v604_v27   ;;  %802 = vperm.xlu1 %4984, %v606_v28   ;;  %v4410_v27 = vld [vmem:[%s7643_s29 + $0xd0] sm:$0xff]  ;;  %v4493_v28 = vld [vmem:[%s7643_s29 + $0x218] sm:$0xff] }
  0x5f   : > { %797 = vperm.xlu2 %4982, %v605_v29  }
  0x64   : > { %4391 = vmatmul.msk.f32.gmra.mxu0 %vm646_vm0, %v632_v30  ;;  %v645_v30 = vld [vmem:[%s7643_s29 + $0xa0] sm:$0xff] }
  0x66   : > { %892 = vperm.xlu1 %4984, %v624_v38   ;;  %882 = vperm.xlu0 %4983, %v622_v60   ;;  %v4495_v38 = vld [vmem:[%s7643_s29 + $0x228] sm:$0xff] }
  0x67   : > { %887 = vperm.xlu2 %4982, %v623_v61   ;;  %v4536_v60 = vld [vmem:[%s7643_s29 + $0x2c8] sm:$0xff] }
  0x68   : > { %v4458_v61 = vld [vmem:[%s7643_s29 + $0x1a8] sm:$0xff] }
  0x6c   : > { %4392 = vmatmul.msk.f32.gmra.mxu0 %vm646_vm0, %v633_v31  ;;  %v4452_v31 = vld [vmem:[%s7643_s29 + $0x178] sm:$0xff] }
  0x6e   : > { %877 = vperm.xlu1 %4984, %v621_v48   ;;  %v4497_v48 = vld [vmem:[%s7643_s29 + $0x238] sm:$0xff] }
  0x6f   : > { %872 = vperm.xlu2 %4982, %v620_v9   ;;  %v4460_v9 = vld [vmem:[%s7643_s29 + $0x1b8] sm:$0xff] }
  0x74   : > { %4393 = vmatmul.msk.f32.gmra.mxu0 %vm646_vm0, %v634_v32  ;;  %v4411_v32 = vld [vmem:[%s7643_s29 + $0xd8] sm:$0xff] }
  0x7c   : > { %4394 = vmatmul.msk.f32.gmra.mxu0 %vm646_vm0, %v635_v33  ;;  %v4494_v33 = vld [vmem:[%s7643_s29 + $0x220] sm:$0xff] }
  0x81   : > { %v4964_v36 = vpop.permute.xlu2 %4963 }
  0x82   : > { %v4965_v59 = vunpack.i.l.bf16 %v4964_v36  ;;  %v4966_v62 = vunpack.i.h.bf16 %v4964_v36  ;;  %v4453_v36 = vld [vmem:[%s7643_s29 + $0x180] sm:$0xff] }
  0x84   : > { %4395 = vmatmul.msk.f32.gmra.mxu0 %vm646_vm0, %v636_v34 }
  0x89   : > { %v4969_v46 = vpop.permute.xlu2 %4968 }
  0x8a   : > { %v4970_v47 = vunpack.i.l.bf16 %v4969_v46  ;;  %v4971_v49 = vunpack.i.h.bf16 %v4969_v46  ;;  %v4455_v46 = vld [vmem:[%s7643_s29 + $0x190] sm:$0xff] }
  0x8c   : > { %4396 = vmatmul.msk.f32.gmra.mxu0 %vm646_vm0, %v637_v35  ;;  %v4531_v35 = vld [vmem:[%s7643_s29 + $0x2a0] sm:$0xff] }
  0x94   : > { %4397 = vmatmul.msk.f32.gmra.mxu0 %vm646_vm0, %v638_v37  ;;  %v4412_v37 = vld [vmem:[%s7643_s29 + $0xe0] sm:$0xff] }
  0x98   : > { %v4954_v39 = vpop.permute.xlu1 %4953  ;;  %v4944_v40 = vpop.permute.xlu0 %4943 }
  0x99   : > { %v4955_v42 = vunpack.i.l.bf16 %v4954_v39  ;;  %v4956_v43 = vunpack.i.h.bf16 %v4954_v39  ;;  %v4945_v44 = vunpack.i.l.bf16 %v4944_v40  ;;  %v4946_v45 = vunpack.i.h.bf16 %v4944_v40  ;;  %v4532_v40 = vld [vmem:[%s7643_s29 + $0x2a8] sm:$0xff] }
  0x9b   : > { %1029 = vmatpush.msra.mxu1 %v4955_v42  ;;  %1227 = vmatpush.msra.mxu2 %v4945_v44  ;;  %v4413_v42 = vld [vmem:[%s7643_s29 + $0xe8] sm:$0xff] }
  0x9c   : > { %4398 = vmatmul.msk.f32.gmra.mxu0 %vm646_vm0, %v639_v41  ;;  %v4454_v41 = vld [vmem:[%s7643_s29 + $0x188] sm:$0xff] }
  0x9d   : > { %1030 = vmatpush.msra.mxu1 %v4956_v43  ;;  %1228 = vmatpush.msra.mxu2 %v4946_v45  ;;  %v4496_v43 = vld [vmem:[%s7643_s29 + $0x230] sm:$0xff] }
  0x9e   : > { %v4533_v45 = vld [vmem:[%s7643_s29 + $0x2b0] sm:$0xff] }
  0x9f   : > { %1031 = vmatpush.msra.mxu1 %v4970_v47  ;;  %v4414_v47 = vld [vmem:[%s7643_s29 + $0xf0] sm:$0xff] }
  0xa0   : > { %v4949_v51 = vpop.permute.xlu0 %4948  ;;  %v4959_v52 = vpop.permute.xlu1 %4958 }
  0xa1   : > { %1032 = vmatpush.msra.mxu1 %v4971_v49  ;;  %v4960_v54 = vunpack.i.l.bf16 %v4959_v52  ;;  %v4950_v55 = vunpack.i.l.bf16 %v4949_v51  ;;  %v4961_v56 = vunpack.i.h.bf16 %v4959_v52  ;;  %v4951_v57 = vunpack.i.h.bf16 %v4949_v51  ;;  %v4456_v51 = vld [vmem:[%s7643_s29 + $0x198] sm:$0xff] }
  0xa2   : > { %4426 = vmatmul.msk.f32.vlgmr.msra.gmra.mxu1 %vm646_vm0, %v4405_v50  ;;  %v4534_v50 = vld [vmem:[%s7643_s29 + $0x2b8] sm:$0xff] }
  0xa3   : > { %1229 = vmatpush.msra.mxu2 %v4960_v54  ;;  %1425 = vmatpush.msra.mxu3 %v4950_v55  ;;  %v4415_v52 = vld [vmem:[%s7643_s29 + $0xf8] sm:$0xff]  ;;  %v4535_v55 = vld [vmem:[%s7643_s29 + $0x2c0] sm:$0xff] }
  0xa4   : > { %4399 = vmatmul.msk.f32.gmra.mxu0 %vm646_vm0, %v640_v53  ;;  %v4498_v53 = vld [vmem:[%s7643_s29 + $0x240] sm:$0xff] }
  0xa5   : > { %1230 = vmatpush.msra.mxu2 %v4961_v56  ;;  %1426 = vmatpush.msra.mxu3 %v4951_v57  ;;  %v4457_v56 = vld [vmem:[%s7643_s29 + $0x1a0] sm:$0xff] }
  0xa6   : > { %4468 = vmatmul.msk.f32.vlgmr.msra.gmra.mxu2 %vm646_vm0, %v4447_v58  ;;  %v4416_v57 = vld [vmem:[%s7643_s29 + $0x100] sm:$0xff]  ;;  %v4499_v58 = vld [vmem:[%s7643_s29 + $0x248] sm:$0xff] }
  0xa7   : > { %1427 = vmatpush.msra.mxu3 %v4965_v59 }
  0xa8   : > { %v4974_v2 = vpop.permute.xlu0 %4973  ;;  %v4979_v8 = vpop.permute.xlu1 %4978 }
  0xa9   : > { %v5505_v3 = vpop.f32.mrf.mxu0  ;;  %1428 = vmatpush.msra.mxu3 %v4966_v62  ;;  %v4975_v5 = vunpack.i.l.bf16 %v4974_v2  ;;  %v4976_v6 = vunpack.i.h.bf16 %v4974_v2  ;;  %v4980_v10 = vunpack.i.l.bf16 %v4979_v8  ;;  %v4981_v13 = vunpack.i.h.bf16 %v4979_v8  ;;  %v4417_v62 = vld [vmem:[%s7643_s29 + $0x108] sm:$0xff]  ;;  %v4537_v2 = vld [vmem:[%s7643_s29 + $0x2d0] sm:$0xff]  ;;  %v4538_v8 = vld [vmem:[%s7643_s29 + $0x2d8] sm:$0xff] }
  0xaa   : > { %7645 = vst [vmem:[#allocation10_spill] sm:$0xff] %v5505_v3  ;;  %4427 = vmatmul.msk.f32.gmra.mxu1 %vm646_vm0, %v4406_v63  ;;  %4510 = vmatmul.msk.f32.vlgmr.msra.gmra.mxu3 %vm646_vm0, %v4489_v1  ;;  %v4500_v63 = vld [vmem:[%s7643_s29 + $0x250] sm:$0xff] }
  0xab   : > { %1623 = vmatpush.msrb.mxu0 %v4975_v5  ;;  %v4418_v5 = vld [vmem:[%s7643_s29 + $0x110] sm:$0xff] }
  0xac   : > { %4400 = vmatmul.msk.f32.gmra.mxu0 %vm646_vm0, %v641_v4  ;;  %v4459_v4 = vld [vmem:[%s7643_s29 + $0x1b0] sm:$0xff] }
  0xad   : > { %1624 = vmatpush.msrb.mxu0 %v4976_v6  ;;  %v4501_v6 = vld [vmem:[%s7643_s29 + $0x258] sm:$0xff] }
  0xae   : > { %4469 = vmatmul.msk.f32.gmra.mxu2 %vm646_vm0, %v4448_v7 }
  0xaf   : > { %1625 = vmatpush.msrb.mxu0 %v4980_v10  ;;  %v4419_v10 = vld [vmem:[%s7643_s29 + $0x118] sm:$0xff] }
  0xb1   : > { %v5526_v14 = vpop.f32.mrf.mxu0  ;;  %1626 = vmatpush.msrb.mxu0 %v4981_v13  ;;  %v4539_v13 = vld [vmem:[%s7643_s29 + $0x2e0] sm:$0xff] }
  0xb2   : > { %7646 = vst [vmem:[#allocation11_spill] sm:$0xff] %v5526_v14  ;;  %4428 = vmatmul.msk.f32.gmra.mxu1 %vm646_vm0, %v4407_v11  ;;  %4511 = vmatmul.msk.f32.gmra.mxu3 %vm646_vm0, %v4490_v12  ;;  %v4502_v11 = vld [vmem:[%s7643_s29 + $0x260] sm:$0xff] }
  0xb4   : > { %4401 = vmatmul.msk.f32.gmra.mxu0 %vm646_vm0, %v642_v15  ;;  %v4461_v15 = vld [vmem:[%s7643_s29 + $0x1c0] sm:$0xff] }
  0xb6   : > { %4470 = vmatmul.msk.f32.gmra.mxu2 %vm646_vm0, %v4449_v16  ;;  %v4420_v16 = vld [vmem:[%s7643_s29 + $0x120] sm:$0xff] }
  0xb9   : > { %v5544_v19 = vpop.f32.mrf.mxu0 }
  0xba   : > { %7647 = vst [vmem:[#allocation12_spill] sm:$0xff] %v5544_v19  ;;  %4429 = vmatmul.msk.f32.gmra.mxu1 %vm646_vm0, %v4408_v17  ;;  %4512 = vmatmul.msk.f32.gmra.mxu3 %vm646_vm0, %v4491_v18  ;;  %v4503_v17 = vld [vmem:[%s7643_s29 + $0x268] sm:$0xff] }
  0xbc   : > { %4402 = vmatmul.msk.f32.gmra.mxu0 %vm646_vm0, %v643_v20  ;;  %v4540_v20 = vld [vmem:[%s7643_s29 + $0x2e8] sm:$0xff] }
  0xbe   : > { %4471 = vmatmul.msk.f32.gmra.mxu2 %vm646_vm0, %v4450_v21  ;;  %v4462_v21 = vld [vmem:[%s7643_s29 + $0x1c8] sm:$0xff] }
  0xc1   : > { %v5562_v24 = vpop.f32.mrf.mxu0 }
  0xc2   : > { %7648 = vst [vmem:[#allocation13_spill] sm:$0xff] %v5562_v24  ;;  %4430 = vmatmul.msk.f32.gmra.mxu1 %vm646_vm0, %v4409_v22  ;;  %4513 = vmatmul.msk.f32.gmra.mxu3 %vm646_vm0, %v4492_v23  ;;  %v4421_v22 = vld [vmem:[%s7643_s29 + $0x128] sm:$0xff]  ;;  %v4504_v23 = vld [vmem:[%s7643_s29 + $0x270] sm:$0xff] }
  0xc4   : > { %4403 = vmatmul.msk.f32.gmra.mxu0 %vm646_vm0, %v644_v25 }
  0xc6   : > { %4472 = vmatmul.msk.f32.gmra.mxu2 %vm646_vm0, %v4451_v26 }
  0xc9   : > { %v5580_v29 = vpop.f32.mrf.mxu0 }
  0xca   : > { %7649 = vst [vmem:[#allocation14_spill] sm:$0xff] %v5580_v29  ;;  %4431 = vmatmul.msk.f32.gmra.mxu1 %vm646_vm0, %v4410_v27  ;;  %4514 = vmatmul.msk.f32.gmra.mxu3 %vm646_vm0, %v4493_v28  ;;  %v4541_v27 = vld [vmem:[%s7643_s29 + $0x2f0] sm:$0xff] }
  0xcb   : > { %v4463_v28 = vld [vmem:[%s7643_s29 + $0x1d0] sm:$0xff] }
  0xcc   : > { %4404 = vmatmul.msk.f32.gmra.mxu0 %vm646_vm0, %v645_v30  ;;  %v4422_v30 = vld [vmem:[%s7643_s29 + $0x130] sm:$0xff] }
  0xce   : > { %4473 = vmatmul.msk.f32.gmra.mxu2 %vm646_vm0, %v4452_v31  ;;  %v4505_v31 = vld [vmem:[%s7643_s29 + $0x278] sm:$0xff] }
  0xd1   : > { %v5598_v34 = vpop.f32.mrf.mxu0 }
  0xd2   : > { %4432 = vmatmul.msk.f32.gmra.mxu1 %vm646_vm0, %v4411_v32  ;;  %4515 = vmatmul.msk.f32.gmra.mxu3 %vm646_vm0, %v4494_v33 }
  0xd4   : > { %4552 = vmatmul.msk.f32.vlgmr.msrb.gmra.mxu0 %vm646_vm0, %v4531_v35  ;;  %v4542_v35 = vld [vmem:[%s7643_s29 + $0x2f8] sm:$0xff] }
  0xd6   : > { %4474 = vmatmul.msk.f32.gmra.mxu2 %vm646_vm0, %v4453_v36 }
  0xd9   : > { %v5616_v39 = vpop.f32.mrf.mxu0 }
  0xda   : > { %4433 = vmatmul.msk.f32.gmra.mxu1 %vm646_vm0, %v4412_v37  ;;  %4516 = vmatmul.msk.f32.gmra.mxu3 %vm646_vm0, %v4495_v38  ;;  %v4464_v37 = vld [vmem:[%s7643_s29 + $0x1d8] sm:$0xff] }
  0xdc   : > { %4553 = vmatmul.msk.f32.gmra.mxu0 %vm646_vm0, %v4532_v40  ;;  %v4423_v40 = vld [vmem:[%s7643_s29 + $0x138] sm:$0xff] }
  0xde   : > { %4475 = vmatmul.msk.f32.gmra.mxu2 %vm646_vm0, %v4454_v41  ;;  %v4506_v41 = vld [vmem:[%s7643_s29 + $0x280] sm:$0xff] }
  0xe1   : > { %v5634_v44 = vpop.f32.mrf.mxu0 }
  0xe2   : > { %4434 = vmatmul.msk.f32.gmra.mxu1 %vm646_vm0, %v4413_v42  ;;  %4517 = vmatmul.msk.f32.gmra.mxu3 %vm646_vm0, %v4496_v43 }
  0xe4   : > { %4554 = vmatmul.msk.f32.gmra.mxu0 %vm646_vm0, %v4533_v45  ;;  %v4543_v45 = vld [vmem:[%s7643_s29 + $0x300] sm:$0xff] }
  0xe6   : > { %4476 = vmatmul.msk.f32.gmra.mxu2 %vm646_vm0, %v4455_v46  ;;  %v4465_v46 = vld [vmem:[%s7643_s29 + $0x1e0] sm:$0xff] }
  0xe9   : > { %v5652_v49 = vpop.f32.mrf.mxu0 }
  0xea   : > { %4435 = vmatmul.msk.f32.gmra.mxu1 %vm646_vm0, %v4414_v47  ;;  %4518 = vmatmul.msk.f32.gmra.mxu3 %vm646_vm0, %v4497_v48 }
  0xec   : > { %4555 = vmatmul.msk.f32.gmra.mxu0 %vm646_vm0, %v4534_v50  ;;  %v4424_v50 = vld [vmem:[%s7643_s29 + $0x140] sm:$0xff] }
  0xee   : > { %4477 = vmatmul.msk.f32.gmra.mxu2 %vm646_vm0, %v4456_v51  ;;  %v4507_v51 = vld [vmem:[%s7643_s29 + $0x288] sm:$0xff] }
  0xf1   : > { %v5670_v54 = vpop.f32.mrf.mxu0 }
  0xf2   : > { %4436 = vmatmul.msk.f32.gmra.mxu1 %vm646_vm0, %v4415_v52  ;;  %4519 = vmatmul.msk.f32.gmra.mxu3 %vm646_vm0, %v4498_v53 }
  0xf4   : > { %4556 = vmatmul.msk.f32.gmra.mxu0 %vm646_vm0, %v4535_v55  ;;  %v4544_v55 = vld [vmem:[%s7643_s29 + $0x308] sm:$0xff] }
  0xf6   : > { %4478 = vmatmul.msk.f32.gmra.mxu2 %vm646_vm0, %v4457_v56  ;;  %v4466_v56 = vld [vmem:[%s7643_s29 + $0x1e8] sm:$0xff] }
  0xf9   : > { %v5688_v59 = vpop.f32.mrf.mxu0 }
  0xfa   : > { %4437 = vmatmul.msk.f32.gmra.mxu1 %vm646_vm0, %v4416_v57  ;;  %4520 = vmatmul.msk.f32.gmra.mxu3 %vm646_vm0, %v4499_v58 }
  0xfc   : > { %4557 = vmatmul.msk.f32.gmra.mxu0 %vm646_vm0, %v4536_v60  ;;  %v4425_v60 = vld [vmem:[%s7643_s29 + $0x148] sm:$0xff] }
  0xfe   : > { %4479 = vmatmul.msk.f32.gmra.mxu2 %vm646_vm0, %v4458_v61  ;;  %v4508_v61 = vld [vmem:[%s7643_s29 + $0x290] sm:$0xff] }
 0x101   : > { %v5706_v1 = vpop.f32.mrf.mxu0 }
 0x102   : > { %4438 = vmatmul.msk.f32.gmra.mxu1 %vm646_vm0, %v4417_v62  ;;  %4521 = vmatmul.msk.f32.gmra.mxu3 %vm646_vm0, %v4500_v63 }
 0x104   : > { %4558 = vmatmul.msk.f32.gmra.mxu0 %vm646_vm0, %v4537_v2  ;;  %v4545_v2 = vld [vmem:[%s7643_s29 + $0x310] sm:$0xff] }
 0x106   : > { %4480 = vmatmul.msk.f32.gmra.mxu2 %vm646_vm0, %v4459_v4  ;;  %v4467_v4 = vld [vmem:[%s7643_s29 + $0x1f0] sm:$0xff] }
 0x109   : > { %v5724_v7 = vpop.f32.mrf.mxu0 }
 0x10a   : > { %4439 = vmatmul.msk.f32.gmra.mxu1 %vm646_vm0, %v4418_v5  ;;  %4522 = vmatmul.msk.f32.gmra.mxu3 %vm646_vm0, %v4501_v6  ;;  %v4509_v6 = vld [vmem:[%s7643_s29 + $0x298] sm:$0xff] }
 0x10c   : > { %4559 = vmatmul.msk.f32.gmra.mxu0 %vm646_vm0, %v4538_v8 }
 0x10e   : > { %4481 = vmatmul.msk.f32.gmra.mxu2 %vm646_vm0, %v4460_v9 }
 0x111   : > { %v5742_v12 = vpop.f32.mrf.mxu0 }
 0x112   : > { %4440 = vmatmul.msk.f32.gmra.mxu1 %vm646_vm0, %v4419_v10  ;;  %4523 = vmatmul.msk.f32.gmra.mxu3 %vm646_vm0, %v4502_v11  ;;  %v4546_v10 = vld [vmem:[%s7643_s29 + $0x318] sm:$0xff] }
 0x114   : > { %4560 = vmatmul.msk.f32.gmra.mxu0 %vm646_vm0, %v4539_v13 }
 0x116   : > { %4482 = vmatmul.msk.f32.gmra.mxu2 %vm646_vm0, %v4461_v15 }
 0x119   : > { %v5760_v18 = vpop.f32.mrf.mxu0 }
 0x11a   : > { %4441 = vmatmul.msk.f32.gmra.mxu1 %vm646_vm0, %v4420_v16  ;;  %4524 = vmatmul.msk.f32.gmra.mxu3 %vm646_vm0, %v4503_v17  ;;  %v4547_v16 = vld [vmem:[%s7643_s29 + $0x320] sm:$0xff] }
 0x11c   : > { %4561 = vmatmul.msk.f32.gmra.mxu0 %vm646_vm0, %v4540_v20 }
 0x11e   : > { %4483 = vmatmul.msk.f32.gmra.mxu2 %vm646_vm0, %v4462_v21 }
 0x11f   : > { %v5778_v25 = vpop.f32.mrf.mxu1 }
 0x120   : > { %7650 = vst [vmem:[#allocation15_spill] sm:$0xff] %v5778_v25 }
 0x121   : > { %v5780_v26 = vpop.f32.mrf.mxu0 }
 0x122   : > { %4442 = vmatmul.msk.f32.gmra.mxu1 %vm646_vm0, %v4421_v22  ;;  %4525 = vmatmul.msk.f32.gmra.mxu3 %vm646_vm0, %v4504_v23  ;;  %v4548_v23 = vld [vmem:[%s7643_s29 + $0x328] sm:$0xff] }
 0x124   : > { %4562 = vmatmul.msk.f32.gmra.mxu0 %vm646_vm0, %v4541_v27 }
 0x126   : > { %4484 = vmatmul.msk.f32.gmra.mxu2 %vm646_vm0, %v4463_v28 }
 0x127   : > { %v5807_v36 = vpop.f32.mrf.mxu1 }
 0x128   : > { %7653 = vst [vmem:[#allocation18_spill] sm:$0xff] %v5807_v36  ;;  %v863_v36 = vpop.permute.xlu0 %862 }
 0x129   : > { %v5798_v32 = vpop.f32.mrf.mxu0  ;;  %v5800_v33 = vpop.f32.mrf.mxu2  ;;  %v909_v19 = vadd.f32 %v863_v36, %v5760_v18 }
 0x12a   : > { %7651 = vst [vmem:[#allocation16_spill] sm:$0xff] %v5798_v32  ;;  %4443 = vmatmul.msk.f32.gmra.mxu1 %vm646_vm0, %v4422_v30  ;;  %4526 = vmatmul.msk.f32.gmra.mxu3 %vm646_vm0, %v4505_v31 }
 0x12b   : > { %7652 = vst [vmem:[#allocation17_spill] sm:$0xff] %v5800_v33 }
 0x12c   : > { %4563 = vmatmul.msk.f32.gmra.mxu0 %vm646_vm0, %v4542_v35  ;;  %v4549_v35 = vld [vmem:[%s7643_s29 + $0x330] sm:$0xff] }
 0x12d   : > { %v5813_v38 = vpop.f32.mrf.mxu3 }
 0x12e   : > { %7654 = vst [vmem:[#allocation19_spill] sm:$0xff] %v5813_v38  ;;  %4485 = vmatmul.msk.f32.gmra.mxu2 %vm646_vm0, %v4464_v37 }
 0x12f   : > { %v5835_v47 = vpop.f32.mrf.mxu1 }
 0x130   : > { %7657 = vst [vmem:[#allocation22_spill] sm:$0xff] %v5835_v47 }
 0x131   : > { %v5822_v42 = vpop.f32.mrf.mxu0  ;;  %v5824_v43 = vpop.f32.mrf.mxu2 }
 0x132   : > { %7655 = vst [vmem:[#allocation20_spill] sm:$0xff] %v5822_v42  ;;  %4444 = vmatmul.msk.f32.gmra.mxu1 %vm646_vm0, %v4423_v40  ;;  %4527 = vmatmul.msk.f32.gmra.mxu3 %vm646_vm0, %v4506_v41 }
 0x133   : > { %7656 = vst [vmem:[#allocation21_spill] sm:$0xff] %v5824_v43  ;;  %v858_v43 = vpop.permute.xlu1 %857 }
 0x134   : > { %4564 = vmatmul.msk.f32.gmra.mxu0 %vm646_vm0, %v4543_v45  ;;  %v4550_v45 = vld [vmem:[%s7643_s29 + $0x338] sm:$0xff] }
 0x135   : > { %v5837_v48 = vpop.f32.mrf.mxu3 }
 0x136   : > { %7658 = vst [vmem:[#allocation23_spill] sm:$0xff] %v5837_v48  ;;  %4486 = vmatmul.msk.f32.gmra.mxu2 %vm646_vm0, %v4465_v46  ;;  %v868_v48 = vpop.permute.xlu2 %867 }
 0x137   : > { %v5862_v58 = vpop.f32.mrf.mxu1 }
 0x138   : > { %7662 = vst [vmem:[#allocation27_spill] sm:$0xff] %v5862_v58 }
 0x139   : > { %v5846_v52 = vpop.f32.mrf.mxu0  ;;  %v5848_v53 = vpop.f32.mrf.mxu2 }
 0x13a   : > { %7659 = vst [vmem:[#allocation24_spill] sm:$0xff] %v5846_v52  ;;  %4445 = vmatmul.msk.f32.gmra.mxu1 %vm646_vm0, %v4424_v50  ;;  %4528 = vmatmul.msk.f32.gmra.mxu3 %vm646_vm0, %v4507_v51 }
 0x13b   : > { %7660 = vst [vmem:[#allocation25_spill] sm:$0xff] %v5848_v53 }
 0x13c   : > { %4565 = vmatmul.msk.f32.gmra.mxu0 %vm646_vm0, %v4544_v55  ;;  %v4551_v55 = vld [vmem:[%s7643_s29 + $0x340] sm:$0xff] }
 0x13d   : > { %v5859_v57 = vpop.f32.mrf.mxu3 }
 0x13e   : > { %7661 = vst [vmem:[#allocation26_spill] sm:$0xff] %v5859_v57  ;;  %4487 = vmatmul.msk.f32.gmra.mxu2 %vm646_vm0, %v4466_v56 }
 0x13f   : > { %v5889_v8 = vpop.f32.mrf.mxu1 }
 0x140   : > { %7666 = vst [vmem:[#allocation31_spill] sm:$0xff] %v5889_v8  ;;  %v908_v8 = vadd.f32 %v858_v43, %v5742_v12 }
 0x141   : > { %v5870_v62 = vpop.f32.mrf.mxu0  ;;  %v5872_v63 = vpop.f32.mrf.mxu2 }
 0x142   : > { %7663 = vst [vmem:[#allocation28_spill] sm:$0xff] %v5870_v62  ;;  %4446 = vmatmul.msk.f32.gmra.mxu1 %vm646_vm0, %v4425_v60  ;;  %4529 = vmatmul.msk.f32.gmra.mxu3 %vm646_vm0, %v4508_v61 }
 0x143   : > { %7664 = vst [vmem:[#allocation29_spill] sm:$0xff] %v5872_v63 }
 0x144   : > { %4566 = vmatmul.msk.f32.gmra.mxu0 %vm646_vm0, %v4545_v2 }
 0x145   : > { %v5883_v5 = vpop.f32.mrf.mxu3 }
 0x146   : > { %7665 = vst [vmem:[#allocation30_spill] sm:$0xff] %v5883_v5  ;;  %4488 = vmatmul.msk.f32.gmra.mxu2 %vm646_vm0, %v4467_v4 }
 0x147   : > { %v5907_v17 = vpop.f32.mrf.mxu1 }
 0x148   : > { %7671 = vst [vmem:[#allocation36_spill] sm:$0xff] %v5907_v17 }
 0x149   : > { %v5891_v9 = vpop.f32.mrf.mxu0  ;;  %v5897_v11 = vpop.f32.mrf.mxu2 }
 0x14a   : > { %7667 = vst [vmem:[#allocation32_spill] sm:$0xff] %v5891_v9  ;;  %4530 = vmatmul.msk.f32.gmra.mxu3 %vm646_vm0, %v4509_v6 }
 0x14b   : > { %7668 = vst [vmem:[#allocation33_spill] sm:$0xff] %v5897_v11 }
 0x14c   : > { %4567 = vmatmul.msk.f32.gmra.mxu0 %vm646_vm0, %v4546_v10 }
 0x14d   : > { %v5900_v13 = vpop.f32.mrf.mxu3 }
 0x14e   : > { %7669 = vst [vmem:[#allocation34_spill] sm:$0xff] %v5900_v13 }
 0x14f   : > { %v5920_v27 = vpop.f32.mrf.mxu1 }
 0x151   : > { %v5902_v15 = vpop.f32.mrf.mxu0  ;;  %v5910_v20 = vpop.f32.mrf.mxu2 }
 0x152   : > { %7670 = vst [vmem:[#allocation35_spill] sm:$0xff] %v5902_v15 }
 0x153   : > { %7672 = vst [vmem:[#allocation37_spill] sm:$0xff] %v5910_v20 }
 0x154   : > { %4568 = vmatmul.msk.f32.gmra.mxu0 %vm646_vm0, %v4547_v16 }
 0x155   : > { %v5912_v21 = vpop.f32.mrf.mxu3 }
 0x156   : > { %7673 = vst [vmem:[#allocation38_spill] sm:$0xff] %v5912_v21 }
 0x157   : > { %v5932_v37 = vpop.f32.mrf.mxu1 }
 0x159   : > { %v5914_v22 = vpop.f32.mrf.mxu0  ;;  %v5922_v28 = vpop.f32.mrf.mxu2 }
 0x15a   : > { %7674 = vst [vmem:[#allocation39_spill] sm:$0xff] %v5914_v22 }
 0x15b   : > { %7675 = vst [vmem:[#allocation40_spill] sm:$0xff] %v5922_v28 }
 0x15c   : > { %4569 = vmatmul.msk.f32.gmra.mxu0 %vm646_vm0, %v4548_v23 }
 0x15d   : > { %v5924_v30 = vpop.f32.mrf.mxu3 }
 0x15e   : > { %7676 = vst [vmem:[#allocation41_spill] sm:$0xff] %v5924_v30 }
 0x15f   : > { %v5944_v50 = vpop.f32.mrf.mxu1 }
 0x161   : > { %v5926_v31 = vpop.f32.mrf.mxu0  ;;  %v5934_v40 = vpop.f32.mrf.mxu2 }
 0x162   : > { %7677 = vst [vmem:[#allocation42_spill] sm:$0xff] %v5926_v31 }
 0x163   : > { %7678 = vst [vmem:[#allocation43_spill] sm:$0xff] %v5934_v40 }
 0x164   : > { %4570 = vmatmul.msk.f32.gmra.mxu0 %vm646_vm0, %v4549_v35 }
 0x165   : > { %v5941_v46 = vpop.f32.mrf.mxu3 }
 0x166   : > { %7680 = vst [vmem:[#allocation45_spill] sm:$0xff] %v5941_v46 }
 0x167   : > { %v5958_v2 = vpop.f32.mrf.mxu1 }
 0x169   : > { %v5936_v41 = vpop.f32.mrf.mxu0  ;;  %v5951_v56 = vpop.f32.mrf.mxu2 }
 0x16a   : > { %7679 = vst [vmem:[#allocation44_spill] sm:$0xff] %v5936_v41 }
 0x16c   : > { %4571 = vmatmul.msk.f32.gmra.mxu0 %vm646_vm0, %v4550_v45 }
 0x16d   : > { %v5954_v60 = vpop.f32.mrf.mxu3 }
 0x16e   : > { %7682 = vst [vmem:[#allocation47_spill] sm:$0xff] %v5954_v60 }
 0x16f   : > { %v1064_v16 = vpop.f32.mrf.mxu1 }
 0x171   : > { %v5946_v51 = vpop.f32.mrf.mxu0  ;;  %v5960_v4 = vpop.f32.mrf.mxu2 }
 0x172   : > { %7681 = vst [vmem:[#allocation46_spill] sm:$0xff] %v5946_v51  ;;  %v853_v51 = vpop.permute.xlu2 %852 }
 0x173   : > { %v907_v17 = vadd.f32 %v853_v51, %v5724_v7 }
 0x174   : > { %4572 = vmatmul.msk.f32.gmra.mxu0 %vm646_vm0, %v4551_v55 }
 0x175   : > { %v5962_v6 = vpop.f32.mrf.mxu3 }
 0x177   : > { %v1067_v55 = vpop.f32.mrf.mxu1 }
 0x179   : > { %v5956_v61 = vpop.f32.mrf.mxu0  ;;  %v5966_v23 = vpop.f32.mrf.mxu2 }
 0x17a   : > { %7683 = vst [vmem:[#allocation48_spill] sm:$0xff] %v5956_v61  ;;  %v848_v61 = vpop.permute.xlu1 %847  ;;  %v843_v47 = vpop.permute.xlu2 %842 }
 0x17b   : > { %v906_v60 = vadd.f32 %v848_v61, %v5706_v1  ;;  %v7694_v61 = vld [vmem:[#allocation36_spill] sm:$0xff] }
 0x17d   : > { %v5968_v35 = vpop.f32.mrf.mxu3  ;;  %v1108_v40 = vadd.f32 %v1067_v55, %v906_v60  ;;  %v7698_v55 = vld [vmem:[#allocation13_spill] sm:$0xff] }
 0x17f   : > { %v1070_v52 = vpop.f32.mrf.mxu1 }
 0x180   : > { %v1109_v18 = vadd.f32 %v1070_v52, %v907_v17 }
 0x181   : > { %v5964_v10 = vpop.f32.mrf.mxu0  ;;  %v1265_v0 = vpop.f32.mrf.mxu2 }
 0x182   : > { %7684 = vst [vmem:[#allocation49_spill] sm:$0xff] %v5964_v10  ;;  %v838_v10 = vpop.permute.xlu0 %837  ;;  %v833_v58 = vpop.permute.xlu1 %832 }
 0x183   : > { %v828_v20 = vpop.permute.xlu2 %827 }
 0x185   : > { %v5974_v42 = vpop.f32.mrf.mxu3 }
 0x187   : > { %v1073_v38 = vpop.f32.mrf.mxu1 }
 0x188   : > { %v1110_v29 = vadd.f32 %v1073_v38, %v908_v8 }
 0x189   : > { %v5970_v45 = vpop.f32.mrf.mxu0  ;;  %v1268_v62 = vpop.f32.mrf.mxu2 }
 0x18a   : > { %7685 = vst [vmem:[#allocation50_spill] sm:$0xff] %v5970_v45  ;;  %v910_v45 = vadd.f32 %v868_v48, %v5780_v26  ;;  %v823_v28 = vpop.permute.xlu0 %822 }
 0x18b   : > { %v813_v52 = vpop.permute.xlu2 %812 }
 0x18d   : > { %v1466_v15 = vpop.f32.mrf.mxu3 }
 0x18f   : > { %v1076_v57 = vpop.f32.mrf.mxu1 }
 0x190   : > { %v1111_v24 = vadd.f32 %v1076_v57, %v909_v19  ;;  %v1307_v19 = vadd.f32 %v1268_v62, %v1109_v18 }
 0x191   : > { %v5972_v32 = vpop.f32.mrf.mxu0  ;;  %v1271_v31 = vpop.f32.mrf.mxu2 }
 0x192   : > { %7686 = vst [vmem:[#allocation51_spill] sm:$0xff] %v5972_v32  ;;  %v1308_v36 = vadd.f32 %v1271_v31, %v1110_v29  ;;  %v1505_v1 = vadd.f32 %v1466_v15, %v1307_v19  ;;  %v7700_v19 = vld [vmem:[#allocation37_spill] sm:$0xff] }
 0x195   : > { %v1469_v33 = vpop.f32.mrf.mxu3 }
 0x197   : > { %v1079_v3 = vpop.f32.mrf.mxu1 }
 0x198   : > { %v1112_v32 = vadd.f32 %v1079_v3, %v910_v45  ;;  %v1506_v3 = vadd.f32 %v1469_v33, %v1308_v36  ;;  %v904_v45 = vadd.f32 %v838_v10, %v5670_v54  ;;  %v7696_v10 = vld [vmem:[#allocation45_spill] sm:$0xff]  ;;  %v7699_v36 = vld [vmem:[#allocation31_spill] sm:$0xff] }
 0x199   : > { %v5976_v9 = vpop.f32.mrf.mxu0  ;;  %v1274_v25 = vpop.f32.mrf.mxu2 }
 0x19a   : > { %7687 = vst [vmem:[#allocation52_spill] sm:$0xff] %v5976_v9 }
 0x19d   : > { %v1472_v5 = vpop.f32.mrf.mxu3 }
 0x19f   : > { %v5982_v21 = vpop.f32.mrf.mxu1 }
 0x1a0   : > { %7688 = vst [vmem:[#allocation53_spill] sm:$0xff] %v5982_v21  ;;  %v1309_v21 = vadd.f32 %v1274_v25, %v1111_v24  ;;  %v818_v24 = vpop.permute.xlu1 %817  ;;  %v1306_v25 = vadd.f32 %v1265_v0, %v1108_v40  ;;  %v902_v0 = vadd.f32 %v828_v20, %v5634_v44  ;;  %v7690_v40 = vld [vmem:[#allocation43_spill] sm:$0xff] }
 0x1a1   : > { %v5978_v22 = vpop.f32.mrf.mxu0  ;;  %v1277_v13 = vpop.f32.mrf.mxu2 }
 0x1a2   : > { %v1310_v9 = vadd.f32 %v1277_v13, %v1112_v32  ;;  %v1507_v26 = vadd.f32 %v1472_v5, %v1309_v21  ;;  %v1504_v62 = vadd.f32 %v5974_v42, %v1306_v25  ;;  %v1104_v13 = vadd.f32 %v5932_v37, %v902_v0  ;;  %v7692_v37 = vld [vmem:[#allocation52_spill] sm:$0xff]  ;;  %v7707_v0 = vld [vmem:[#allocation49_spill] sm:$0xff] }
 0x1a3   : > { %v7703_v25 = vld [vmem:[#allocation12_spill] sm:$0xff] }
 0x1a5   : > { %v1475_v14 = vpop.f32.mrf.mxu3 }
 0x1a6   : > { %v1508_v48 = vadd.f32 %v1475_v14, %v1310_v9  ;;  %v903_v14 = vadd.f32 %v833_v58, %v5652_v49  ;;  %v808_v49 = vpop.permute.xlu0 %807 }
 0x1a7   : > { %v5995_v38 = vpop.f32.mrf.mxu1  ;;  %v898_v18 = vadd.f32 %v808_v49, %v7698_v55 }
 0x1a9   : > { %v5980_v41 = vpop.f32.mrf.mxu0  ;;  %v5986_v30 = vpop.f32.mrf.mxu2 }
 0x1aa   : > { %7689 = vst [vmem:[#allocation54_spill] sm:$0xff] %v5986_v30  ;;  %v905_v30 = vadd.f32 %v843_v47, %v5688_v59  ;;  %v1106_v59 = vadd.f32 %v5958_v2, %v904_v45  ;;  %v7702_v45 = vld [vmem:[#allocation50_spill] sm:$0xff] }
 0x1ac   : > { %v1107_v7 = vadd.f32 %v1064_v16, %v905_v30  ;;  %v1304_v58 = vadd.f32 %v5960_v4, %v1106_v59  ;;  %v900_v30 = vadd.f32 %v818_v24, %v5598_v34  ;;  %v803_v4 = vpop.permute.xlu1 %802  ;;  %v7697_v16 = vld [vmem:[#allocation51_spill] sm:$0xff] }
 0x1ad   : > { %v5989_v46 = vpop.f32.mrf.mxu3 }
 0x1ae   : > { %v1305_v33 = vadd.f32 %v5966_v23, %v1107_v7  ;;  %v1502_v17 = vadd.f32 %v5962_v6, %v1304_v58  ;;  %v7695_v6 = vld [vmem:[#allocation40_spill] sm:$0xff]  ;;  %v7708_v58 = vld [vmem:[#allocation11_spill] sm:$0xff] }
 0x1af   : > { %v6024_v2 = vpop.f32.mrf.mxu1 }
 0x1b0   : > { %v1503_v9 = vadd.f32 %v5968_v35, %v1305_v33  ;;  %v7705_v33 = vld [vmem:[#allocation33_spill] sm:$0xff] }
 0x1b1   : > { %v1664_v53 = vpop.f32.mrf.mxu0  ;;  %v5999_v47 = vpop.f32.mrf.mxu2 }
 0x1b2   : > { %v1703_v54 = vadd.f32 %v1664_v53, %v1505_v1  ;;  %v901_v53 = vadd.f32 %v823_v28, %v5616_v39  ;;  %v1701_v20 = vadd.f32 %v5978_v22, %v1503_v9  ;;  %v7691_v39 = vld [vmem:[#allocation47_spill] sm:$0xff]  ;;  %v1102_v22 = vadd.f32 %v7694_v61, %v900_v30 }
 0x1b3   : > { %v897_v1 = vadd.f32 %v803_v4, %v7703_v25 }
 0x1b4   : > { %v1724_v21 = vmax.f32 %v1703_v54, 0.0  ;;  %v1103_v31 = vadd.f32 %v5920_v27, %v901_v53  ;;  %v1722_v35 = vmax.f32 %v1701_v20, 0.0  ;;  %v7706_v54 = vld [vmem:[#allocation38_spill] sm:$0xff]  ;;  %v7710_v53 = vld [vmem:[#allocation29_spill] sm:$0xff]  ;;  %v7712_v20 = vld [vmem:[#allocation48_spill] sm:$0xff] }
 0x1b5   : > { %v6005_v8 = vpop.f32.mrf.mxu3 }
 0x1b6   : > { %v1301_v34 = vadd.f32 %v7695_v6, %v1103_v31  ;;  %v7713_v31 = vld [vmem:[#allocation10_spill] sm:$0xff] }
 0x1b7   : > { %v1091_v6 = vpop.f32.mrf.mxu1 }
 0x1b9   : > { %v1667_v63 = vpop.f32.mrf.mxu0 }
 0x1ba   : > { %v1704_v32 = vadd.f32 %v1667_v63, %v1506_v3  ;;  %v1105_v63 = vadd.f32 %v5944_v50, %v903_v14  ;;  %v1700_v50 = vadd.f32 %v7692_v37, %v1502_v17  ;;  %v1300_v3 = vadd.f32 %v7700_v19, %v1102_v22  ;;  %v7718_v22 = vld [vmem:[#allocation15_spill] sm:$0xff]  ;;  %v7722_v19 = vld [vmem:[#allocation17_spill] sm:$0xff] }
 0x1bc   : > { %v1725_v42 = vmax.f32 %v1704_v32, 0.0  ;;  %v1303_v44 = vadd.f32 %v5951_v56, %v1105_v63  ;;  %v7693_v56 = vld [vmem:[#allocation14_spill] sm:$0xff]  ;;  %v1721_v24 = vmax.f32 %v1700_v50, 0.0  ;;  %v7704_v32 = vld [vmem:[#allocation27_spill] sm:$0xff] }
 0x1bd   : > { %v899_v60 = vadd.f32 %v813_v52, %v7693_v56  ;;  %v6038_v14 = vpop.f32.mrf.mxu3  ;;  %v793_v52 = vpop.permute.xlu0 %792  ;;  %v7716_v50 = vld [vmem:[#allocation30_spill] sm:$0xff] }
 0x1be   : > { %v1501_v28 = vadd.f32 %v7691_v39, %v1303_v44  ;;  %v7711_v44 = vld [vmem:[#allocation34_spill] sm:$0xff] }
 0x1bf   : > { %v7717_v56 = vld [vmem:[#allocation46_spill] sm:$0xff] }
 0x1c0   : > { %v1699_v23 = vadd.f32 %v7697_v16, %v1501_v28  ;;  %v7715_v28 = vld [vmem:[#allocation25_spill] sm:$0xff]  ;;  %v7720_v16 = vld [vmem:[#allocation26_spill] sm:$0xff] }
 0x1c1   : > { %v1670_v11 = vpop.f32.mrf.mxu0 }
 0x1c2   : > { %v1705_v43 = vadd.f32 %v1670_v11, %v1507_v26  ;;  %v1702_v11 = vadd.f32 %v5980_v41, %v1504_v62  ;;  %v1302_v41 = vadd.f32 %v7690_v40, %v1104_v13  ;;  %v1101_v26 = vadd.f32 %v7699_v36, %v899_v60 }
 0x1c3   : > { %v1720_v49 = vmax.f32 %v1699_v23, 0.0  ;;  %v895_v40 = vadd.f32 %v793_v52, %v7713_v31 }
 0x1c4   : > { %v1726_v5 = vmax.f32 %v1705_v43, 0.0  ;;  %v1723_v51 = vmax.f32 %v1702_v11, 0.0  ;;  %v1500_v27 = vadd.f32 %v7696_v10, %v1302_v41  ;;  %v7701_v43 = vld [vmem:[#allocation41_spill] sm:$0xff]  ;;  %v1299_v62 = vadd.f32 %v7705_v33, %v1101_v26  ;;  %v7709_v11 = vld [vmem:[#allocation22_spill] sm:$0xff] }
 0x1c5   : > { %v7714_v41 = vld [vmem:[#allocation18_spill] sm:$0xff]  ;;  %v1097_v4 = vadd.f32 %v7718_v22, %v895_v40  ;;  %v7719_v10 = vld [vmem:[#allocation21_spill] sm:$0xff]  ;;  %v1487_v25 = vpop.f32.mrf.mxu3 }
 0x1c6   : > { %v1698_v7 = vadd.f32 %v7702_v45, %v1500_v27  ;;  %v1497_v17 = vadd.f32 %v7711_v44, %v1299_v62  ;;  %v7724_v45 = vld [vmem:[#allocation42_spill] sm:$0xff]  ;;  %v7727_v62 = vld [vmem:[#allocation35_spill] sm:$0xff] }
 0x1c7   : > { %v1733_v44 = vld [vmem:[%s7730_s23] sm:$0xff] }
 0x1c8   : > { %v1719_v30 = vmax.f32 %v1698_v7, 0.0  ;;  %v1695_v60 = vadd.f32 %v7717_v56, %v1497_v17 }
 0x1c9   : > { %v1673_v12 = vpop.f32.mrf.mxu0 }
 0x1ca   : > { %v1706_v57 = vadd.f32 %v1673_v12, %v1508_v48  ;;  %v6031_v48 = vpop.f32.mrf.mxu2  ;;  %v798_v12 = vpop.permute.xlu2 %797 }
 0x1cb   : > { %v896_v9 = vadd.f32 %v798_v12, %v7708_v58 }
 0x1cc   : > { %v1727_v29 = vmax.f32 %v1706_v57, 0.0  ;;  %v1499_v57 = vadd.f32 %v7701_v43, %v1301_v34  ;;  %v893_v34 = vpop.permute.xlu1 %892  ;;  %v7723_v43 = vld [vmem:[#allocation23_spill] sm:$0xff] }
 0x1cd   : > { %v1098_v39 = vadd.f32 %v7714_v41, %v896_v9  ;;  %v7728_v9 = vld [vmem:[#allocation28_spill] sm:$0xff] }
 0x1ce   : > { %1789 = vmatpush.msrb.mxu1 %v1727_v29  ;;  %1944 = vmatpush.msrb.mxu3 %v1727_v29  ;;  %v1100_v29 = vadd.f32 %v7704_v32, %v898_v18  ;;  %v1697_v63 = vadd.f32 %v7707_v0, %v1499_v57  ;;  %v883_v0 = vpop.permute.xlu0 %882 }
 0x1cf   : > { %v1296_v27 = vadd.f32 %v7719_v10, %v1098_v39  ;;  %v1490_v39 = vpop.f32.mrf.mxu3 }
 0x1d0   : > { %1790 = vmatpush.msrb.mxu1 %v1726_v5  ;;  %1945 = vmatpush.msrb.mxu3 %v1726_v5  ;;  %v1498_v5 = vadd.f32 %v7706_v54, %v1300_v3  ;;  %v1298_v13 = vadd.f32 %v7710_v53, %v1100_v29  ;;  %v1718_v61 = vmax.f32 %v1697_v63, 0.0  ;;  %v1295_v3 = vadd.f32 %v7722_v19, %v1097_v4  ;;  %v7726_v29 = vld [vmem:[#allocation39_spill] sm:$0xff] }
 0x1d1   : > { %v6012_v15 = vpop.f32.mrf.mxu0  ;;  %v1494_v57 = vadd.f32 %v7723_v43, %v1296_v27 }
 0x1d2   : > { %1791 = vmatpush.msrb.mxu1 %v1725_v42  ;;  %1946 = vmatpush.msrb.mxu3 %v1725_v42  ;;  %v1099_v42 = vadd.f32 %v7709_v11, %v897_v1  ;;  %v1289_v36 = vpop.f32.mrf.mxu2  ;;  %v888_v12 = vpop.permute.xlu2 %887  ;;  %v7725_v1 = vld [vmem:[#allocation19_spill] sm:$0xff] }
 0x1d3   : > { %v1493_v32 = vadd.f32 %v7725_v1, %v1295_v3  ;;  %v1692_v52 = vadd.f32 %v7726_v29, %v1494_v57  ;;  %v914_v11 = vadd.f32 %v888_v12, %v7728_v9  ;;  %v1740_v1 = vld [vmem:[%s7730_s23 + $0x38] sm:$0xff]  ;;  %v1742_v29 = vld [vmem:[%s7730_s23 + $0x48] sm:$0xff]  ;;  %v1895_v9 = vld [vmem:[%s7736_s4 + $0x30] sm:$0xff] }
 0x1d4   : > { %1792 = vmatpush.msrb.mxu1 %v1724_v21  ;;  %1947 = vmatpush.msrb.mxu3 %v1724_v21  ;;  %v1696_v21 = vadd.f32 %v7712_v20, %v1498_v5  ;;  %v1297_v37 = vadd.f32 %v7715_v28, %v1099_v42  ;;  %v7729_v42 = vld [vmem:[#allocation32_spill] sm:$0xff]  ;;  %v878_v17 = vpop.permute.xlu1 %877 }
 0x1d5   : > { %v1691_v54 = vadd.f32 %v7727_v62, %v1493_v32  ;;  %v1713_v63 = vmax.f32 %v1692_v52, 0.0  ;;  %v915_v53 = vadd.f32 %v893_v34, %v7729_v42  ;;  %v1116_v40 = vadd.f32 %v1091_v6, %v914_v11  ;;  %v7732_v28 = vld [vmem:[#allocation20_spill] sm:$0xff]  ;;  %v7734_v6 = vld [vmem:[#allocation53_spill] sm:$0xff]  ;;  %v1750_v42 = vld [vmem:[%s7730_s23 + $0x88] sm:$0xff] }
 0x1d6   : > { %1793 = vmatpush.msrb.mxu1 %v1723_v51  ;;  %1948 = vmatpush.msrb.mxu3 %v1723_v51  ;;  %v1496_v51 = vadd.f32 %v7716_v50, %v1298_v13  ;;  %v1495_v23 = vadd.f32 %v7720_v16, %v1297_v37  ;;  %v1717_v18 = vmax.f32 %v1696_v21, 0.0  ;;  %v912_v37 = vadd.f32 %v878_v17, %v7732_v28  ;;  %v1745_v32 = vld [vmem:[%s7730_s23 + $0x60] sm:$0xff]  ;;  %v1744_v62 = vld [vmem:[%s7730_s23 + $0x58] sm:$0xff]  ;;  %v1899_v17 = vld [vmem:[%s7736_s4 + $0x50] sm:$0xff] }
 0x1d7   : > { %v1712_v13 = vmax.f32 %v1691_v54, 0.0  ;;  %v1889_v52 = vld [vmem:[%s7736_s4] sm:$0xff]  ;;  %v1891_v54 = vld [vmem:[%s7736_s4 + $0x10] sm:$0xff]  ;;  %v1898_v28 = vld [vmem:[%s7736_s4 + $0x48] sm:$0xff] }
 0x1d8   : > { %1794 = vmatpush.msrb.mxu1 %v1722_v35  ;;  %1949 = vmatpush.msrb.mxu3 %v1722_v35  ;;  %v7721_v35 = vld [vmem:[#allocation44_spill] sm:$0xff]  ;;  %v1693_v7 = vadd.f32 %v7724_v45, %v1495_v23  ;;  %v1114_v22 = vadd.f32 %v5995_v38, %v912_v37  ;;  %v1753_v11 = vld [vmem:[%s7730_s23 + $0xa0] sm:$0xf] }
 0x1d9   : > { %v6040_v59 = vpop.f32.mrf.mxu0  ;;  %v1694_v55 = vadd.f32 %v7721_v35, %v1496_v51  ;;  %v1314_v51 = vadd.f32 %v1289_v36, %v1116_v40  ;;  %v7735_v36 = vld [vmem:[#allocation54_spill] sm:$0xff]  ;;  %v1903_v40 = vld [vmem:[%s7736_s4 + $0x70] sm:$0xff] }
 0x1da   : > { %1795 = vmatpush.msrb.mxu1 %v1721_v24  ;;  %1950 = vmatpush.msrb.mxu3 %v1721_v24  ;;  %v1716_v24 = vmax.f32 %v1695_v60, 0.0  ;;  %v1714_v5 = vmax.f32 %v1693_v7, 0.0  ;;  %v1292_v20 = vpop.f32.mrf.mxu2  ;;  %v873_v21 = vpop.permute.xlu2 %872  ;;  %v7733_v60 = vld [vmem:[#allocation16_spill] sm:$0xff]  ;;  %v1312_v23 = vadd.f32 %v5999_v47, %v1114_v22  ;;  %v1741_v7 = vld [vmem:[%s7730_s23 + $0x40] sm:$0xff] }
 0x1db   : > { %v1715_v33 = vmax.f32 %v1694_v55, 0.0  ;;  %v1512_v34 = vadd.f32 %v1487_v25, %v1314_v51  ;;  %v1743_v25 = vld [vmem:[%s7730_s23 + $0x50] sm:$0xff]  ;;  %v1900_v51 = vld [vmem:[%s7736_s4 + $0x58] sm:$0xff] }
 0x1dc   : > { %1796 = vmatpush.msrb.mxu1 %v1720_v49  ;;  %1951 = vmatpush.msrb.mxu3 %v1720_v49  ;;  %v1094_v49 = vpop.f32.mrf.mxu1  ;;  %v1510_v38 = vadd.f32 %v6005_v8, %v1312_v23  ;;  %v1737_v8 = vld [vmem:[%s7730_s23 + $0x20] sm:$0xff]  ;;  %v1907_v37 = vld [vmem:[%s7736_s4 + $0x90] sm:$0xff]  ;;  %v1910_v23 = vld [vmem:[%s7736_s4 + $0xa8] sm:$0xf] }
 0x1dd   : > { %v1117_v41 = vadd.f32 %v1094_v49, %v915_v53  ;;  %v1751_v49 = vld [vmem:[%s7730_s23 + $0x90] sm:$0xff]  ;;  %v1897_v53 = vld [vmem:[%s7736_s4 + $0x40] sm:$0xff] }
 0x1de   : > { %1797 = vmatpush.msrb.mxu1 %v1719_v30  ;;  %1952 = vmatpush.msrb.mxu3 %v1719_v30  ;;  %v7731_v30 = vld [vmem:[#allocation24_spill] sm:$0xff]  ;;  %v1708_v43 = vadd.f32 %v6040_v59, %v1510_v38  ;;  %v1734_v59 = vld [vmem:[%s7730_s23 + $0x8] sm:$0xff] }
 0x1df   : > { %v913_v31 = vadd.f32 %v883_v0, %v7731_v30  ;;  %v1315_v56 = vadd.f32 %v1292_v20, %v1117_v41  ;;  %v1746_v0 = vld [vmem:[%s7730_s23 + $0x68] sm:$0xff]  ;;  %v1892_v20 = vld [vmem:[%s7736_s4 + $0x18] sm:$0xff]  ;;  %v1901_v30 = vld [vmem:[%s7736_s4 + $0x60] sm:$0xff] }
 0x1e0   : > { %1798 = vmatpush.msrb.mxu1 %v1718_v61  ;;  %1953 = vmatpush.msrb.mxu3 %v1718_v61  ;;  %v911_v61 = vadd.f32 %v873_v21, %v7733_v60  ;;  %v1729_v45 = vmax.f32 %v1708_v43, 0.0  ;;  %v1754_v21 = vld [vmem:[%s7730_s23 + $0xa8] sm:$0xf]  ;;  %v1896_v41 = vld [vmem:[%s7736_s4 + $0x38] sm:$0xff] }
 0x1e1   : > { %v1682_v26 = vpop.f32.mrf.mxu0  ;;  %v1115_v50 = vadd.f32 %v6024_v2, %v913_v31  ;;  %v1513_v10 = vadd.f32 %v1490_v39, %v1315_v56  ;;  %v1735_v2 = vld [vmem:[%s7730_s23 + $0x10] sm:$0xff]  ;;  %v1894_v31 = vld [vmem:[%s7736_s4 + $0x28] sm:$0xff]  ;;  %v1905_v39 = vld [vmem:[%s7736_s4 + $0x80] sm:$0xff] }
 0x1e2   : > { %1799 = vmatpush.msrb.mxu1 %v1717_v18  ;;  %1954 = vmatpush.msrb.mxu3 %v1717_v18  ;;  %v1113_v27 = vadd.f32 %v7734_v6, %v911_v61  ;;  %v1909_v56 = vld [vmem:[%s7736_s4 + $0xa0] sm:$0xf]  ;;  %v1902_v61 = vld [vmem:[%s7736_s4 + $0x68] sm:$0xff] }
 0x1e3   : > { %v1313_v4 = vadd.f32 %v6031_v48, %v1115_v50  ;;  %v2056_v38 = vld [vmem:[%s7737_s5 + $0x8] sm:$0xff] }
 0x1e4   : > { %1800 = vmatpush.msrb.mxu1 %v1716_v24  ;;  %1955 = vmatpush.msrb.mxu3 %v1716_v24  ;;  %v1311_v12 = vadd.f32 %v7735_v36, %v1113_v27  ;;  %v1738_v24 = vld [vmem:[%s7730_s23 + $0x28] sm:$0xff]  ;;  %v1908_v27 = vld [vmem:[%s7736_s4 + $0x98] sm:$0xff]  ;;  %v2149_v36 = vld [vmem:[%s7595_s6 + $0x10] sm:$0xff] }
 0x1e5   : > { %v1511_v35 = vadd.f32 %v6038_v14, %v1313_v4  ;;  %v1904_v4 = vld [vmem:[%s7736_s4 + $0x78] sm:$0xff] }
 0x1e6   : > { %1801 = vmatpush.msrb.mxu1 %v1715_v33  ;;  %1956 = vmatpush.msrb.mxu3 %v1715_v33  ;;  %v1509_v3 = vadd.f32 %v5989_v46, %v1311_v12  ;;  %v1747_v33 = vld [vmem:[%s7730_s23 + $0x70] sm:$0xff] }
 0x1e7   : > { %v1709_v48 = vadd.f32 %v1682_v26, %v1511_v35  ;;  %v1736_v26 = vld [vmem:[%s7730_s23 + $0x18] sm:$0xff] }
 0x1e8   : > { %1802 = vmatpush.msrb.mxu1 %v1714_v5  ;;  %1957 = vmatpush.msrb.mxu3 %v1714_v5  ;;  %v1707_v14 = vadd.f32 %v6012_v15, %v1509_v3  ;;  %v1739_v15 = vld [vmem:[%s7730_s23 + $0x30] sm:$0xff]  ;;  %v1749_v5 = vld [vmem:[%s7730_s23 + $0x80] sm:$0xff] }
 0x1e9   : > { %v1685_v58 = vpop.f32.mrf.mxu0  ;;  %v1730_v57 = vmax.f32 %v1709_v48, 0.0  ;;  %v2148_v48 = vld [vmem:[%s7595_s6 + $0x8] sm:$0xff]  ;;  %v2147_v3 = vld [vmem:[%s7595_s6] sm:$0xff] }
 0x1ea   : > { %1803 = vmatpush.msrb.mxu1 %v1713_v63  ;;  %1958 = vmatpush.msrb.mxu3 %v1713_v63  ;;  %v1710_v55 = vadd.f32 %v1685_v58, %v1512_v34  ;;  %v1728_v46 = vmax.f32 %v1707_v14, 0.0  ;;  %v1893_v63 = vld [vmem:[%s7736_s4 + $0x20] sm:$0xff]  ;;  %v1748_v58 = vld [vmem:[%s7730_s23 + $0x78] sm:$0xff] }
 0x1ec   : > { %1804 = vmatpush.msrb.mxu1 %v1712_v13  ;;  %1959 = vmatpush.msrb.mxu3 %v1712_v13  ;;  %v1731_v47 = vmax.f32 %v1710_v55, 0.0  ;;  %v1890_v13 = vld [vmem:[%s7736_s4 + $0x8] sm:$0xff]  ;;  %v2058_v55 = vld [vmem:[%s7737_s5 + $0x18] sm:$0xf] }
 0x1ed   : > { %1805 = vmatmul.f32.vlgmr.msrb.gmra.mxu1 %v1733_v44  ;;  %1960 = vmatmul.f32.vlgmr.msrb.gmra.mxu3 %v1889_v52  ;;  %v1752_v44 = vld [vmem:[%s7730_s23 + $0x98] sm:$0xff] }
 0x1f1   : > { %v1688_v16 = vpop.f32.mrf.mxu0 }
 0x1f2   : > { %v1711_v18 = vadd.f32 %v1688_v16, %v1513_v10  ;;  %v1906_v10 = vld [vmem:[%s7736_s4 + $0x88] sm:$0xff] }
 0x1f4   : > { %v1732_v19 = vmax.f32 %v1711_v18, 0.0  ;;  %v2150_v18 = vld [vmem:[%s7595_s6 + $0x18] sm:$0xf] }
 0x1f5   : > { %1808 = vmatmul.f32.gmra.mxu1 %v1735_v2  ;;  %1963 = vmatmul.f32.gmra.mxu3 %v1891_v54  ;;  %v2057_v2 = vld [vmem:[%s7737_s5 + $0x10] sm:$0xff] }
 0x1f6   : > { %1850 = vmatpush.msrb.mxu2 %v1732_v19  ;;  %2005 = vmatpush.msra.mxu1 %v1732_v19  ;;  %v2055_v19 = vld [vmem:[%s7737_s5] sm:$0xff] }
 0x1f7   : > { %4607 = vmatpush.msk.msra.mxu3 %vm2093_vm2, %v2150_v18 }
 0x1f8   : > { %1851 = vmatpush.msrb.mxu2 %v1731_v47  ;;  %2006 = vmatpush.msra.mxu1 %v1731_v47 }
 0x1f9   : > { %2167 = vmatpush.msra.mxu3 %v2149_v36 }
 0x1fa   : > { %1852 = vmatpush.msrb.mxu2 %v1730_v57  ;;  %2007 = vmatpush.msra.mxu1 %v1730_v57 }
 0x1fb   : > { %2168 = vmatpush.msra.mxu3 %v2148_v48 }
 0x1fc   : > { %1853 = vmatpush.msrb.mxu2 %v1729_v45  ;;  %2008 = vmatpush.msra.mxu1 %v1729_v45 }
 0x1fd   : > { %1811 = vmatmul.f32.gmra.mxu1 %v1737_v8  ;;  %1966 = vmatmul.f32.gmra.mxu3 %v1893_v63 }
 0x1fe   : > { %1854 = vmatpush.msrb.mxu2 %v1728_v46  ;;  %2009 = vmatpush.msra.mxu1 %v1728_v46 }
 0x1ff   : > { %4573 = vmatmul.msk.f32.vlgmr.msrb.gmra.mxu2 %vm1755_vm1, %v1734_v59  ;;  %2169 = vmatpush.msra.mxu3 %v2147_v3 }
 0x200   : > { %4595 = vmatpush.msk.msra.mxu2 %vm2093_vm2, %v2058_v55 }
 0x202   : > { %2110 = vmatpush.msra.mxu2 %v2057_v2 }
 0x204   : > { %2111 = vmatpush.msra.mxu2 %v2056_v38 }
 0x205   : > { %1814 = vmatmul.f32.gmra.mxu1 %v1739_v15  ;;  %1969 = vmatmul.f32.gmra.mxu3 %v1895_v9 }
 0x206   : > { %2112 = vmatpush.msra.mxu2 %v2055_v19 }
 0x207   : > { %4574 = vmatmul.msk.f32.gmra.mxu2 %vm1755_vm1, %v1736_v26 }
 0x20d   : > { %1817 = vmatmul.f32.gmra.mxu1 %v1741_v7  ;;  %1972 = vmatmul.f32.gmra.mxu3 %v1897_v53 }
 0x20f   : > { %4575 = vmatmul.msk.f32.gmra.mxu2 %vm1755_vm1, %v1738_v24 }
 0x215   : > { %1820 = vmatmul.f32.gmra.mxu1 %v1743_v25  ;;  %1975 = vmatmul.f32.gmra.mxu3 %v1899_v17 }
 0x217   : > { %4576 = vmatmul.msk.f32.gmra.mxu2 %vm1755_vm1, %v1740_v1 }
 0x21d   : > { %1823 = vmatmul.f32.gmra.mxu1 %v1745_v32  ;;  %1978 = vmatmul.f32.gmra.mxu3 %v1901_v30 }
 0x21f   : > { %4577 = vmatmul.msk.f32.gmra.mxu2 %vm1755_vm1, %v1742_v29 }
 0x225   : > { %1826 = vmatmul.f32.gmra.mxu1 %v1747_v33  ;;  %1981 = vmatmul.f32.gmra.mxu3 %v1903_v40 }
 0x227   : > { %4578 = vmatmul.msk.f32.gmra.mxu2 %vm1755_vm1, %v1744_v62 }
 0x22d   : > { %1829 = vmatmul.f32.gmra.mxu1 %v1749_v5  ;;  %1984 = vmatmul.f32.gmra.mxu3 %v1905_v39 }
 0x22f   : > { %4579 = vmatmul.msk.f32.gmra.mxu2 %vm1755_vm1, %v1746_v0 }
 0x235   : > { %1832 = vmatmul.f32.gmra.mxu1 %v1751_v49  ;;  %1987 = vmatmul.f32.gmra.mxu3 %v1907_v37 }
 0x237   : > { %4580 = vmatmul.msk.f32.gmra.mxu2 %vm1755_vm1, %v1748_v58 }
 0x23d   : > { %1835 = vmatmul.f32.gmra.mxu1 %v1753_v11  ;;  %1990 = vmatmul.f32.gmra.mxu3 %v1909_v56 }
 0x23f   : > { %4581 = vmatmul.msk.f32.gmra.mxu2 %vm1755_vm1, %v1750_v42 }
 0x245   : > { %4584 = vmatmul.msk.f32.vlgmr.msra.gmra.mxu1 %vm1755_vm1, %v1890_v13 }
 0x247   : > { %4582 = vmatmul.msk.f32.gmra.mxu2 %vm1755_vm1, %v1752_v44 }
 0x24d   : > { %4585 = vmatmul.msk.f32.gmra.mxu1 %vm1755_vm1, %v1892_v20 }
 0x24f   : > { %4583 = vmatmul.msk.f32.gmra.mxu2 %vm1755_vm1, %v1754_v21 }
 0x255   : > { %4586 = vmatmul.msk.f32.gmra.mxu1 %vm1755_vm1, %v1894_v31 }
 0x25d   : > { %4587 = vmatmul.msk.f32.gmra.mxu1 %vm1755_vm1, %v1896_v41 }
 0x265   : > { %4588 = vmatmul.msk.f32.gmra.mxu1 %vm1755_vm1, %v1898_v28 }
 0x26a   : > { %v1806_v50 = vpop.f32.mrf.mxu1 }
 0x26d   : > { %4589 = vmatmul.msk.f32.gmra.mxu1 %vm1755_vm1, %v1900_v51 }
 0x270   : > { %v1961_v14 = vpop.f32.mrf.mxu3 }
 0x272   : > { %v1809_v60 = vpop.f32.mrf.mxu1 }
 0x275   : > { %4590 = vmatmul.msk.f32.gmra.mxu1 %vm1755_vm1, %v1902_v61 }
 0x278   : > { %v1964_v8 = vpop.f32.mrf.mxu3 }
 0x27a   : > { %v1812_v22 = vpop.f32.mrf.mxu1 }
 0x27d   : > { %4591 = vmatmul.msk.f32.gmra.mxu1 %vm1755_vm1, %v1904_v4 }
 0x280   : > { %v1967_v15 = vpop.f32.mrf.mxu3 }
 0x282   : > { %v1815_v34 = vpop.f32.mrf.mxu1  ;;  %v1856_v47 = vpop.f32.mrf.mxu2 }
 0x283   : > { %v1857_v7 = vadd.f32 %v1856_v47, %v1806_v50 }
 0x285   : > { %4592 = vmatmul.msk.f32.gmra.mxu1 %vm1755_vm1, %v1906_v10 }
 0x288   : > { %v1970_v29 = vpop.f32.mrf.mxu3 }
 0x28a   : > { %v6227_v6 = vpop.f32.mrf.mxu1  ;;  %v1859_v45 = vpop.f32.mrf.mxu2 }
 0x28b   : > { %v1860_v52 = vadd.f32 %v1859_v45, %v1809_v60 }
 0x28d   : > { %4593 = vmatmul.msk.f32.gmra.mxu1 %vm1755_vm1, %v1908_v27 }
 0x290   : > { %v1973_v49 = vpop.f32.mrf.mxu3 }
 0x292   : > { %v6233_v16 = vpop.f32.mrf.mxu1  ;;  %v1862_v59 = vpop.f32.mrf.mxu2 }
 0x293   : > { %v1863_v5 = vadd.f32 %v1862_v59, %v1812_v22 }
 0x295   : > { %4594 = vmatmul.msk.f32.gmra.mxu1 %vm1755_vm1, %v1910_v23 }
 0x298   : > { %v1976_v44 = vpop.f32.mrf.mxu3 }
 0x29a   : > { %v6239_v35 = vpop.f32.mrf.mxu1  ;;  %v1865_v1 = vpop.f32.mrf.mxu2 }
 0x29b   : > { %v1866_v11 = vadd.f32 %v1865_v1, %v1815_v34 }
 0x2a0   : > { %v1979_v40 = vpop.f32.mrf.mxu3 }
 0x2a2   : > { %v6255_v12 = vpop.f32.mrf.mxu1  ;;  %v1868_v0 = vpop.f32.mrf.mxu2 }
 0x2a3   : > { %v1869_v20 = vadd.f32 %v1868_v0, %v6227_v6 }
 0x2a8   : > { %v1982_v56 = vpop.f32.mrf.mxu3 }
 0x2aa   : > { %v6269_v43 = vpop.f32.mrf.mxu1  ;;  %v1871_v53 = vpop.f32.mrf.mxu2 }
 0x2ab   : > { %v1872_v39 = vadd.f32 %v1871_v53, %v6233_v16 }
 0x2b0   : > { %v1985_v27 = vpop.f32.mrf.mxu3 }
 0x2b2   : > { %v6271_v57 = vpop.f32.mrf.mxu1  ;;  %v1874_v31 = vpop.f32.mrf.mxu2 }
 0x2b3   : > { %v1875_v60 = vadd.f32 %v1874_v31, %v6239_v35 }
 0x2b8   : > { %v1988_v36 = vpop.f32.mrf.mxu3 }
 0x2ba   : > { %v6273_v46 = vpop.f32.mrf.mxu1  ;;  %v1877_v50 = vpop.f32.mrf.mxu2 }
 0x2bb   : > { %v1878_v34 = vadd.f32 %v1877_v50, %v6255_v12 }
 0x2c0   : > { %v1991_v47 = vpop.f32.mrf.mxu3 }
 0x2c2   : > { %v2011_v26 = vpop.f32.mrf.mxu1  ;;  %v1880_v6 = vpop.f32.mrf.mxu2 }
 0x2c3   : > { %v2012_v24 = vadd.f32 %v2011_v26, %v1961_v14  ;;  %v1881_v35 = vadd.f32 %v1880_v6, %v6269_v43  ;;  %v2225_v6 = vld [vmem:[%s7597_s8 + $0x50] sm:$0xff] }
 0x2c5   : > { %v2044_v25 = vmax.f32 %v1857_v7, %v2012_v24 }
 0x2c7   : > { %4596 = vmatmul.msk.f32.vlgmr.msra.gmra.mxu2 %vm2059_vm3, %v2044_v25  ;;  %4608 = vmatmul.msk.f32.vlgmr.msra.gmra.mxu3 %vm2059_vm3, %v2044_v25 }
 0x2ca   : > { %v2014_v32 = vpop.f32.mrf.mxu1  ;;  %v1883_v2 = vpop.f32.mrf.mxu2 }
 0x2cb   : > { %v2015_v33 = vadd.f32 %v2014_v32, %v1964_v8  ;;  %v1884_v38 = vadd.f32 %v1883_v2, %v6271_v57  ;;  %v2240_v2 = vld [vmem:[%s7596_s7 + $0x28] sm:$0xff] }
 0x2cd   : > { %v2045_v62 = vmax.f32 %v1860_v52, %v2015_v33 }
 0x2cf   : > { %4597 = vmatmul.msk.f32.gmra.mxu2 %vm2059_vm3, %v2045_v62  ;;  %4609 = vmatmul.msk.f32.gmra.mxu3 %vm2059_vm3, %v2045_v62 }
 0x2d2   : > { %v2017_v54 = vpop.f32.mrf.mxu1  ;;  %v1886_v3 = vpop.f32.mrf.mxu2 }
 0x2d3   : > { %v2018_v63 = vadd.f32 %v2017_v54, %v1967_v15  ;;  %v1887_v14 = vadd.f32 %v1886_v3, %v6273_v46  ;;  %v2216_v3 = vld [vmem:[%s7597_s8 + $0x8] sm:$0xff] }
 0x2d5   : > { %v2046_v58 = vmax.f32 %v1863_v5, %v2018_v63 }
 0x2d7   : > { %4598 = vmatmul.msk.f32.gmra.mxu2 %vm2059_vm3, %v2046_v58  ;;  %4610 = vmatmul.msk.f32.gmra.mxu3 %vm2059_vm3, %v2046_v58 }
 0x2da   : > { %v2020_v9 = vpop.f32.mrf.mxu1 }
 0x2db   : > { %v2021_v42 = vadd.f32 %v2020_v9, %v1970_v29 }
 0x2dd   : > { %v2047_v13 = vmax.f32 %v1866_v11, %v2021_v42 }
 0x2df   : > { %4599 = vmatmul.msk.f32.gmra.mxu2 %vm2059_vm3, %v2047_v13  ;;  %4611 = vmatmul.msk.f32.gmra.mxu3 %vm2059_vm3, %v2047_v13 }
 0x2e2   : > { %v2023_v17 = vpop.f32.mrf.mxu1 }
 0x2e3   : > { %v2024_v21 = vadd.f32 %v2023_v17, %v1973_v49 }
 0x2e5   : > { %v2048_v30 = vmax.f32 %v1869_v20, %v2024_v21 }
 0x2e7   : > { %4600 = vmatmul.msk.f32.gmra.mxu2 %vm2059_vm3, %v2048_v30  ;;  %4612 = vmatmul.msk.f32.gmra.mxu3 %vm2059_vm3, %v2048_v30 }
 0x2ea   : > { %v2026_v41 = vpop.f32.mrf.mxu1 }
 0x2eb   : > { %v2027_v28 = vadd.f32 %v2026_v41, %v1976_v44 }
 0x2ed   : > { %v2049_v37 = vmax.f32 %v1872_v39, %v2027_v28 }
 0x2ef   : > { %4601 = vmatmul.msk.f32.gmra.mxu2 %vm2059_vm3, %v2049_v37  ;;  %4613 = vmatmul.msk.f32.gmra.mxu3 %vm2059_vm3, %v2049_v37 }
 0x2f2   : > { %v2029_v51 = vpop.f32.mrf.mxu1 }
 0x2f3   : > { %v2030_v61 = vadd.f32 %v2029_v51, %v1979_v40  ;;  %v2235_v51 = vld [vmem:[%s7596_s7] sm:$0xff] }
 0x2f5   : > { %v2050_v22 = vmax.f32 %v1875_v60, %v2030_v61  ;;  %v2236_v60 = vld [vmem:[%s7596_s7 + $0x8] sm:$0xff]  ;;  %v2237_v61 = vld [vmem:[%s7596_s7 + $0x10] sm:$0xff] }
 0x2f7   : > { %4602 = vmatmul.msk.f32.gmra.mxu2 %vm2059_vm3, %v2050_v22  ;;  %4614 = vmatmul.msk.f32.gmra.mxu3 %vm2059_vm3, %v2050_v22  ;;  %v2228_v22 = vld [vmem:[%s7597_s8 + $0x68] sm:$0xff] }
 0x2fa   : > { %v2032_v4 = vpop.f32.mrf.mxu1 }
 0x2fb   : > { %v2033_v10 = vadd.f32 %v2032_v4, %v1982_v56  ;;  %v2230_v4 = vld [vmem:[%s7597_s8 + $0x78] sm:$0xff] }
 0x2fd   : > { %v2051_v16 = vmax.f32 %v1878_v34, %v2033_v10  ;;  %v2229_v34 = vld [vmem:[%s7597_s8 + $0x70] sm:$0xff]  ;;  %v2238_v10 = vld [vmem:[%s7596_s7 + $0x18] sm:$0xff] }
 0x2ff   : > { %4603 = vmatmul.msk.f32.gmra.mxu2 %vm2059_vm3, %v2051_v16  ;;  %4615 = vmatmul.msk.f32.gmra.mxu3 %vm2059_vm3, %v2051_v16  ;;  %v2226_v16 = vld [vmem:[%s7597_s8 + $0x58] sm:$0xff] }
 0x302   : > { %v2035_v23 = vpop.f32.mrf.mxu1 }
 0x303   : > { %v2036_v55 = vadd.f32 %v2035_v23, %v1985_v27  ;;  %v2227_v27 = vld [vmem:[%s7597_s8 + $0x60] sm:$0xff] }
 0x304   : > { %v2239_v23 = vld [vmem:[%s7596_s7 + $0x20] sm:$0xff] }
 0x305   : > { %v2052_v18 = vmax.f32 %v1881_v35, %v2036_v55  ;;  %v2222_v35 = vld [vmem:[%s7597_s8 + $0x38] sm:$0xff]  ;;  %v2224_v55 = vld [vmem:[%s7597_s8 + $0x48] sm:$0xff] }
 0x307   : > { %4604 = vmatmul.msk.f32.gmra.mxu2 %vm2059_vm3, %v2052_v18  ;;  %4616 = vmatmul.msk.f32.gmra.mxu3 %vm2059_vm3, %v2052_v18  ;;  %v2223_v18 = vld [vmem:[%s7597_s8 + $0x40] sm:$0xff] }
 0x30a   : > { %v2038_v12 = vpop.f32.mrf.mxu1 }
 0x30b   : > { %v2039_v48 = vadd.f32 %v2038_v12, %v1988_v36  ;;  %v2219_v36 = vld [vmem:[%s7597_s8 + $0x20] sm:$0xff]  ;;  %v2221_v12 = vld [vmem:[%s7597_s8 + $0x30] sm:$0xff] }
 0x30d   : > { %v2053_v19 = vmax.f32 %v1884_v38, %v2039_v48  ;;  %v2220_v38 = vld [vmem:[%s7597_s8 + $0x28] sm:$0xff]  ;;  %v2241_v48 = vld [vmem:[%s7596_s7 + $0x30] sm:$0xff] }
 0x30f   : > { %4605 = vmatmul.msk.f32.gmra.mxu2 %vm2059_vm3, %v2053_v19  ;;  %4617 = vmatmul.msk.f32.gmra.mxu3 %vm2059_vm3, %v2053_v19 }
 0x312   : > { %v2041_v43 = vpop.f32.mrf.mxu1 }
 0x313   : > { %v2042_v45 = vadd.f32 %v2041_v43, %v1991_v47  ;;  %v2218_v47 = vld [vmem:[%s7597_s8 + $0x18] sm:$0xff]  ;;  %v2217_v43 = vld [vmem:[%s7597_s8 + $0x10] sm:$0xff] }
 0x315   : > { %v2054_v8 = vmax.f32 %v1887_v14, %v2042_v45  ;;  %v2242_v14 = vld [vmem:[%s7596_s7 + $0x38] sm:$0xff] }
 0x317   : > { %4606 = vmatmul.msk.f32.gmra.mxu2 %vm2059_vm3, %v2054_v8  ;;  %4618 = vmatmul.msk.f32.gmra.mxu3 %vm2059_vm3, %v2054_v8  ;;  %v2233_v8 = vld [vmem:[%s7597_s8 + $0x90] sm:$0xff] }
 0x34a   : > { %v2114_v59 = vpop.f32.mrf.mxu2  ;;  %v2171_v15 = vpop.f32.mrf.mxu3 }
 0x34b   : > { %v2204_v50 = vmax.f32 %v2114_v59, %v2171_v15  ;;  %v2215_v59 = vld [vmem:[%s7597_s8] sm:$0xff]  ;;  %v2234_v15 = vld [vmem:[%s7597_s8 + $0x98] sm:$0xff] }
 0x352   : > { %v2117_v57 = vpop.f32.mrf.mxu2  ;;  %v2174_v26 = vpop.f32.mrf.mxu3 }
 0x353   : > { %v2205_v37 = vmax.f32 %v2117_v57, %v2174_v26  ;;  %v2243_v57 = vld [vmem:[%s7596_s7 + $0x40] sm:$0xff] }
 0x355   : > { %v5055_v56 = vpack.i.bf16 %v2204_v50, %v2205_v37 }
 0x35a   : > { %v2120_v7 = vpop.f32.mrf.mxu2  ;;  %v2177_v24 = vpop.f32.mrf.mxu3 }
 0x35b   : > { %v2206_v39 = vmax.f32 %v2120_v7, %v2177_v24  ;;  %v2232_v7 = vld [vmem:[%s7597_s8 + $0x88] sm:$0xff]  ;;  %v2231_v24 = vld [vmem:[%s7597_s8 + $0x80] sm:$0xff] }
 0x362   : > { %v2123_v25 = vpop.f32.mrf.mxu2  ;;  %v2180_v1 = vpop.f32.mrf.mxu3 }
 0x363   : > { %v2207_v41 = vmax.f32 %v2123_v25, %v2180_v1  ;;  %v2244_v25 = vld [vmem:[%s7596_s7 + $0x48] sm:$0xff] }
 0x365   : > { %v5035_v28 = vpack.i.bf16 %v2206_v39, %v2207_v41 }
 0x36a   : > { %v2126_v32 = vpop.f32.mrf.mxu2  ;;  %v2183_v29 = vpop.f32.mrf.mxu3 }
 0x36b   : > { %v2208_v62 = vmax.f32 %v2126_v32, %v2183_v29 }
 0x372   : > { %v2129_v52 = vpop.f32.mrf.mxu2  ;;  %v2186_v33 = vpop.f32.mrf.mxu3 }
 0x373   : > { %v2209_v46 = vmax.f32 %v2129_v52, %v2186_v33  ;;  %v2245_v52 = vld [vmem:[%s7596_s7 + $0x50] sm:$0xff] }
 0x375   : > { %v4995_v54 = vpack.i.bf16 %v2208_v62, %v2209_v46 }
 0x377   : > { %4996 = vrot.lane.b32.xlu1 %v4995_v54, %s7738_s2  ;;  %4991 = vrot.lane.b32.xlu2 %v4995_v54, %s7739_s0 }
 0x378   : > { %4986 = vrot.lane.b32.xlu0 %v4995_v54, %s7740_s25 }
 0x37a   : > { %v2132_v5 = vpop.f32.mrf.mxu2  ;;  %v2189_v0 = vpop.f32.mrf.mxu3 }
 0x37b   : > { %v2210_v58 = vmax.f32 %v2132_v5, %v2189_v0  ;;  %v2247_v0 = vld [vmem:[%s7596_s7 + $0x60] sm:$0xff] }
 0x382   : > { %v2135_v63 = vpop.f32.mrf.mxu2  ;;  %v2192_v49 = vpop.f32.mrf.mxu3 }
 0x383   : > { %v2211_v9 = vmax.f32 %v2135_v63, %v2192_v49 }
 0x385   : > { %v5010_v11 = vpack.i.bf16 %v2210_v58, %v2211_v9 }
 0x387   : > { %5011 = vrot.lane.b32.xlu2 %v5010_v11, %s7738_s2  ;;  %5006 = vrot.lane.b32.xlu1 %v5010_v11, %s7739_s0 }
 0x388   : > { %5001 = vrot.lane.b32.xlu0 %v5010_v11, %s7740_s25 }
 0x38a   : > { %v2138_v42 = vpop.f32.mrf.mxu2  ;;  %v2195_v53 = vpop.f32.mrf.mxu3 }
 0x38b   : > { %v2212_v17 = vmax.f32 %v2138_v42, %v2195_v53 }
 0x392   : > { %v2141_v13 = vpop.f32.mrf.mxu2  ;;  %v2198_v44 = vpop.f32.mrf.mxu3 }
 0x393   : > { %v2213_v20 = vmax.f32 %v2141_v13, %v2198_v44 }
 0x395   : > { %v5030_v21 = vpack.i.bf16 %v2212_v17, %v2213_v20 }
 0x397   : > { %5031 = vrot.lane.b32.xlu0 %v5030_v21, %s7741_s22  ;;  %5026 = vrot.lane.b32.xlu2 %v5030_v21, %s7738_s2 }
 0x398   : > { %5016 = vrot.lane.b32.xlu1 %v5030_v21, %s7740_s25 }
 0x39a   : > { %v2144_v30 = vpop.f32.mrf.mxu2  ;;  %v2201_v31 = vpop.f32.mrf.mxu3 }
 0x39b   : > { %v2214_v40 = vmax.f32 %v2144_v30, %v2201_v31 }
 0x39d   : > { %4619 = vmatpush.msk.msra.mxu0 %vm2093_vm2, %v2214_v40 }
 0x39f   : > { %2991 = vrot.lane.b32.xlu2 %v2214_v40, %s7739_s0  ;;  %2779 = vrot.lane.b32.xlu0 %v2214_v40, %s7740_s25 }
 0x3a0   : > { %5021 = vrot.lane.b32.xlu1 %v5030_v21, %s7739_s0  ;;  %2325 = vmatpush.msra.mxu0 %v2213_v20  ;;  %v2248_v20 = vld [vmem:[%s7596_s7 + $0x68] sm:$0xff] }
 0x3a2   : > { %2326 = vmatpush.msra.mxu0 %v2212_v17 }
 0x3a4   : > { %2327 = vmatpush.msra.mxu0 %v2211_v9 }
 0x3a6   : > { %2328 = vmatpush.msra.mxu0 %v2210_v58 }
 0x3a7   : > { %5036 = vrot.lane.b32.xlu2 %v5035_v28, %s7740_s25  ;;  %2567 = vrot.lane.b32.xlu0 %v2214_v40, %s7738_s2 }
 0x3a8   : > { %5046 = vrot.lane.b32.xlu1 %v5010_v11, %s7741_s22  ;;  %2329 = vmatpush.msra.mxu0 %v2209_v46  ;;  %v2246_v46 = vld [vmem:[%s7596_s7 + $0x58] sm:$0xff] }
 0x3aa   : > { %2330 = vmatpush.msra.mxu0 %v2208_v62 }
 0x3ac   : > { %2331 = vmatpush.msra.mxu0 %v2207_v41 }
 0x3ae   : > { %2332 = vmatpush.msra.mxu0 %v2206_v39 }
 0x3af   : > { %5051 = vrot.lane.b32.xlu2 %v5035_v28, %s7738_s2  ;;  %5041 = vrot.lane.b32.xlu0 %v5035_v28, %s7739_s0 }
 0x3b0   : > { %3203 = vrot.lane.b32.xlu1 %v2214_v40, %s7741_s22  ;;  %2333 = vmatpush.msra.mxu0 %v2205_v37 }
 0x3b2   : > { %2334 = vmatpush.msra.mxu0 %v2204_v50 }
 0x3b3   : > { %4620 = vmatmul.msk.f32.vlgmr.msra.gmra.mxu0 %vm2255_vm4, %v2235_v51 }
 0x3b7   : > { %5066 = vrot.lane.b32.xlu2 %v4995_v54, %s7741_s22  ;;  %5056 = vrot.lane.b32.xlu0 %v5055_v56, %s7740_s25  ;;  %s593_s25 = sand.u32 1, %s5183_s30  }
 0x3b8   : > { %5061 = vrot.lane.b32.xlu1 %v5055_v56, %s7739_s0  ;;  %s594_s28 = scalar_lea.vmem [#allocation2], %s593_s25 }
 0x3b9   : > { %s4321_s20 = sshll.u32 %s594_s28, 4  ;;  %s4322_s20 = int_to_ptr.vmem [resolvable:$true] %s4321_s20 }
 0x3bb   : > { %4621 = vmatmul.msk.f32.gmra.mxu0 %vm2255_vm4, %v2236_v60 }
 0x3bf   : > { %5081 = vrot.lane.b32.xlu2 %v5055_v56, %s7741_s22  ;;  %5071 = vrot.lane.b32.xlu0 %v5055_v56, %s7738_s2  ;;  %s4323_s2 = sshll.u32 %s4319_s24, 4  ;;  %s4324_s2 = int_to_ptr.hbm [resolvable:$true] %s4323_s2 }
 0x3c0   : > { %5076 = vrot.lane.b32.xlu1 %v5035_v28, %s7741_s22  ;;  %s4311_s22 = scalar_lea.sflag [#allocation3], %s593_s25  ;;  %s5143_s29 = sshra.s32 %s4324_s2, 4  ;;  %s5144_s29 = int_to_ptr.hbm [resolvable:$true] %s5143_s29 }
 0x3c1   : > { %s5145_s27 = scalar_lea.hbm %s5144_s29, 1  ;;  %p5150_p0 = scmp.lt.s32.totalorder %s5144_s29, %s7608_s19 }
 0x3c2   : > { %p5146_p11 = scmp.ne.s32.totalorder %s5144_s29, %s5145_s27  ;;  %p5151_p1 = scmp.lt.s32.totalorder %s5149_s1, %s5145_s27 }
 0x3c3   : > { %4622 = vmatmul.msk.f32.gmra.mxu0 %vm2255_vm4, %v2237_v61 }
 0x3c4   : > { %p5147_p12 = pnand %p5146_p11, %p5341_p5  ;;  %p5152_p2 = por %p5151_p1, %p5150_p0 }
 0x3c6   : > { %p5148_p13 = pneg %p5147_p12 }
 0x3c7   : > { %2463 = vperm.xlu2 %4982, %v2228_v22   ;;  %2473 = vperm.xlu0 %4983, %v2230_v4   ;;  %v2249_v4 = vld [vmem:[%s7596_s7 + $0x70] sm:$0xff] }
 0x3c8   : > { %2468 = vperm.xlu1 %4984, %v2229_v34   ;;  %p5153_p3 = pnand %p5152_p2, %p5148_p13 }
 0x3cb   : > { %4623 = vmatmul.msk.f32.gmra.mxu0 %vm2255_vm4, %v2238_v10 }
 0x3cf   : > { %2448 = vperm.xlu2 %4982, %v2225_v6   ;;  %2458 = vperm.xlu0 %4983, %v2227_v27  }
 0x3d0   : > { %2453 = vperm.xlu1 %4984, %v2226_v16  }
 0x3d1   : > { %v6392_v19 = vpop.permute.xlu2 %4991 }
 0x3d2   : > { %v4993_v39 = vunpack.i.l.bf16 %v6392_v19  ;;  %v4994_v50 = vunpack.i.h.bf16 %v6392_v19 }
 0x3d3   : > { %4624 = vmatmul.msk.f32.gmra.mxu0 %vm2255_vm4, %v2239_v23 }
 0x3d7   : > { %2433 = vperm.xlu2 %4982, %v2222_v35   ;;  %2443 = vperm.xlu0 %4983, %v2224_v55  }
 0x3d8   : > { %2438 = vperm.xlu1 %4984, %v2223_v18  }
 0x3db   : > { %4625 = vmatmul.msk.f32.gmra.mxu0 %vm2255_vm4, %v2240_v2 }
 0x3df   : > { %2418 = vperm.xlu2 %4982, %v2219_v36   ;;  %2428 = vperm.xlu0 %4983, %v2221_v12   ;;  %v2250_v12 = vld [vmem:[%s7596_s7 + $0x78] sm:$0xff] }
 0x3e0   : > { %2423 = vperm.xlu1 %4984, %v2220_v38  }
 0x3e1   : > { %v6407_v45 = vpop.permute.xlu2 %5011 }
 0x3e2   : > { %v5013_v51 = vunpack.i.l.bf16 %v6407_v45  ;;  %v5014_v61 = vunpack.i.h.bf16 %v6407_v45 }
 0x3e3   : > { %4626 = vmatmul.msk.f32.gmra.mxu0 %vm2255_vm4, %v2241_v48 }
 0x3e7   : > { %2403 = vperm.xlu2 %4982, %v2216_v3   ;;  %2413 = vperm.xlu0 %4983, %v2218_v47  }
 0x3e8   : > { %2408 = vperm.xlu1 %4984, %v2217_v43  }
 0x3e9   : > { %v6432_v29 = vpop.permute.xlu1 %4996 }
 0x3ea   : > { %v4987_v1 = vpop.permute.xlu0 %4986  ;;  %v4998_v10 = vunpack.i.l.bf16 %v6432_v29  ;;  %v4999_v16 = vunpack.i.h.bf16 %v6432_v29 }
 0x3eb   : > { %4627 = vmatmul.msk.f32.gmra.mxu0 %vm2255_vm4, %v2242_v14  ;;  %v4988_v31 = vunpack.i.l.bf16 %v4987_v1  ;;  %v4989_v28 = vunpack.i.h.bf16 %v4987_v1 }
 0x3ef   : > { %2488 = vperm.xlu2 %4982, %v2233_v8   ;;  %2398 = vperm.xlu0 %4983, %v2215_v59   ;;  %v4681_v8 = vld [vmem:[%s7596_s7 + $0x140] sm:$0xff] }
 0x3f0   : > { %2493 = vperm.xlu1 %4984, %v2234_v15   ;;  %v4722_v15 = vld [vmem:[%s7596_s7 + $0x1e0] sm:$0xff] }
 0x3f1   : > { %v5027_v26 = vpop.permute.xlu2 %5026 }
 0x3f2   : > { %v5028_v40 = vunpack.i.l.bf16 %v5027_v26  ;;  %v5029_v37 = vunpack.i.h.bf16 %v5027_v26 }
 0x3f3   : > { %4628 = vmatmul.msk.f32.gmra.mxu0 %vm2255_vm4, %v2243_v57 }
 0x3f7   : > { %2483 = vperm.xlu0 %4983, %v2232_v7   ;;  %v2251_v7 = vld [vmem:[%s7596_s7 + $0x80] sm:$0xff] }
 0x3f8   : > { %2478 = vperm.xlu1 %4984, %v2231_v24  }
 0x3f9   : > { %v2992_v32 = vpop.permute.xlu2 %2991  ;;  %v5007_v62 = vpop.permute.xlu1 %5006 }
 0x3fa   : > { %4742 = vmatpush.msk.msrb.mxu3 %vm2093_vm2, %v2992_v32  ;;  %v5002_v33 = vpop.permute.xlu0 %5001  ;;  %v5008_v44 = vunpack.i.l.bf16 %v5007_v62  ;;  %v5009_v21 = vunpack.i.h.bf16 %v5007_v62 }
 0x3fb   : > { %4629 = vmatmul.msk.f32.gmra.mxu0 %vm2255_vm4, %v2244_v25  ;;  %v5003_v13 = vunpack.i.l.bf16 %v5002_v33  ;;  %v5004_v17 = vunpack.i.h.bf16 %v5002_v33  ;;  %v4640_v33 = vld [vmem:[%s7596_s7 + $0xa0] sm:$0xff] }
 0x401   : > { %v5037_v42 = vpop.permute.xlu2 %5036 }
 0x402   : > { %v5038_v56 = vunpack.i.l.bf16 %v5037_v42  ;;  %v5039_v22 = vunpack.i.h.bf16 %v5037_v42 }
 0x403   : > { %4630 = vmatmul.msk.f32.gmra.mxu0 %vm2255_vm4, %v2245_v52 }
 0x409   : > { %v6443_v54 = vpop.permute.xlu0 %5031  ;;  %v5052_v60 = vpop.permute.xlu2 %5051 }
 0x40a   : > { %v5017_v5 = vpop.permute.xlu1 %5016  ;;  %v5033_v23 = vunpack.i.l.bf16 %v6443_v54  ;;  %v5034_v55 = vunpack.i.h.bf16 %v6443_v54  ;;  %v5053_v18 = vunpack.i.l.bf16 %v5052_v60  ;;  %v5054_v2 = vunpack.i.h.bf16 %v5052_v60  ;;  %v4723_v54 = vld [vmem:[%s7596_s7 + $0x1e8] sm:$0xff] }
 0x40b   : > { %4631 = vmatmul.msk.f32.gmra.mxu0 %vm2255_vm4, %v2246_v46  ;;  %v5018_v49 = vunpack.i.l.bf16 %v5017_v5  ;;  %v5019_v11 = vunpack.i.h.bf16 %v5017_v5  ;;  %v4682_v46 = vld [vmem:[%s7596_s7 + $0x148] sm:$0xff] }
 0x40c   : > { %v4645_v60 = vld [vmem:[%s7596_s7 + $0xc8] sm:$0xff] }
 0x411   : > { %v2780_v63 = vpop.permute.xlu0 %2779  ;;  %v5067_v38 = vpop.permute.xlu2 %5066 }
 0x412   : > { %v5022_v58 = vpop.permute.xlu1 %5021  ;;  %4701 = vmatpush.msk.msrb.mxu2 %vm2093_vm2, %v2780_v63  ;;  %v5068_v14 = vunpack.i.l.bf16 %v5067_v38  ;;  %v5069_v57 = vunpack.i.h.bf16 %v5067_v38  ;;  %v2252_v63 = vld [vmem:[%s7596_s7 + $0x88] sm:$0xff] }
 0x413   : > { %v5023_v9 = vunpack.i.l.bf16 %v5022_v58  ;;  %4632 = vmatmul.msk.f32.gmra.mxu0 %vm2255_vm4, %v2247_v0  ;;  %v5024_v53 = vunpack.i.h.bf16 %v5022_v58  ;;  %v4641_v58 = vld [vmem:[%s7596_s7 + $0xa8] sm:$0xff] }
 0x414   : > { %2859 = vmatpush.msrb.mxu2 %v5018_v49  ;;  %v4690_v38 = vld [vmem:[%s7596_s7 + $0x188] sm:$0xff] }
 0x415   : > { %3071 = vmatpush.msrb.mxu3 %v5023_v9  ;;  %v4683_v9 = vld [vmem:[%s7596_s7 + $0x150] sm:$0xff] }
 0x416   : > { %2860 = vmatpush.msrb.mxu2 %v5019_v11  ;;  %v4724_v11 = vld [vmem:[%s7596_s7 + $0x1f0] sm:$0xff] }
 0x417   : > { %3072 = vmatpush.msrb.mxu3 %v5024_v53  ;;  %v2253_v53 = vld [vmem:[%s7596_s7 + $0x90] sm:$0xff] }
 0x418   : > { %2861 = vmatpush.msrb.mxu2 %v5003_v13  ;;  %v4642_v13 = vld [vmem:[%s7596_s7 + $0xb0] sm:$0xff] }
 0x419   : > { %3073 = vmatpush.msrb.mxu3 %v5008_v44  ;;  %v2568_v30 = vpop.permute.xlu0 %2567  ;;  %v5082_v29 = vpop.permute.xlu2 %5081  ;;  %v4684_v44 = vld [vmem:[%s7596_s7 + $0x158] sm:$0xff] }
 0x41a   : > { %v5047_v41 = vpop.permute.xlu1 %5046  ;;  %4660 = vmatpush.msk.msrb.mxu1 %vm2093_vm2, %v2568_v30  ;;  %2862 = vmatpush.msrb.mxu2 %v5004_v17  ;;  %v5083_v5 = vunpack.i.l.bf16 %v5082_v29  ;;  %v5084_v49 = vunpack.i.h.bf16 %v5082_v29  ;;  %v4725_v17 = vld [vmem:[%s7596_s7 + $0x1f8] sm:$0xff] }
 0x41b   : > { %4633 = vmatmul.msk.f32.gmra.mxu0 %vm2255_vm4, %v2248_v20  ;;  %3074 = vmatpush.msrb.mxu3 %v5009_v21  ;;  %v5048_v36 = vunpack.i.l.bf16 %v5047_v41  ;;  %v5049_v19 = vunpack.i.h.bf16 %v5047_v41  ;;  %v2254_v21 = vld [vmem:[%s7596_s7 + $0x98] sm:$0xff] }
 0x41c   : > { %2647 = vmatpush.msrb.mxu1 %v5028_v40  ;;  %2863 = vmatpush.msrb.mxu2 %v4988_v31  ;;  %v4643_v30 = vld [vmem:[%s7596_s7 + $0xb8] sm:$0xff]  ;;  %v4685_v31 = vld [vmem:[%s7596_s7 + $0x160] sm:$0xff] }
 0x41d   : > { %3075 = vmatpush.msrb.mxu3 %v4993_v39  ;;  %v4726_v40 = vld [vmem:[%s7596_s7 + $0x200] sm:$0xff] }
 0x41e   : > { %2648 = vmatpush.msrb.mxu1 %v5029_v37  ;;  %2864 = vmatpush.msrb.mxu2 %v4989_v28  ;;  %v4763_v39 = vld [vmem:[%s7596_s7 + $0x280] sm:$0xff]  ;;  %v4686_v37 = vld [vmem:[%s7596_s7 + $0x168] sm:$0xff] }
 0x41f   : > { %3076 = vmatpush.msrb.mxu3 %v4994_v50  ;;  %v4644_v28 = vld [vmem:[%s7596_s7 + $0xc0] sm:$0xff]  ;;  %v4727_v50 = vld [vmem:[%s7596_s7 + $0x208] sm:$0xff] }
 0x420   : > { %2649 = vmatpush.msrb.mxu1 %v5013_v51  ;;  %2865 = vmatpush.msrb.mxu2 %v5038_v56  ;;  %v4764_v56 = vld [vmem:[%s7596_s7 + $0x288] sm:$0xff] }
 0x421   : > { %v5042_v34 = vpop.permute.xlu0 %5041 }
 0x422   : > { %v3204_v6 = vpop.permute.xlu1 %3203  ;;  %v5043_v27 = vunpack.i.l.bf16 %v5042_v34  ;;  %2650 = vmatpush.msrb.mxu1 %v5014_v61  ;;  %2866 = vmatpush.msrb.mxu2 %v5039_v22  ;;  %v5044_v35 = vunpack.i.h.bf16 %v5042_v34  ;;  %v4687_v61 = vld [vmem:[%s7596_s7 + $0x170] sm:$0xff] }
 0x423   : > { %4634 = vmatmul.msk.f32.gmra.mxu0 %vm2255_vm4, %v2249_v4  ;;  %v4728_v22 = vld [vmem:[%s7596_s7 + $0x210] sm:$0xff] }
 0x424   : > { %4783 = vmatpush.msk.msrb.mxu0 %vm2093_vm2, %v3204_v6  ;;  %2651 = vmatpush.msrb.mxu1 %v4998_v10  ;;  %v4765_v34 = vld [vmem:[%s7596_s7 + $0x290] sm:$0xff]  ;;  %v4688_v6 = vld [vmem:[%s7596_s7 + $0x178] sm:$0xff] }
 0x425   : > { %3077 = vmatpush.msrb.mxu3 %v5043_v27  ;;  %v4646_v10 = vld [vmem:[%s7596_s7 + $0xd0] sm:$0xff]  ;;  %v4729_v27 = vld [vmem:[%s7596_s7 + $0x218] sm:$0xff] }
 0x426   : > { %3283 = vmatpush.msrb.mxu0 %v5033_v23  ;;  %2652 = vmatpush.msrb.mxu1 %v4999_v16  ;;  %v4766_v23 = vld [vmem:[%s7596_s7 + $0x298] sm:$0xff] }
 0x427   : > { %3078 = vmatpush.msrb.mxu3 %v5044_v35  ;;  %v4647_v35 = vld [vmem:[%s7596_s7 + $0xd8] sm:$0xff] }
 0x428   : > { %3284 = vmatpush.msrb.mxu0 %v5034_v55  ;;  %2653 = vmatpush.msrb.mxu1 %v5053_v18  ;;  %v4689_v55 = vld [vmem:[%s7596_s7 + $0x180] sm:$0xff] }
 0x429   : > { %v5057_v48 = vpop.permute.xlu0 %5056  ;;  %v4730_v18 = vld [vmem:[%s7596_s7 + $0x220] sm:$0xff] }
 0x42a   : > { %3285 = vmatpush.msrb.mxu0 %v5048_v36  ;;  %v5062_v3 = vpop.permute.xlu1 %5061  ;;  %v5058_v47 = vunpack.i.l.bf16 %v5057_v48  ;;  %2654 = vmatpush.msrb.mxu1 %v5054_v2  ;;  %v5059_v45 = vunpack.i.h.bf16 %v5057_v48  ;;  %v4767_v36 = vld [vmem:[%s7596_s7 + $0x2a0] sm:$0xff]  ;;  %v4731_v48 = vld [vmem:[%s7596_s7 + $0x228] sm:$0xff] }
 0x42b   : > { %v5063_v43 = vunpack.i.l.bf16 %v5062_v3  ;;  %4635 = vmatmul.msk.f32.gmra.mxu0 %vm2255_vm4, %v2250_v12  ;;  %v5064_v59 = vunpack.i.h.bf16 %v5062_v3  ;;  %v4648_v12 = vld [vmem:[%s7596_s7 + $0xe0] sm:$0xff]  ;;  %v4768_v3 = vld [vmem:[%s7596_s7 + $0x2a8] sm:$0xff] }
 0x42c   : > { %3286 = vmatpush.msrb.mxu0 %v5049_v19  ;;  %2867 = vmatpush.msrb.mxu2 %v5058_v47  ;;  %v4649_v47 = vld [vmem:[%s7596_s7 + $0xe8] sm:$0xff] }
 0x42d   : > { %3079 = vmatpush.msrb.mxu3 %v5063_v43  ;;  %v4691_v43 = vld [vmem:[%s7596_s7 + $0x190] sm:$0xff] }
 0x42e   : > { %3287 = vmatpush.msrb.mxu0 %v5068_v14  ;;  %2868 = vmatpush.msrb.mxu2 %v5059_v45  ;;  %v4732_v14 = vld [vmem:[%s7596_s7 + $0x230] sm:$0xff] }
 0x42f   : > { %3080 = vmatpush.msrb.mxu3 %v5064_v59  ;;  %4702 = vmatmul.msk.f32.vlgmr.msrb.gmra.mxu2 %vm2255_vm4, %v4681_v8  ;;  %v4769_v8 = vld [vmem:[%s7596_s7 + $0x2b0] sm:$0xff] }
 0x430   : > { %3288 = vmatpush.msrb.mxu0 %v5069_v57  ;;  %v6480_v26 = vpop.f32.mrf.mxu0  ;;  %4743 = vmatmul.msk.f32.vlgmr.msrb.gmra.mxu3 %vm2255_vm4, %v4722_v15  ;;  %v4650_v59 = vld [vmem:[%s7596_s7 + $0xf0] sm:$0xff]  ;;  %v4692_v15 = vld [vmem:[%s7596_s7 + $0x198] sm:$0xff] }
 0x431   : > { %v5072_v24 = vpop.permute.xlu0 %5071  ;;  %v4733_v57 = vld [vmem:[%s7596_s7 + $0x238] sm:$0xff] }
 0x432   : > { %v5077_v25 = vpop.permute.xlu1 %5076  ;;  %v5073_v1 = vunpack.i.l.bf16 %v5072_v24  ;;  %v5074_v52 = vunpack.i.h.bf16 %v5072_v24  ;;  %v4770_v24 = vld [vmem:[%s7596_s7 + $0x2b8] sm:$0xff] }
 0x433   : > { %v5078_v32 = vunpack.i.l.bf16 %v5077_v25  ;;  %4636 = vmatmul.msk.f32.gmra.mxu0 %vm2255_vm4, %v2251_v7  ;;  %v5079_v62 = vunpack.i.h.bf16 %v5077_v25  ;;  %v4651_v25 = vld [vmem:[%s7596_s7 + $0xf8] sm:$0xff] }
 0x434   : > { %2655 = vmatpush.msrb.mxu1 %v5073_v1  ;;  %v4693_v1 = vld [vmem:[%s7596_s7 + $0x1a0] sm:$0xff] }
 0x435   : > { %3289 = vmatpush.msrb.mxu0 %v5078_v32  ;;  %v4734_v32 = vld [vmem:[%s7596_s7 + $0x240] sm:$0xff] }
 0x436   : > { %2656 = vmatpush.msrb.mxu1 %v5074_v52 }
 0x437   : > { %3290 = vmatpush.msrb.mxu0 %v5079_v62  ;;  %4661 = vmatmul.msk.f32.vlgmr.msrb.gmra.mxu1 %vm2255_vm4, %v4640_v33  ;;  %v4771_v33 = vld [vmem:[%s7596_s7 + $0x2c0] sm:$0xff] }
 0x438   : > { %v6497_v0 = vpop.f32.mrf.mxu0  ;;  %4703 = vmatmul.msk.f32.gmra.mxu2 %vm2255_vm4, %v4682_v46  ;;  %4744 = vmatmul.msk.f32.gmra.mxu3 %vm2255_vm4, %v4723_v54  ;;  %v4652_v62 = vld [vmem:[%s7596_s7 + $0x100] sm:$0xff]  ;;  %v4694_v46 = vld [vmem:[%s7596_s7 + $0x1a8] sm:$0xff] }
 0x439   : > { %3291 = vmatpush.msrb.mxu0 %v5083_v5  ;;  %v6695_v29 = vpop.permute.xlu0 %2473  ;;  %v4735_v54 = vld [vmem:[%s7596_s7 + $0x248] sm:$0xff] }
 0x43b   : > { %4637 = vmatmul.msk.f32.gmra.mxu0 %vm2255_vm4, %v2252_v63  ;;  %v4772_v63 = vld [vmem:[%s7596_s7 + $0x2c8] sm:$0xff] }
 0x43c   : > { %3292 = vmatpush.msrb.mxu0 %v5084_v49 }
 0x43f   : > { %4662 = vmatmul.msk.f32.gmra.mxu1 %vm2255_vm4, %v4641_v58  ;;  %v4653_v58 = vld [vmem:[%s7596_s7 + $0x108] sm:$0xff] }
 0x440   : > { %v6515_v42 = vpop.f32.mrf.mxu0  ;;  %4704 = vmatmul.msk.f32.gmra.mxu2 %vm2255_vm4, %v4683_v9  ;;  %4745 = vmatmul.msk.f32.gmra.mxu3 %vm2255_vm4, %v4724_v11  ;;  %v4695_v9 = vld [vmem:[%s7596_s7 + $0x1b0] sm:$0xff] }
 0x441   : > { %v6722_v49 = vpop.permute.xlu0 %2458  ;;  %v4736_v11 = vld [vmem:[%s7596_s7 + $0x250] sm:$0xff] }
 0x443   : > { %4638 = vmatmul.msk.f32.gmra.mxu0 %vm2255_vm4, %v2253_v53 }
 0x447   : > { %4663 = vmatmul.msk.f32.gmra.mxu1 %vm2255_vm4, %v4642_v13  ;;  %v4773_v13 = vld [vmem:[%s7596_s7 + $0x2d0] sm:$0xff] }
 0x448   : > { %v6533_v20 = vpop.f32.mrf.mxu0  ;;  %4705 = vmatmul.msk.f32.gmra.mxu2 %vm2255_vm4, %v4684_v44  ;;  %4746 = vmatmul.msk.f32.gmra.mxu3 %vm2255_vm4, %v4725_v17  ;;  %v6742_v44 = vpop.permute.xlu2 %2463 }
 0x449   : > { %v6745_v17 = vpop.permute.xlu0 %2443 }
 0x44b   : > { %4639 = vmatmul.msk.f32.gmra.mxu0 %vm2255_vm4, %v2254_v21  ;;  %v4654_v21 = vld [vmem:[%s7596_s7 + $0x110] sm:$0xff] }
 0x44f   : > { %4664 = vmatmul.msk.f32.gmra.mxu1 %vm2255_vm4, %v4643_v30  ;;  %v4696_v30 = vld [vmem:[%s7596_s7 + $0x1b8] sm:$0xff] }
 0x450   : > { %v6551_v41 = vpop.f32.mrf.mxu0  ;;  %4706 = vmatmul.msk.f32.gmra.mxu2 %vm2255_vm4, %v4685_v31  ;;  %4747 = vmatmul.msk.f32.gmra.mxu3 %vm2255_vm4, %v4726_v40  ;;  %v4737_v31 = vld [vmem:[%s7596_s7 + $0x258] sm:$0xff] }
 0x453   : > { %4784 = vmatmul.msk.f32.vlgmr.msrb.gmra.mxu0 %vm2255_vm4, %v4763_v39  ;;  %v4774_v39 = vld [vmem:[%s7596_s7 + $0x2d8] sm:$0xff] }
 0x457   : > { %4665 = vmatmul.msk.f32.gmra.mxu1 %vm2255_vm4, %v4644_v28  ;;  %v6764_v28 = vpop.permute.xlu1 %2468 }
 0x458   : > { %v6569_v51 = vpop.f32.mrf.mxu0  ;;  %4707 = vmatmul.msk.f32.gmra.mxu2 %vm2255_vm4, %v4686_v37  ;;  %4748 = vmatmul.msk.f32.gmra.mxu3 %vm2255_vm4, %v4727_v50  ;;  %v6767_v37 = vpop.permute.xlu2 %2448  ;;  %v4655_v50 = vld [vmem:[%s7596_s7 + $0x118] sm:$0xff] }
 0x45b   : > { %4785 = vmatmul.msk.f32.gmra.mxu0 %vm2255_vm4, %v4764_v56  ;;  %v4697_v56 = vld [vmem:[%s7596_s7 + $0x1c0] sm:$0xff] }
 0x45f   : > { %4666 = vmatmul.msk.f32.gmra.mxu1 %vm2255_vm4, %v4645_v60  ;;  %v4738_v60 = vld [vmem:[%s7596_s7 + $0x260] sm:$0xff] }
 0x460   : > { %v6587_v4 = vpop.f32.mrf.mxu0  ;;  %4708 = vmatmul.msk.f32.gmra.mxu2 %vm2255_vm4, %v4687_v61  ;;  %4749 = vmatmul.msk.f32.gmra.mxu3 %vm2255_vm4, %v4728_v22  ;;  %v6778_v61 = vpop.permute.xlu0 %2428 }
 0x463   : > { %4786 = vmatmul.msk.f32.gmra.mxu0 %vm2255_vm4, %v4765_v34  ;;  %v4775_v34 = vld [vmem:[%s7596_s7 + $0x2e0] sm:$0xff] }
 0x467   : > { %4667 = vmatmul.msk.f32.gmra.mxu1 %vm2255_vm4, %v4646_v10 }
 0x468   : > { %v6605_v16 = vpop.f32.mrf.mxu0  ;;  %4709 = vmatmul.msk.f32.gmra.mxu2 %vm2255_vm4, %v4688_v6  ;;  %4750 = vmatmul.msk.f32.gmra.mxu3 %vm2255_vm4, %v4729_v27  ;;  %v6789_v27 = vpop.permute.xlu1 %2453 }
 0x46b   : > { %4787 = vmatmul.msk.f32.gmra.mxu0 %vm2255_vm4, %v4766_v23 }
 0x46f   : > { %4668 = vmatmul.msk.f32.gmra.mxu1 %vm2255_vm4, %v4647_v35  ;;  %v4656_v35 = vld [vmem:[%s7596_s7 + $0x120] sm:$0xff] }
 0x470   : > { %v6623_v2 = vpop.f32.mrf.mxu0  ;;  %4710 = vmatmul.msk.f32.gmra.mxu2 %vm2255_vm4, %v4689_v55  ;;  %4751 = vmatmul.msk.f32.gmra.mxu3 %vm2255_vm4, %v4730_v18  ;;  %v4698_v55 = vld [vmem:[%s7596_s7 + $0x1c8] sm:$0xff] }
 0x471   : > { %v4739_v18 = vld [vmem:[%s7596_s7 + $0x268] sm:$0xff] }
 0x473   : > { %4788 = vmatmul.msk.f32.gmra.mxu0 %vm2255_vm4, %v4767_v36  ;;  %v6800_v36 = vpop.permute.xlu2 %2433 }
 0x477   : > { %4669 = vmatmul.msk.f32.gmra.mxu1 %vm2255_vm4, %v4648_v12  ;;  %v6803_v12 = vpop.permute.xlu0 %2413 }
 0x478   : > { %v6641_v19 = vpop.f32.mrf.mxu0  ;;  %4711 = vmatmul.msk.f32.gmra.mxu2 %vm2255_vm4, %v4690_v38  ;;  %4752 = vmatmul.msk.f32.gmra.mxu3 %vm2255_vm4, %v4731_v48  ;;  %v4776_v48 = vld [vmem:[%s7596_s7 + $0x2e8] sm:$0xff] }
 0x47b   : > { %4789 = vmatmul.msk.f32.gmra.mxu0 %vm2255_vm4, %v4768_v3 }
 0x47f   : > { %4670 = vmatmul.msk.f32.gmra.mxu1 %vm2255_vm4, %v4649_v47 }
 0x480   : > { %v6659_v45 = vpop.f32.mrf.mxu0  ;;  %4712 = vmatmul.msk.f32.gmra.mxu2 %vm2255_vm4, %v4691_v43  ;;  %4753 = vmatmul.msk.f32.gmra.mxu3 %vm2255_vm4, %v4732_v14  ;;  %v4657_v14 = vld [vmem:[%s7596_s7 + $0x128] sm:$0xff] }
 0x483   : > { %4790 = vmatmul.msk.f32.gmra.mxu0 %vm2255_vm4, %v4769_v8  ;;  %v4699_v8 = vld [vmem:[%s7596_s7 + $0x1d0] sm:$0xff] }
 0x487   : > { %4671 = vmatmul.msk.f32.gmra.mxu1 %vm2255_vm4, %v4650_v59  ;;  %v4740_v59 = vld [vmem:[%s7596_s7 + $0x270] sm:$0xff] }
 0x488   : > { %v6677_v7 = vpop.f32.mrf.mxu0  ;;  %4713 = vmatmul.msk.f32.gmra.mxu2 %vm2255_vm4, %v4692_v15  ;;  %4754 = vmatmul.msk.f32.gmra.mxu3 %vm2255_vm4, %v4733_v57  ;;  %v6822_v15 = vpop.permute.xlu1 %2438 }
 0x489   : > { %v6825_v57 = vpop.permute.xlu2 %2418 }
 0x48b   : > { %4791 = vmatmul.msk.f32.gmra.mxu0 %vm2255_vm4, %v4770_v24 }
 0x48f   : > { %4672 = vmatmul.msk.f32.gmra.mxu1 %vm2255_vm4, %v4651_v25  ;;  %v4777_v25 = vld [vmem:[%s7596_s7 + $0x2f0] sm:$0xff] }
 0x490   : > { %v6697_v52 = vpop.f32.mrf.mxu0  ;;  %4714 = vmatmul.msk.f32.gmra.mxu2 %vm2255_vm4, %v4693_v1  ;;  %4755 = vmatmul.msk.f32.gmra.mxu3 %vm2255_vm4, %v4734_v32  ;;  %v2399_v1 = vpop.permute.xlu0 %2398 }
 0x493   : > { %4792 = vmatmul.msk.f32.gmra.mxu0 %vm2255_vm4, %v4771_v33 }
 0x497   : > { %4673 = vmatmul.msk.f32.gmra.mxu1 %vm2255_vm4, %v4652_v62 }
 0x498   : > { %v6715_v5 = vpop.f32.mrf.mxu0  ;;  %4715 = vmatmul.msk.f32.gmra.mxu2 %vm2255_vm4, %v4694_v46  ;;  %4756 = vmatmul.msk.f32.gmra.mxu3 %vm2255_vm4, %v4735_v54  ;;  %v4658_v46 = vld [vmem:[%s7596_s7 + $0x130] sm:$0xff]  ;;  %v2496_v54 = vadd.f32 %v2399_v1, %v6480_v26  ;;  %v2404_v26 = vpop.permute.xlu2 %2403  ;;  %v4780_v1 = vld [vmem:[%s7596_s7 + $0x308] sm:$0xff] }
 0x49b   : > { %4793 = vmatmul.msk.f32.gmra.mxu0 %vm2255_vm4, %v4772_v63  ;;  %v4700_v63 = vld [vmem:[%s7596_s7 + $0x1d8] sm:$0xff] }
 0x49f   : > { %4674 = vmatmul.msk.f32.gmra.mxu1 %vm2255_vm4, %v4653_v58  ;;  %v4741_v58 = vld [vmem:[%s7596_s7 + $0x278] sm:$0xff] }
 0x4a0   : > { %v6735_v53 = vpop.f32.mrf.mxu0  ;;  %4716 = vmatmul.msk.f32.gmra.mxu2 %vm2255_vm4, %v4695_v9  ;;  %4757 = vmatmul.msk.f32.gmra.mxu3 %vm2255_vm4, %v4736_v11  ;;  %v6846_v11 = vpop.permute.xlu1 %2423 }
 0x4a3   : > { %4794 = vmatmul.msk.f32.gmra.mxu0 %vm2255_vm4, %v4773_v13 }
 0x4a7   : > { %4675 = vmatmul.msk.f32.gmra.mxu1 %vm2255_vm4, %v4654_v21  ;;  %v4778_v21 = vld [vmem:[%s7596_s7 + $0x2f8] sm:$0xff] }
 0x4a8   : > { %v6757_v40 = vpop.f32.mrf.mxu0  ;;  %4717 = vmatmul.msk.f32.gmra.mxu2 %vm2255_vm4, %v4696_v30  ;;  %4758 = vmatmul.msk.f32.gmra.mxu3 %vm2255_vm4, %v4737_v31 }
 0x4ab   : > { %4795 = vmatmul.msk.f32.gmra.mxu0 %vm2255_vm4, %v4774_v39 }
 0x4af   : > { %4676 = vmatmul.msk.f32.gmra.mxu1 %vm2255_vm4, %v4655_v50 }
 0x4b0   : > { %v6781_v22 = vpop.f32.mrf.mxu0  ;;  %4718 = vmatmul.msk.f32.gmra.mxu2 %vm2255_vm4, %v4697_v56  ;;  %4759 = vmatmul.msk.f32.gmra.mxu3 %vm2255_vm4, %v4738_v60  ;;  %v4659_v56 = vld [vmem:[%s7596_s7 + $0x138] sm:$0xff]  ;;  %v2497_v60 = vadd.f32 %v2404_v26, %v6497_v0 }
 0x4b1   : > { %7742 = vst [vmem:[#allocation43_spill] sm:$0xff] %v6781_v22 }
 0x4b2   : > { %v2870_v10 = vpop.f32.mrf.mxu2 }
 0x4b3   : > { %4796 = vmatmul.msk.f32.gmra.mxu0 %vm2255_vm4, %v4775_v34  ;;  %v3082_v6 = vpop.f32.mrf.mxu3 }
 0x4b4   : > { %v2658_v23 = vpop.f32.mrf.mxu1 }
 0x4b5   : > { %v2718_v9 = vadd.f32 %v2658_v23, %v2496_v54 }
 0x4b7   : > { %4677 = vmatmul.msk.f32.gmra.mxu1 %vm2255_vm4, %v4656_v35  ;;  %v2930_v30 = vadd.f32 %v2870_v10, %v2718_v9  ;;  %v4779_v10 = vld [vmem:[%s7596_s7 + $0x300] sm:$0xff] }
 0x4b8   : > { %v6805_v38 = vpop.f32.mrf.mxu0  ;;  %4719 = vmatmul.msk.f32.gmra.mxu2 %vm2255_vm4, %v4698_v55  ;;  %4760 = vmatmul.msk.f32.gmra.mxu3 %vm2255_vm4, %v4739_v18  ;;  %v2409_v18 = vpop.permute.xlu1 %2408 }
 0x4b9   : > { %7743 = vst [vmem:[#allocation47_spill] sm:$0xff] %v6805_v38  ;;  %v3142_v34 = vadd.f32 %v3082_v6, %v2930_v30  ;;  %v2498_v6 = vadd.f32 %v2409_v18, %v6515_v42  ;;  %v2499_v42 = vadd.f32 %v6803_v12, %v6533_v20  ;;  %v4782_v12 = vld [vmem:[%s7596_s7 + $0x318] sm:$0xff] }
 0x4bb   : > { %4797 = vmatmul.msk.f32.gmra.mxu0 %vm2255_vm4, %v4776_v48  ;;  %v2873_v3 = vpop.f32.mrf.mxu2  ;;  %v3085_v47 = vpop.f32.mrf.mxu3 }
 0x4bc   : > { %v2661_v43 = vpop.f32.mrf.mxu1 }
 0x4bd   : > { %v2719_v23 = vadd.f32 %v2661_v43, %v2497_v60 }
 0x4bf   : > { %4678 = vmatmul.msk.f32.gmra.mxu1 %vm2255_vm4, %v4657_v14  ;;  %v2931_v48 = vadd.f32 %v2873_v3, %v2719_v23 }
 0x4c0   : > { %v6827_v24 = vpop.f32.mrf.mxu0  ;;  %4720 = vmatmul.msk.f32.gmra.mxu2 %vm2255_vm4, %v4699_v8  ;;  %4761 = vmatmul.msk.f32.gmra.mxu3 %vm2255_vm4, %v4740_v59 }
 0x4c1   : > { %7744 = vst [vmem:[#allocation52_spill] sm:$0xff] %v6827_v24  ;;  %v3143_v43 = vadd.f32 %v3085_v47, %v2931_v48 }
 0x4c3   : > { %4798 = vmatmul.msk.f32.gmra.mxu0 %vm2255_vm4, %v4777_v25  ;;  %v2876_v32 = vpop.f32.mrf.mxu2  ;;  %v3088_v33 = vpop.f32.mrf.mxu3 }
 0x4c4   : > { %v2664_v62 = vpop.f32.mrf.mxu1 }
 0x4c5   : > { %v2720_v59 = vadd.f32 %v2664_v62, %v2498_v6 }
 0x4c7   : > { %4679 = vmatmul.msk.f32.gmra.mxu1 %vm2255_vm4, %v4658_v46  ;;  %v2932_v3 = vadd.f32 %v2876_v32, %v2720_v59 }
 0x4c8   : > { %v6848_v13 = vpop.f32.mrf.mxu0  ;;  %4721 = vmatmul.msk.f32.gmra.mxu2 %vm2255_vm4, %v4700_v63  ;;  %4762 = vmatmul.msk.f32.gmra.mxu3 %vm2255_vm4, %v4741_v58 }
 0x4c9   : > { %7745 = vst [vmem:[#allocation14_spill] sm:$0xff] %v6848_v13  ;;  %v3144_v47 = vadd.f32 %v3088_v33, %v2932_v3 }
 0x4cb   : > { %4799 = vmatmul.msk.f32.gmra.mxu0 %vm2255_vm4, %v4778_v21  ;;  %v2879_v31 = vpop.f32.mrf.mxu2  ;;  %v3091_v39 = vpop.f32.mrf.mxu3  ;;  %v4781_v21 = vld [vmem:[%s7596_s7 + $0x310] sm:$0xff] }
 0x4cc   : > { %v2667_v50 = vpop.f32.mrf.mxu1 }
 0x4cd   : > { %v2721_v62 = vadd.f32 %v2667_v50, %v2499_v42 }
 0x4cf   : > { %4680 = vmatmul.msk.f32.gmra.mxu1 %vm2255_vm4, %v4659_v56  ;;  %v2933_v32 = vadd.f32 %v2879_v31, %v2721_v62 }
 0x4d0   : > { %v3294_v35 = vpop.f32.mrf.mxu0 }
 0x4d1   : > { %v6864_v55 = vadd.f32 %v3294_v35, %v3142_v34  ;;  %v3145_v34 = vadd.f32 %v3091_v39, %v2933_v32 }
 0x4d3   : > { %7746 = vst [vmem:[#allocation36_spill] sm:$0xff] %v6864_v55  ;;  %4800 = vmatmul.msk.f32.gmra.mxu0 %vm2255_vm4, %v4779_v10  ;;  %v6867_v14 = vpop.f32.mrf.mxu2  ;;  %v6869_v8 = vpop.f32.mrf.mxu3 }
 0x4d4   : > { %7747 = vst [vmem:[#allocation40_spill] sm:$0xff] %v6867_v14  ;;  %v6871_v0 = vpop.f32.mrf.mxu1  ;;  %v2511_v14 = vadd.f32 %v6695_v29, %v6757_v40  ;;  %v2506_v40 = vadd.f32 %v6767_v37, %v6659_v45 }
 0x4d5   : > { %7748 = vst [vmem:[#allocation45_spill] sm:$0xff] %v6869_v8 }
 0x4d6   : > { %7749 = vst [vmem:[#allocation51_spill] sm:$0xff] %v6871_v0 }
 0x4d8   : > { %v3297_v25 = vpop.f32.mrf.mxu0 }
 0x4d9   : > { %v6877_v46 = vadd.f32 %v3297_v25, %v3143_v43 }
 0x4db   : > { %7750 = vst [vmem:[#allocation13_spill] sm:$0xff] %v6877_v46  ;;  %4801 = vmatmul.msk.f32.gmra.mxu0 %vm2255_vm4, %v4780_v1  ;;  %v6880_v54 = vpop.f32.mrf.mxu2  ;;  %v6882_v63 = vpop.f32.mrf.mxu3 }
 0x4dc   : > { %7751 = vst [vmem:[#allocation31_spill] sm:$0xff] %v6880_v54  ;;  %v6884_v58 = vpop.f32.mrf.mxu1 }
 0x4dd   : > { %7752 = vst [vmem:[#allocation37_spill] sm:$0xff] %v6882_v63 }
 0x4e0   : > { %v3300_v9 = vpop.f32.mrf.mxu0 }
 0x4e1   : > { %v6891_v26 = vadd.f32 %v3300_v9, %v3144_v47 }
 0x4e3   : > { %7753 = vst [vmem:[#allocation41_spill] sm:$0xff] %v6891_v26  ;;  %4802 = vmatmul.msk.f32.gmra.mxu0 %vm2255_vm4, %v4781_v21  ;;  %v6894_v30 = vpop.f32.mrf.mxu2  ;;  %v6896_v56 = vpop.f32.mrf.mxu3 }
 0x4e4   : > { %7754 = vst [vmem:[#allocation50_spill] sm:$0xff] %v6894_v30  ;;  %v6898_v60 = vpop.f32.mrf.mxu1  ;;  %v2508_v30 = vadd.f32 %v6722_v49, %v6697_v52 }
 0x4e5   : > { %7755 = vst [vmem:[#allocation12_spill] sm:$0xff] %v6896_v56  ;;  %v2510_v56 = vadd.f32 %v6764_v28, %v6735_v53  ;;  %v2507_v53 = vadd.f32 %v6789_v27, %v6677_v7  ;;  %v2504_v7 = vadd.f32 %v6822_v15, %v6623_v2  ;;  %v2502_v2 = vadd.f32 %v6778_v61, %v6587_v4 }
 0x4e8   : > { %v3303_v20 = vpop.f32.mrf.mxu0 }
 0x4e9   : > { %v6903_v33 = vadd.f32 %v3303_v20, %v3145_v34 }
 0x4eb   : > { %7756 = vst [vmem:[#allocation27_spill] sm:$0xff] %v6903_v33  ;;  %4803 = vmatmul.msk.f32.gmra.mxu0 %vm2255_vm4, %v4782_v12  ;;  %v6906_v50 = vpop.f32.mrf.mxu2  ;;  %v6910_v23 = vpop.f32.mrf.mxu3 }
 0x4ec   : > { %v6908_v31 = vpop.f32.mrf.mxu1  ;;  %7757 = vst [vmem:[#allocation33_spill] sm:$0xff] %v6910_v23  ;;  %v2509_v23 = vadd.f32 %v6742_v44, %v6715_v5  ;;  %v2505_v44 = vadd.f32 %v6745_v17, %v6641_v19  ;;  %v2503_v19 = vadd.f32 %v6800_v36, %v6605_v16  ;;  %v2501_v16 = vadd.f32 %v6846_v11, %v6569_v51 }
 0x4ed   : > { %v2724_v36 = vadd.f32 %v6898_v60, %v2502_v2  ;;  %v2489_v2 = vpop.permute.xlu2 %2488 }
 0x4ee   : > { %v2725_v15 = vadd.f32 %v6908_v31, %v2503_v19  ;;  %v2500_v31 = vadd.f32 %v6825_v57, %v6551_v41 }
 0x4f0   : > { %v6912_v35 = vpop.f32.mrf.mxu0  ;;  %v2937_v51 = vadd.f32 %v6906_v50, %v2725_v15  ;;  %v2494_v50 = vpop.permute.xlu1 %2493 }
 0x4f1   : > { %7758 = vst [vmem:[#allocation38_spill] sm:$0xff] %v6912_v35 }
 0x4f3   : > { %v6914_v10 = vpop.f32.mrf.mxu2  ;;  %v6918_v18 = vpop.f32.mrf.mxu3 }
 0x4f4   : > { %v6916_v39 = vpop.f32.mrf.mxu1  ;;  %7759 = vst [vmem:[#allocation49_spill] sm:$0xff] %v6918_v18 }
 0x4f5   : > { %v2726_v17 = vadd.f32 %v6916_v39, %v2504_v7 }
 0x4f8   : > { %v6920_v48 = vpop.f32.mrf.mxu0 }
 0x4f9   : > { %7760 = vst [vmem:[#allocation11_spill] sm:$0xff] %v6920_v48 }
 0x4fb   : > { %v6922_v43 = vpop.f32.mrf.mxu2  ;;  %v6926_v25 = vpop.f32.mrf.mxu3  ;;  %v7772_v57 = vld [vmem:[#allocation49_spill] sm:$0xff] }
 0x4fc   : > { %v2685_v6 = vpop.f32.mrf.mxu1  ;;  %7762 = vst [vmem:[#allocation29_spill] sm:$0xff] %v6926_v25 }
 0x4fd   : > { %v2727_v27 = vadd.f32 %v2685_v6, %v2505_v44 }
 0x500   : > { %v6924_v59 = vpop.f32.mrf.mxu0 }
 0x501   : > { %7761 = vst [vmem:[#allocation22_spill] sm:$0xff] %v6924_v59 }
 0x503   : > { %v2900_v3 = vpop.f32.mrf.mxu2  ;;  %v6930_v47 = vpop.f32.mrf.mxu3  ;;  %v7768_v11 = vld [vmem:[#allocation29_spill] sm:$0xff] }
 0x504   : > { %v2688_v1 = vpop.f32.mrf.mxu1 }
 0x505   : > { %v2728_v52 = vadd.f32 %v2688_v1, %v2506_v40 }
 0x508   : > { %v6928_v42 = vpop.f32.mrf.mxu0 }
 0x509   : > { %7763 = vst [vmem:[#allocation34_spill] sm:$0xff] %v6928_v42 }
 0x50b   : > { %v2903_v9 = vpop.f32.mrf.mxu2  ;;  %v3115_v32 = vpop.f32.mrf.mxu3 }
 0x50c   : > { %v2691_v62 = vpop.f32.mrf.mxu1 }
 0x510   : > { %v6932_v21 = vpop.f32.mrf.mxu0 }
 0x511   : > { %7764 = vst [vmem:[#allocation48_spill] sm:$0xff] %v6932_v21 }
 0x513   : > { %v2906_v12 = vpop.f32.mrf.mxu2  ;;  %v3118_v55 = vpop.f32.mrf.mxu3 }
 0x514   : > { %v2694_v34 = vpop.f32.mrf.mxu1 }
 0x515   : > { %v2730_v28 = vadd.f32 %v2694_v34, %v2508_v30 }
 0x517   : > { %v2942_v49 = vadd.f32 %v2906_v12, %v2730_v28 }
 0x518   : > { %v6934_v20 = vpop.f32.mrf.mxu0 }
 0x519   : > { %7765 = vst [vmem:[#allocation10_spill] sm:$0xff] %v6934_v20 }
 0x51b   : > { %v2909_v33 = vpop.f32.mrf.mxu2  ;;  %v3121_v22 = vpop.f32.mrf.mxu3 }
 0x51c   : > { %v2697_v46 = vpop.f32.mrf.mxu1 }
 0x51d   : > { %v2731_v0 = vadd.f32 %v2697_v46, %v2509_v23 }
 0x51f   : > { %v2943_v5 = vadd.f32 %v2909_v33, %v2731_v0  ;;  %v3154_v33 = vadd.f32 %v3118_v55, %v2942_v49  ;;  %v2938_v55 = vadd.f32 %v6914_v10, %v2726_v17  ;;  %v7782_v17 = vld [vmem:[#allocation45_spill] sm:$0xff] }
 0x520   : > { %v6936_v26 = vpop.f32.mrf.mxu0 }
 0x521   : > { %7766 = vst [vmem:[#allocation18_spill] sm:$0xff] %v6936_v26  ;;  %v3155_v45 = vadd.f32 %v3121_v22, %v2943_v5  ;;  %v2939_v22 = vadd.f32 %v6922_v43, %v2727_v27  ;;  %v7777_v5 = vld [vmem:[#allocation40_spill] sm:$0xff] }
 0x523   : > { %v2912_v13 = vpop.f32.mrf.mxu2  ;;  %v3124_v48 = vpop.f32.mrf.mxu3  ;;  %v3151_v60 = vadd.f32 %v7768_v11, %v2939_v22  ;;  %v7784_v22 = vld [vmem:[#allocation52_spill] sm:$0xff] }
 0x524   : > { %v2700_v35 = vpop.f32.mrf.mxu1 }
 0x525   : > { %v2732_v54 = vadd.f32 %v2700_v35, %v2510_v56  ;;  %v2940_v56 = vadd.f32 %v2900_v3, %v2728_v52  ;;  %v7778_v52 = vld [vmem:[#allocation12_spill] sm:$0xff] }
 0x527   : > { %v2944_v25 = vadd.f32 %v2912_v13, %v2732_v54  ;;  %v3152_v4 = vadd.f32 %v6930_v47, %v2940_v56  ;;  %v7771_v47 = vld [vmem:[#allocation50_spill] sm:$0xff] }
 0x528   : > { %v3327_v38 = vpop.f32.mrf.mxu0  ;;  %v7769_v10 = vld [vmem:[#allocation18_spill] sm:$0xff]  ;;  %v2936_v41 = vadd.f32 %v7771_v47, %v2724_v36  ;;  %v7789_v47 = vld [vmem:[#allocation27_spill] sm:$0xff] }
 0x52a   : > { %v3148_v49 = vadd.f32 %v7778_v52, %v2936_v41  ;;  %v3377_v41 = vmax.f32 %v7789_v47, 0.0 }
 0x52b   : > { %v2915_v59 = vpop.f32.mrf.mxu2  ;;  %v3127_v42 = vpop.f32.mrf.mxu3 }
 0x52c   : > { %v2703_v8 = vpop.f32.mrf.mxu1 }
 0x52d   : > { %v2733_v20 = vadd.f32 %v2703_v8, %v2511_v14  ;;  %v3156_v8 = vadd.f32 %v3124_v48, %v2944_v25  ;;  %v3364_v25 = vadd.f32 %v7769_v10, %v3152_v4  ;;  %v2484_v4 = vpop.permute.xlu0 %2483 }
 0x52f   : > { %v2945_v29 = vadd.f32 %v2915_v59, %v2733_v20  ;;  %v7775_v20 = vld [vmem:[#allocation33_spill] sm:$0xff] }
 0x530   : > { %v3330_v24 = vpop.f32.mrf.mxu0  ;;  %v3149_v12 = vadd.f32 %v7775_v20, %v2937_v51 }
 0x531   : > { %v3157_v46 = vadd.f32 %v3127_v42, %v2945_v29  ;;  %v3366_v6 = vadd.f32 %v3330_v24, %v3154_v33  ;;  %v2723_v24 = vadd.f32 %v6884_v58, %v2501_v16  ;;  %v3150_v58 = vadd.f32 %v7772_v57, %v2938_v55  ;;  %v7783_v33 = vld [vmem:[#allocation11_spill] sm:$0xff]  ;;  %v7786_v16 = vld [vmem:[#allocation38_spill] sm:$0xff] }
 0x532   : > { %v3384_v29 = vmax.f32 %v3364_v25, 0.0  ;;  %v7788_v25 = vld [vmem:[#allocation43_spill] sm:$0xff] }
 0x533   : > { %v6948_v26 = vpop.f32.mrf.mxu2  ;;  %v6956_v14 = vpop.f32.mrf.mxu3  ;;  %v3386_v1 = vmax.f32 %v3366_v6, 0.0  ;;  %v7785_v6 = vld [vmem:[#allocation14_spill] sm:$0xff] }
 0x534   : > { %v6942_v21 = vpop.f32.mrf.mxu1 }
 0x535   : > { %7767 = vst [vmem:[#allocation25_spill] sm:$0xff] %v6942_v21  ;;  %v2729_v21 = vadd.f32 %v2691_v62, %v2507_v53  ;;  %v7773_v62 = vld [vmem:[#allocation10_spill] sm:$0xff]  ;;  %v7776_v53 = vld [vmem:[#allocation48_spill] sm:$0xff] }
 0x536   : > { %v3362_v28 = vadd.f32 %v7776_v53, %v3150_v58 }
 0x537   : > { %v2941_v30 = vadd.f32 %v2903_v9, %v2729_v21  ;;  %v3363_v9 = vadd.f32 %v7773_v62, %v3151_v60 }
 0x538   : > { %v3333_v63 = vpop.f32.mrf.mxu0 }
 0x539   : > { %v3367_v23 = vadd.f32 %v3333_v63, %v3155_v45  ;;  %v3383_v7 = vmax.f32 %v3363_v9, 0.0  ;;  %v7781_v45 = vld [vmem:[#allocation22_spill] sm:$0xff] }
 0x53b   : > { %v6968_v48 = vpop.f32.mrf.mxu2  ;;  %v3387_v63 = vmax.f32 %v3367_v23, 0.0  ;;  %v6979_v39 = vpop.f32.mrf.mxu3 }
 0x53c   : > { %v6960_v13 = vpop.f32.mrf.mxu1  ;;  %v7790_v57 = vld [vmem:[#allocation25_spill] sm:$0xff] }
 0x540   : > { %v3336_v18 = vpop.f32.mrf.mxu0 }
 0x541   : > { %v3368_v37 = vadd.f32 %v3336_v18, %v3156_v8  ;;  %v3153_v18 = vadd.f32 %v3115_v32, %v2941_v30  ;;  %v7774_v32 = vld [vmem:[#allocation31_spill] sm:$0xff]  ;;  %v7779_v8 = vld [vmem:[#allocation34_spill] sm:$0xff] }
 0x542   : > { %v2935_v34 = vadd.f32 %v7774_v32, %v2723_v24 }
 0x543   : > { %v3388_v59 = vmax.f32 %v3368_v37, 0.0  ;;  %v3365_v61 = vadd.f32 %v3327_v38, %v3153_v18  ;;  %v7770_v38 = vld [vmem:[#allocation51_spill] sm:$0xff]  ;;  %v2924_v40 = vpop.f32.mrf.mxu2  ;;  %v3360_v37 = vadd.f32 %v7781_v45, %v3148_v49  ;;  %v3136_v19 = vpop.f32.mrf.mxu3  ;;  %v2514_v18 = vadd.f32 %v2489_v2, %v7784_v22 }
 0x544   : > { %v2722_v3 = vadd.f32 %v7770_v38, %v2500_v31  ;;  %v2712_v42 = vpop.f32.mrf.mxu1  ;;  %v3400_v45 = vld [vmem:[%s7598_s9 + $0x30] sm:$0xff]  ;;  %v3407_v22 = vld [vmem:[%s7598_s9 + $0x68] sm:$0xff] }
 0x545   : > { %v3385_v21 = vmax.f32 %v3365_v61, 0.0  ;;  %v3380_v55 = vmax.f32 %v3360_v37, 0.0  ;;  %v2479_v61 = vpop.permute.xlu1 %2478  ;;  %v2736_v51 = vadd.f32 %v2712_v42, %v2514_v18  ;;  %v3399_v37 = vld [vmem:[%s7598_s9 + $0x28] sm:$0xff]  ;;  %v3540_v2 = vld [vmem:[%s7599_s10 + $0x10] sm:$0xff]  ;;  %v3542_v18 = vld [vmem:[%s7599_s10 + $0x20] sm:$0xff] }
 0x546   : > { %v2934_v44 = vadd.f32 %v7777_v5, %v2722_v3 }
 0x547   : > { %v2948_v62 = vadd.f32 %v2924_v40, %v2736_v51  ;;  %v3550_v51 = vld [vmem:[%s7599_s10 + $0x60] sm:$0xff] }
 0x548   : > { %v3339_v54 = vpop.f32.mrf.mxu0  ;;  %v3146_v56 = vadd.f32 %v7782_v17, %v2934_v44  ;;  %v3404_v17 = vld [vmem:[%s7598_s9 + $0x50] sm:$0xff] }
 0x549   : > { %v3369_v0 = vadd.f32 %v3339_v54, %v3157_v46  ;;  %v3361_v46 = vadd.f32 %v7779_v8, %v3149_v12  ;;  %v7780_v54 = vld [vmem:[#allocation37_spill] sm:$0xff]  ;;  %v3160_v12 = vadd.f32 %v3136_v19, %v2948_v62 }
 0x54a   : > { %v3147_v30 = vadd.f32 %v7780_v54, %v2935_v34  ;;  %v3358_v36 = vadd.f32 %v7786_v16, %v3146_v56  ;;  %v7792_v34 = vld [vmem:[#allocation13_spill] sm:$0xff]  ;;  %v3403_v56 = vld [vmem:[%s7598_s9 + $0x48] sm:$0xff]  ;;  %v3544_v16 = vld [vmem:[%s7599_s10 + $0x30] sm:$0xff] }
 0x54b   : > { %v3389_v35 = vmax.f32 %v3369_v0, 0.0  ;;  %v3382_v0 = vmax.f32 %v3362_v28, 0.0  ;;  %v2927_v60 = vpop.f32.mrf.mxu2  ;;  %v3139_v42 = vpop.f32.mrf.mxu3  ;;  %v3375_v20 = vmax.f32 %v7792_v34, 0.0  ;;  %v3401_v19 = vld [vmem:[%s7598_s9 + $0x38] sm:$0xff] }
 0x54c   : > { %v3359_v23 = vadd.f32 %v7783_v33, %v3147_v30  ;;  %v2715_v15 = vpop.f32.mrf.mxu1  ;;  %v3378_v38 = vmax.f32 %v3358_v36, 0.0  ;;  %v3397_v30 = vld [vmem:[%s7598_s9 + $0x18] sm:$0xff]  ;;  %v3538_v33 = vld [vmem:[%s7599_s10] sm:$0xff]  ;;  %v3412_v36 = vld [vmem:[%s7598_s9 + $0x90] sm:$0xff] }
 0x54d   : > { %3444 = vmatpush.msra.mxu1 %v3389_v35  ;;  %3588 = vmatpush.msra.mxu3 %v3389_v35  ;;  %v3381_v35 = vmax.f32 %v3361_v46, 0.0 }
 0x54e   : > { %v3379_v24 = vmax.f32 %v3359_v23, 0.0  ;;  %v3406_v23 = vld [vmem:[%s7598_s9 + $0x60] sm:$0xff] }
 0x54f   : > { %3445 = vmatpush.msra.mxu1 %v3388_v59  ;;  %3589 = vmatpush.msra.mxu3 %v3388_v59  ;;  %v2515_v59 = vadd.f32 %v2494_v50, %v7785_v6  ;;  %v3410_v6 = vld [vmem:[%s7598_s9 + $0x80] sm:$0xff] }
 0x550   : > { %v6981_v43 = vpop.f32.mrf.mxu0 }
 0x551   : > { %3446 = vmatpush.msra.mxu1 %v3387_v63  ;;  %3590 = vmatpush.msra.mxu3 %v3387_v63  ;;  %v7787_v63 = vld [vmem:[#allocation47_spill] sm:$0xff]  ;;  %v2737_v11 = vadd.f32 %v2715_v15, %v2515_v59  ;;  %v3409_v59 = vld [vmem:[%s7598_s9 + $0x78] sm:$0xff] }
 0x552   : > { %v2513_v31 = vadd.f32 %v2484_v4, %v7787_v63  ;;  %v3408_v15 = vld [vmem:[%s7598_s9 + $0x70] sm:$0xff]  ;;  %v3546_v4 = vld [vmem:[%s7599_s10 + $0x40] sm:$0xff]  ;;  %v3539_v63 = vld [vmem:[%s7599_s10 + $0x8] sm:$0xff] }
 0x553   : > { %3447 = vmatpush.msra.mxu1 %v3386_v1  ;;  %3591 = vmatpush.msra.mxu3 %v3386_v1  ;;  %v2512_v1 = vadd.f32 %v2479_v61, %v7788_v25  ;;  %v2949_v9 = vadd.f32 %v2927_v60, %v2737_v11  ;;  %v3413_v61 = vld [vmem:[%s7598_s9 + $0x98] sm:$0xff]  ;;  %v3543_v11 = vld [vmem:[%s7599_s10 + $0x28] sm:$0xff]  ;;  %v3552_v60 = vld [vmem:[%s7599_s10 + $0x70] sm:$0xff] }
 0x554   : > { %v2735_v3 = vadd.f32 %v6960_v13, %v2513_v31  ;;  %v3548_v31 = vld [vmem:[%s7599_s10 + $0x50] sm:$0xff]  ;;  %v3554_v25 = vld [vmem:[%s7599_s10 + $0x80] sm:$0xff] }
 0x555   : > { %3448 = vmatpush.msra.mxu1 %v3385_v21  ;;  %3592 = vmatpush.msra.mxu3 %v3385_v21  ;;  %v2734_v58 = vadd.f32 %v7790_v57, %v2512_v1  ;;  %v7791_v21 = vld [vmem:[#allocation41_spill] sm:$0xff]  ;;  %v3161_v53 = vadd.f32 %v3139_v42, %v2949_v9  ;;  %v3547_v1 = vld [vmem:[%s7599_s10 + $0x48] sm:$0xff] }
 0x556   : > { %v3376_v50 = vmax.f32 %v7791_v21, 0.0  ;;  %v2947_v32 = vadd.f32 %v6968_v48, %v2735_v3  ;;  %v3394_v48 = vld [vmem:[%s7598_s9] sm:$0xff]  ;;  %v3549_v3 = vld [vmem:[%s7599_s10 + $0x58] sm:$0xff]  ;;  %v3555_v9 = vld [vmem:[%s7599_s10 + $0x88] sm:$0xff] }
 0x557   : > { %3449 = vmatpush.msra.mxu1 %v3384_v29  ;;  %3593 = vmatpush.msra.mxu3 %v3384_v29  ;;  %v2946_v13 = vadd.f32 %v6948_v26, %v2734_v58  ;;  %v7793_v29 = vld [vmem:[#allocation36_spill] sm:$0xff] }
 0x558   : > { %v3345_v27 = vpop.f32.mrf.mxu0  ;;  %v3374_v40 = vmax.f32 %v7793_v29, 0.0  ;;  %v3159_v5 = vadd.f32 %v6979_v39, %v2947_v32  ;;  %v3553_v58 = vld [vmem:[%s7599_s10 + $0x78] sm:$0xff] }
 0x559   : > { %3450 = vmatpush.msra.mxu1 %v3383_v7  ;;  %3594 = vmatpush.msra.mxu3 %v3383_v7  ;;  %v3158_v49 = vadd.f32 %v6956_v14, %v2946_v13  ;;  %v3396_v14 = vld [vmem:[%s7598_s9 + $0x10] sm:$0xff]  ;;  %v3557_v21 = vld [vmem:[%s7599_s10 + $0x98] sm:$0xff]  ;;  %v3777_v13 = vld [vmem:[%s7601_s12 + $0x8] sm:$0x3] }
 0x55a   : > { %v3371_v26 = vadd.f32 %v3345_v27, %v3159_v5  ;;  %v3395_v27 = vld [vmem:[%s7598_s9 + $0x8] sm:$0xff] }
 0x55b   : > { %3451 = vmatpush.msra.mxu1 %v3382_v0  ;;  %3595 = vmatpush.msra.mxu3 %v3382_v0  ;;  %v3370_v46 = vadd.f32 %v6981_v43, %v3158_v49  ;;  %v3398_v43 = vld [vmem:[%s7598_s9 + $0x20] sm:$0xff] }
 0x55c   : > { %v3391_v39 = vmax.f32 %v3371_v26, 0.0  ;;  %v3402_v0 = vld [vmem:[%s7598_s9 + $0x40] sm:$0xff] }
 0x55d   : > { %3452 = vmatpush.msra.mxu1 %v3381_v35  ;;  %3596 = vmatpush.msra.mxu3 %v3381_v35  ;;  %v3390_v54 = vmax.f32 %v3370_v46, 0.0  ;;  %v3405_v35 = vld [vmem:[%s7598_s9 + $0x58] sm:$0xff] }
 0x55f   : > { %3453 = vmatpush.msra.mxu1 %v3380_v55  ;;  %3597 = vmatpush.msra.mxu3 %v3380_v55  ;;  %v3411_v55 = vld [vmem:[%s7598_s9 + $0x88] sm:$0xff] }
 0x560   : > { %v3348_v10 = vpop.f32.mrf.mxu0 }
 0x561   : > { %3454 = vmatpush.msra.mxu1 %v3379_v24  ;;  %3598 = vmatpush.msra.mxu3 %v3379_v24  ;;  %v3372_v44 = vadd.f32 %v3348_v10, %v3160_v12  ;;  %v3541_v24 = vld [vmem:[%s7599_s10 + $0x18] sm:$0xff]  ;;  %v3692_v12 = vld [vmem:[%s7600_s11] sm:$0xff] }
 0x562   : > { %v3545_v10 = vld [vmem:[%s7599_s10 + $0x38] sm:$0xff] }
 0x563   : > { %3455 = vmatpush.msra.mxu1 %v3378_v38  ;;  %3599 = vmatpush.msra.mxu3 %v3378_v38  ;;  %v3392_v7 = vmax.f32 %v3372_v44, 0.0  ;;  %v3556_v38 = vld [vmem:[%s7599_s10 + $0x90] sm:$0xff] }
 0x565   : > { %3456 = vmatpush.msra.mxu1 %v3377_v41  ;;  %3600 = vmatpush.msra.mxu3 %v3377_v41  ;;  %v3551_v41 = vld [vmem:[%s7599_s10 + $0x68] sm:$0xff] }
 0x567   : > { %3457 = vmatpush.msra.mxu1 %v3376_v50  ;;  %3601 = vmatpush.msra.mxu3 %v3376_v50 }
 0x568   : > { %v3351_v28 = vpop.f32.mrf.mxu0 }
 0x569   : > { %v3373_v52 = vadd.f32 %v3351_v28, %v3161_v53  ;;  %3458 = vmatpush.msra.mxu1 %v3375_v20  ;;  %3602 = vmatpush.msra.mxu3 %v3375_v20  ;;  %v3693_v20 = vld [vmem:[%s7600_s11 + $0x8] sm:$0x3]  ;;  %v3776_v53 = vld [vmem:[%s7601_s12] sm:$0xff] }
 0x56b   : > { %v3393_v8 = vmax.f32 %v3373_v52, 0.0  ;;  %3459 = vmatpush.msra.mxu1 %v3374_v40  ;;  %3603 = vmatpush.msra.mxu3 %v3374_v40 }
 0x56c   : > { %3460 = vmatmul.f32.vlgmr.msra.gmra.mxu1 %v3394_v48  ;;  %3604 = vmatmul.f32.vlgmr.msra.gmra.mxu3 %v3538_v33 }
 0x56d   : > { %3503 = vmatpush.msra.mxu2 %v3393_v8  ;;  %3647 = vmatpush.msrb.mxu1 %v3393_v8 }
 0x56e   : > { %4835 = vmatpush.msk.msrb.mxu3 %vm3725_vm5, %v3777_v13 }
 0x56f   : > { %3504 = vmatpush.msra.mxu2 %v3392_v7  ;;  %3648 = vmatpush.msrb.mxu1 %v3392_v7 }
 0x570   : > { %3796 = vmatpush.msrb.mxu3 %v3776_v53  ;;  %v5198_v53 = vmov 1  }
 0x571   : > { %3505 = vmatpush.msra.mxu2 %v3391_v39  ;;  %3649 = vmatpush.msrb.mxu1 %v3391_v39 }
 0x572   : > { %5085 = vset.pattern.permute.xlu2 %v5198_v53 }
 0x573   : > { %3506 = vmatpush.msra.mxu2 %v3390_v54  ;;  %3650 = vmatpush.msrb.mxu1 %v3390_v54 }
 0x574   : > { %3463 = vmatmul.f32.gmra.mxu1 %v3396_v14  ;;  %4804 = vmatmul.msk.f32.vlgmr.msra.gmra.mxu2 %vm646_vm0, %v3395_v27 }
 0x575   : > { %3607 = vmatmul.f32.gmra.mxu3 %v3540_v2  ;;  %4824 = vmatpush.msk.msrb.mxu2 %vm3725_vm5, %v3693_v20 }
 0x577   : > { %3744 = vmatpush.msrb.mxu2 %v3692_v12 }
 0x57c   : > { %3466 = vmatmul.f32.gmra.mxu1 %v3398_v43  ;;  %4805 = vmatmul.msk.f32.gmra.mxu2 %vm646_vm0, %v3397_v30 }
 0x57d   : > { %3610 = vmatmul.f32.gmra.mxu3 %v3542_v18 }
 0x584   : > { %3469 = vmatmul.f32.gmra.mxu1 %v3400_v45  ;;  %4806 = vmatmul.msk.f32.gmra.mxu2 %vm646_vm0, %v3399_v37 }
 0x585   : > { %3613 = vmatmul.f32.gmra.mxu3 %v3544_v16 }
 0x58c   : > { %3472 = vmatmul.f32.gmra.mxu1 %v3402_v0  ;;  %4807 = vmatmul.msk.f32.gmra.mxu2 %vm646_vm0, %v3401_v19 }
 0x58d   : > { %3616 = vmatmul.f32.gmra.mxu3 %v3546_v4 }
 0x594   : > { %3475 = vmatmul.f32.gmra.mxu1 %v3404_v17  ;;  %4808 = vmatmul.msk.f32.gmra.mxu2 %vm646_vm0, %v3403_v56 }
 0x595   : > { %3619 = vmatmul.f32.gmra.mxu3 %v3548_v31 }
 0x59c   : > { %3478 = vmatmul.f32.gmra.mxu1 %v3406_v23  ;;  %4809 = vmatmul.msk.f32.gmra.mxu2 %vm646_vm0, %v3405_v35 }
 0x59d   : > { %3622 = vmatmul.f32.gmra.mxu3 %v3550_v51 }
 0x5a4   : > { %3481 = vmatmul.f32.gmra.mxu1 %v3408_v15  ;;  %4810 = vmatmul.msk.f32.gmra.mxu2 %vm646_vm0, %v3407_v22 }
 0x5a5   : > { %3625 = vmatmul.f32.gmra.mxu3 %v3552_v60 }
 0x5ac   : > { %3484 = vmatmul.f32.gmra.mxu1 %v3410_v6  ;;  %4811 = vmatmul.msk.f32.gmra.mxu2 %vm646_vm0, %v3409_v59 }
 0x5ad   : > { %3628 = vmatmul.f32.gmra.mxu3 %v3554_v25 }
 0x5b4   : > { %3487 = vmatmul.f32.gmra.mxu1 %v3412_v36  ;;  %4812 = vmatmul.msk.f32.gmra.mxu2 %vm646_vm0, %v3411_v55 }
 0x5b5   : > { %3631 = vmatmul.f32.gmra.mxu3 %v3556_v38 }
 0x5bc   : > { %4813 = vmatmul.msk.f32.gmra.mxu2 %vm646_vm0, %v3413_v61  ;;  %4814 = vmatmul.msk.f32.vlgmr.msrb.gmra.mxu1 %vm646_vm0, %v3539_v63 }
 0x5c4   : > { %4815 = vmatmul.msk.f32.gmra.mxu1 %vm646_vm0, %v3541_v24 }
 0x5cc   : > { %4816 = vmatmul.msk.f32.gmra.mxu1 %vm646_vm0, %v3543_v11 }
 0x5d4   : > { %4817 = vmatmul.msk.f32.gmra.mxu1 %vm646_vm0, %v3545_v10 }
 0x5dc   : > { %4818 = vmatmul.msk.f32.gmra.mxu1 %vm646_vm0, %v3547_v1 }
 0x5e4   : > { %4819 = vmatmul.msk.f32.gmra.mxu1 %vm646_vm0, %v3549_v3 }
 0x5e9   : > { %v3461_v47 = vpop.f32.mrf.mxu1 }
 0x5ec   : > { %4820 = vmatmul.msk.f32.gmra.mxu1 %vm646_vm0, %v3551_v41 }
 0x5ef   : > { %v3605_v40 = vpop.f32.mrf.mxu3 }
 0x5f1   : > { %v3464_v57 = vpop.f32.mrf.mxu1 }
 0x5f4   : > { %4821 = vmatmul.msk.f32.gmra.mxu1 %vm646_vm0, %v3553_v58 }
 0x5f7   : > { %v3508_v29 = vpop.f32.mrf.mxu2 }
 0x5f8   : > { %v3608_v52 = vpop.f32.mrf.mxu3  ;;  %v3509_v46 = vadd.f32 %v3508_v29, %v3461_v47 }
 0x5f9   : > { %v3467_v62 = vpop.f32.mrf.mxu1 }
 0x5fc   : > { %4822 = vmatmul.msk.f32.gmra.mxu1 %vm646_vm0, %v3555_v9 }
 0x5ff   : > { %v3511_v44 = vpop.f32.mrf.mxu2 }
 0x600   : > { %v3611_v8 = vpop.f32.mrf.mxu3  ;;  %v3512_v14 = vadd.f32 %v3511_v44, %v3464_v57 }
 0x601   : > { %v3470_v42 = vpop.f32.mrf.mxu1 }
 0x604   : > { %4823 = vmatmul.msk.f32.gmra.mxu1 %vm646_vm0, %v3557_v21 }
 0x607   : > { %v3514_v49 = vpop.f32.mrf.mxu2 }
 0x608   : > { %v3614_v30 = vpop.f32.mrf.mxu3  ;;  %v3515_v0 = vadd.f32 %v3514_v49, %v3467_v62 }
 0x609   : > { %v3473_v50 = vpop.f32.mrf.mxu1 }
 0x60f   : > { %v3517_v27 = vpop.f32.mrf.mxu2 }
 0x610   : > { %v3617_v33 = vpop.f32.mrf.mxu3  ;;  %v3518_v35 = vadd.f32 %v3517_v27, %v3470_v42 }
 0x611   : > { %v3476_v32 = vpop.f32.mrf.mxu1 }
 0x617   : > { %v3520_v17 = vpop.f32.mrf.mxu2 }
 0x618   : > { %v3620_v18 = vpop.f32.mrf.mxu3  ;;  %v3521_v59 = vadd.f32 %v3520_v17, %v3473_v50 }
 0x619   : > { %v7156_v34 = vpop.f32.mrf.mxu1 }
 0x61f   : > { %v3523_v22 = vpop.f32.mrf.mxu2 }
 0x620   : > { %v3623_v61 = vpop.f32.mrf.mxu3  ;;  %v3524_v63 = vadd.f32 %v3523_v22, %v3476_v32 }
 0x621   : > { %v7170_v28 = vpop.f32.mrf.mxu1 }
 0x627   : > { %v3526_v55 = vpop.f32.mrf.mxu2 }
 0x628   : > { %v3527_v11 = vadd.f32 %v3526_v55, %v7156_v34  ;;  %v3626_v25 = vpop.f32.mrf.mxu3 }
 0x629   : > { %v7172_v5 = vpop.f32.mrf.mxu1 }
 0x62f   : > { %v3529_v10 = vpop.f32.mrf.mxu2 }
 0x630   : > { %v3530_v3 = vadd.f32 %v3529_v10, %v7170_v28  ;;  %v3629_v58 = vpop.f32.mrf.mxu3  ;;  %v5199_v28 = vmov 2   ;;  %v4847_v10 = vld [vmem:[%s7602_s13 + $0x58] sm:$0xff] }
 0x631   : > { %v7174_v48 = vpop.f32.mrf.mxu1  ;;  %5086 = vset.pattern.permute.xlu0 %v5199_v28 }
 0x637   : > { %v3532_v57 = vpop.f32.mrf.mxu2 }
 0x638   : > { %v3533_v9 = vadd.f32 %v3532_v57, %v7172_v5  ;;  %v3632_v32 = vpop.f32.mrf.mxu3 }
 0x639   : > { %v3652_v26 = vpop.f32.mrf.mxu1 }
 0x63a   : > { %v3653_v7 = vadd.f32 %v3652_v26, %v3605_v40 }
 0x63c   : > { %v3682_v39 = vmax.f32 %v3509_v46, %v3653_v7  ;;  %v7794_v46 = vmov 0  }
 0x63e   : > { %4825 = vmatmul.msk.f32.vlgmr.msrb.gmra.mxu2 %vm3694_vm6, %v3682_v39  ;;  %4836 = vmatmul.msk.f32.vlgmr.msrb.gmra.mxu3 %vm3694_vm6, %v3682_v39 }
 0x63f   : > { %v3535_v50 = vpop.f32.mrf.mxu2 }
 0x640   : > { %v3536_v20 = vadd.f32 %v3535_v50, %v7174_v48  ;;  %v4858_v50 = vld [vmem:[%s7602_s13 + $0xb0] sm:$0xff] }
 0x641   : > { %v3655_v54 = vpop.f32.mrf.mxu1 }
 0x642   : > { %v3656_v43 = vadd.f32 %v3655_v54, %v3608_v52 }
 0x644   : > { %v3683_v45 = vmax.f32 %v3512_v14, %v3656_v43 }
 0x646   : > { %4826 = vmatmul.msk.f32.gmra.mxu2 %vm3694_vm6, %v3683_v45  ;;  %4837 = vmatmul.msk.f32.gmra.mxu3 %vm3694_vm6, %v3683_v45 }
 0x649   : > { %v3658_v37 = vpop.f32.mrf.mxu1 }
 0x64a   : > { %v3659_v19 = vadd.f32 %v3658_v37, %v3611_v8 }
 0x64c   : > { %v3684_v56 = vmax.f32 %v3515_v0, %v3659_v19  ;;  %v5201_v19 = vmov 4  }
 0x64e   : > { %4827 = vmatmul.msk.f32.gmra.mxu2 %vm3694_vm6, %v3684_v56  ;;  %4838 = vmatmul.msk.f32.gmra.mxu3 %vm3694_vm6, %v3684_v56 }
 0x651   : > { %v3661_v23 = vpop.f32.mrf.mxu1 }
 0x652   : > { %v3662_v2 = vadd.f32 %v3661_v23, %v3614_v30  ;;  %v5200_v30 = vmov 3  }
 0x654   : > { %v3685_v15 = vmax.f32 %v3518_v35, %v3662_v2 }
 0x656   : > { %4828 = vmatmul.msk.f32.gmra.mxu2 %vm3694_vm6, %v3685_v15  ;;  %4839 = vmatmul.msk.f32.gmra.mxu3 %vm3694_vm6, %v3685_v15 }
 0x659   : > { %v3664_v6 = vpop.f32.mrf.mxu1 }
 0x65a   : > { %v3665_v16 = vadd.f32 %v3664_v6, %v3617_v33 }
 0x65c   : > { %v3686_v36 = vmax.f32 %v3521_v59, %v3665_v16 }
 0x65e   : > { %4829 = vmatmul.msk.f32.gmra.mxu2 %vm3694_vm6, %v3686_v36  ;;  %4840 = vmatmul.msk.f32.gmra.mxu3 %vm3694_vm6, %v3686_v36 }
 0x661   : > { %v3667_v4 = vpop.f32.mrf.mxu1 }
 0x662   : > { %v3668_v31 = vadd.f32 %v3667_v4, %v3620_v18 }
 0x664   : > { %v3687_v24 = vmax.f32 %v3524_v63, %v3668_v31  ;;  %v3838_v63 = vld [vmem:[%s7602_s13] sm:$0xff] }
 0x666   : > { %4830 = vmatmul.msk.f32.gmra.mxu2 %vm3694_vm6, %v3687_v24  ;;  %4841 = vmatmul.msk.f32.gmra.mxu3 %vm3694_vm6, %v3687_v24 }
 0x669   : > { %v3670_v51 = vpop.f32.mrf.mxu1 }
 0x66a   : > { %v3671_v60 = vadd.f32 %v3670_v51, %v3623_v61  ;;  %v4846_v61 = vld [vmem:[%s7602_s13 + $0x50] sm:$0xff] }
 0x66c   : > { %v3688_v1 = vmax.f32 %v3527_v11, %v3671_v60 }
 0x66e   : > { %4831 = vmatmul.msk.f32.gmra.mxu2 %vm3694_vm6, %v3688_v1  ;;  %4842 = vmatmul.msk.f32.gmra.mxu3 %vm3694_vm6, %v3688_v1 }
 0x671   : > { %v3673_v38 = vpop.f32.mrf.mxu1 }
 0x672   : > { %v3674_v47 = vadd.f32 %v3673_v38, %v3626_v25  ;;  %v3839_v25 = vld [vmem:[%s7602_s13 + $0x8] sm:$0xff] }
 0x673   : > { %v4857_v38 = vld [vmem:[%s7602_s13 + $0xa8] sm:$0xff] }
 0x674   : > { %v3689_v41 = vmax.f32 %v3530_v3, %v3674_v47 }
 0x676   : > { %4832 = vmatmul.msk.f32.gmra.mxu2 %vm3694_vm6, %v3689_v41  ;;  %4843 = vmatmul.msk.f32.gmra.mxu3 %vm3694_vm6, %v3689_v41 }
 0x679   : > { %v3676_v62 = vpop.f32.mrf.mxu1 }
 0x67a   : > { %v3677_v42 = vadd.f32 %v3676_v62, %v3629_v58 }
 0x67c   : > { %v3690_v21 = vmax.f32 %v3533_v9, %v3677_v42  ;;  %v3840_v42 = vld [vmem:[%s7602_s13 + $0x10] sm:$0xff] }
 0x67e   : > { %4833 = vmatmul.msk.f32.gmra.mxu2 %vm3694_vm6, %v3690_v21  ;;  %4844 = vmatmul.msk.f32.gmra.mxu3 %vm3694_vm6, %v3690_v21  ;;  %v4848_v21 = vld [vmem:[%s7602_s13 + $0x60] sm:$0xff] }
 0x681   : > { %v3679_v34 = vpop.f32.mrf.mxu1 }
 0x682   : > { %v3680_v13 = vadd.f32 %v3679_v34, %v3632_v32 }
 0x684   : > { %v3691_v12 = vmax.f32 %v3536_v20, %v3680_v13 }
 0x686   : > { %4834 = vmatmul.msk.f32.gmra.mxu2 %vm3694_vm6, %v3691_v12  ;;  %4845 = vmatmul.msk.f32.gmra.mxu3 %vm3694_vm6, %v3691_v12 }
 0x6c1   : > { %v3746_v29 = vpop.f32.mrf.mxu2  ;;  %v3798_v40 = vpop.f32.mrf.mxu3 }
 0x6c2   : > { %v7202_v5 = vmax.f32 %v3746_v29, %v3798_v40 }
 0x6c4   : > { %3920 = vperm.xlu2 %5085, %v7202_v5   ;;  %3850 = vperm.xlu1 %4984, %v7202_v5  }
 0x6c9   : > { %v3749_v44 = vpop.f32.mrf.mxu2  ;;  %v3801_v52 = vpop.f32.mrf.mxu3 }
 0x6ca   : > { %v7206_v48 = vmax.f32 %v3749_v44, %v3801_v52  ;;  %v4849_v44 = vld [vmem:[%s7602_s13 + $0x68] sm:$0xff]  ;;  %v4859_v52 = vld [vmem:[%s7602_s13 + $0xb8] sm:$0xff] }
 0x6cc   : > { %3995 = vperm.xlu0 %5086, %v7206_v48   ;;  %3924 = vperm.xlu2 %5085, %v7206_v48  }
 0x6cd   : > { %3855 = vperm.xlu1 %4984, %v7206_v48  }
 0x6d1   : > { %v3752_v49 = vpop.f32.mrf.mxu2  ;;  %v3804_v26 = vpop.f32.mrf.mxu3 }
 0x6d2   : > { %v7211_v8 = vmax.f32 %v3752_v49, %v3804_v26 }
 0x6d4   : > { %5088 = vset.pattern.permute.xlu0 %v5198_v53  ;;  %5087 = vset.pattern.permute.xlu2 %v7794_v46 }
 0x6d5   : > { %5089 = vset.pattern.permute.xlu1 %v5199_v28  ;;  %3928 = vperm.xlu0 %5088, %v7211_v8  }
 0x6d6   : > { %3999 = vperm.xlu1 %5089, %v7211_v8   ;;  %3860 = vperm.xlu2 %5087, %v7211_v8  }
 0x6d9   : > { %v3755_v7 = vpop.f32.mrf.mxu2  ;;  %v3807_v39 = vpop.f32.mrf.mxu3 }
 0x6da   : > { %v7219_v54 = vmax.f32 %v3755_v7, %v3807_v39  ;;  %v4869_v7 = vld [vmem:[%s7602_s13 + $0x108] sm:$0xff] }
 0x6dd   : > { %3932 = vperm.xlu0 %5088, %v7219_v54  }
 0x6de   : > { %4003 = vperm.xlu1 %5089, %v7219_v54   ;;  %3865 = vperm.xlu2 %5087, %v7219_v54  }
 0x6e1   : > { %v3758_v14 = vpop.f32.mrf.mxu2  ;;  %v3810_v27 = vpop.f32.mrf.mxu3 }
 0x6e2   : > { %v7224_v43 = vmax.f32 %v3758_v14, %v3810_v27 }
 0x6e5   : > { %5095 = vset.pattern.permute.xlu0 %v7794_v46 }
 0x6e6   : > { %5092 = vset.pattern.permute.xlu1 %v5198_v53  ;;  %5090 = vset.pattern.permute.xlu2 %v5200_v30 }
 0x6e7   : > { %4074 = vperm.xlu2 %5090, %v7219_v54   ;;  %3936 = vperm.xlu1 %5092, %v7224_v43  }
 0x6e9   : > { %v3761_v45 = vpop.f32.mrf.mxu2  ;;  %v3813_v37 = vpop.f32.mrf.mxu3 }
 0x6ea   : > { %v3833_v0 = vmax.f32 %v3761_v45, %v3813_v37  ;;  %v3842_v37 = vld [vmem:[%s7602_s13 + $0x20] sm:$0xff] }
 0x6ec   : > { %3875 = vperm.xlu0 %5095, %v3833_v0  }
 0x6ef   : > { %5091 = vset.pattern.permute.xlu2 %v7794_v46  ;;  %5093 = vset.pattern.permute.xlu1 %v5199_v28 }
 0x6f0   : > { %4007 = vperm.xlu1 %5093, %v7224_v43   ;;  %3870 = vperm.xlu2 %5091, %v7224_v43  }
 0x6f1   : > { %v3764_v17 = vpop.f32.mrf.mxu2  ;;  %v3816_v56 = vpop.f32.mrf.mxu3 }
 0x6f2   : > { %v3834_v33 = vmax.f32 %v3764_v17, %v3816_v56 }
 0x6f4   : > { %5099 = vset.pattern.permute.xlu0 %v5201_v19 }
 0x6f5   : > { %4153 = vperm.xlu0 %5099, %v3833_v0  }
 0x6f8   : > { %5096 = vset.pattern.permute.xlu1 %v5198_v53  ;;  %5094 = vset.pattern.permute.xlu2 %v5200_v30 }
 0x6f9   : > { %4078 = vperm.xlu2 %5094, %v7224_v43   ;;  %3940 = vperm.xlu1 %5096, %v3833_v0   ;;  %v3767_v23 = vpop.f32.mrf.mxu2  ;;  %v3819_v35 = vpop.f32.mrf.mxu3 }
 0x6fa   : > { %v3835_v2 = vmax.f32 %v3767_v23, %v3819_v35 }
 0x6fd   : > { %5100 = vset.pattern.permute.xlu0 %v7794_v46 }
 0x6fe   : > { %3880 = vperm.xlu0 %5100, %v3834_v33  }
 0x701   : > { %5097 = vset.pattern.permute.xlu2 %v5199_v28  ;;  %3944 = vperm.xlu1 %5096, %v3834_v33   ;;  %v3822_v15 = vpop.f32.mrf.mxu3  ;;  %v3770_v22 = vpop.f32.mrf.mxu2 }
 0x702   : > { %4011 = vperm.xlu2 %5097, %v3833_v0   ;;  %v3836_v18 = vmax.f32 %v3770_v22, %v3822_v15  ;;  %v4860_v15 = vld [vmem:[%s7602_s13 + $0xc0] sm:$0xff]  ;;  %v4870_v22 = vld [vmem:[%s7602_s13 + $0x110] sm:$0xff] }
 0x706   : > { %5102 = vset.pattern.permute.xlu0 %v5200_v30 }
 0x707   : > { %4086 = vperm.xlu0 %5102, %v3834_v33  }
 0x709   : > { %5103 = vset.pattern.permute.xlu1 %v5201_v19  ;;  %v3825_v6 = vpop.f32.mrf.mxu3  ;;  %v3773_v59 = vpop.f32.mrf.mxu2 }
 0x70a   : > { %5098 = vset.pattern.permute.xlu2 %v5200_v30  ;;  %4157 = vperm.xlu1 %5103, %v3834_v33   ;;  %v7249_v36 = vmax.f32 %v3773_v59, %v3825_v6 }
 0x70b   : > { %4082 = vperm.xlu2 %5098, %v3833_v0   ;;  %v4850_v0 = vld [vmem:[%s7602_s13 + $0x70] sm:$0xff] }
 0x70f   : > { %5105 = vset.pattern.permute.xlu0 %v5198_v53 }
 0x710   : > { %3948 = vperm.xlu0 %5105, %v3835_v2  }
 0x712   : > { %4161 = vperm.xlu1 %5103, %v3835_v2  }
 0x713   : > { %5101 = vset.pattern.permute.xlu2 %v5199_v28 }
 0x714   : > { %4015 = vperm.xlu2 %5101, %v3834_v33  }
 0x718   : > { %5107 = vset.pattern.permute.xlu0 %v5200_v30 }
 0x719   : > { %4090 = vperm.xlu0 %5107, %v3835_v2  }
 0x71a   : > { %5108 = vset.pattern.permute.xlu1 %v7794_v46 }
 0x71b   : > { %3890 = vperm.xlu1 %5108, %v3836_v18  }
 0x71c   : > { %5104 = vset.pattern.permute.xlu2 %v7794_v46 }
 0x71d   : > { %3885 = vperm.xlu2 %5104, %v3835_v2  }
 0x71e   : > { %v3921_v16 = vpop.permute.xlu2 %3920 }
 0x71f   : > { %v3959_v24 = vmul.f32 %v4846_v61, %v3921_v16 }
 0x721   : > { %5114 = vset.pattern.permute.xlu0 %v5198_v53 }
 0x722   : > { %3956 = vperm.xlu0 %5114, %v7249_v36  }
 0x723   : > { %5110 = vset.pattern.permute.xlu1 %v5199_v28 }
 0x724   : > { %4023 = vperm.xlu1 %5110, %v3836_v18  }
 0x725   : > { %5106 = vset.pattern.permute.xlu2 %v5199_v28 }
 0x726   : > { %4019 = vperm.xlu2 %5106, %v3835_v2   ;;  %v3925_v55 = vpop.permute.xlu2 %3924 }
 0x727   : > { %v3960_v47 = vmul.f32 %v4847_v10, %v3925_v55 }
 0x72a   : > { %5115 = vset.pattern.permute.xlu0 %v5201_v19 }
 0x72b   : > { %4149 = vperm.xlu0 %5115, %v7224_v43  }
 0x72c   : > { %5111 = vset.pattern.permute.xlu1 %v5200_v30 }
 0x72d   : > { %4094 = vperm.xlu1 %5111, %v3836_v18  }
 0x72e   : > { %5109 = vset.pattern.permute.xlu2 %v5198_v53 }
 0x72f   : > { %3952 = vperm.xlu2 %5109, %v3836_v18  }
 0x730   : > { %v3861_v4 = vpop.permute.xlu2 %3860 }
 0x731   : > { %v3900_v34 = vmul.f32 %v3861_v4, %v3840_v42  ;;  %v3843_v4 = vld [vmem:[%s7602_s13 + $0x28] sm:$0xff] }
 0x733   : > { %4141 = vperm.xlu0 %5115, %v7211_v8  }
 0x735   : > { %5112 = vset.pattern.permute.xlu1 %v5201_v19 }
 0x736   : > { %4165 = vperm.xlu1 %5112, %v3836_v18   ;;  %v3851_v31 = vpop.permute.xlu1 %3850 }
 0x737   : > { %v3898_v51 = vmul.f32 %v3851_v31, %v3838_v63  ;;  %5113 = vset.pattern.permute.xlu2 %v7794_v46  ;;  %v4871_v31 = vld [vmem:[%s7602_s13 + $0x118] sm:$0xff] }
 0x738   : > { %v3866_v11 = vpop.permute.xlu2 %3865  ;;  %3895 = vperm.xlu2 %5113, %v7249_v36  }
 0x739   : > { %v7269_v60 = vadd.f32 %v3959_v24, %v3898_v51 }
 0x73e   : > { %5116 = vset.pattern.permute.xlu1 %v5200_v30  ;;  %v3996_v1 = vpop.permute.xlu0 %3995 }
 0x73f   : > { %v3856_v3 = vpop.permute.xlu1 %3855  ;;  %4070 = vperm.xlu1 %5116, %v7211_v8   ;;  %v4031_v58 = vmul.f32 %v4857_v38, %v3996_v1  ;;  %v3844_v38 = vld [vmem:[%s7602_s13 + $0x30] sm:$0xff] }
 0x740   : > { %v3899_v41 = vmul.f32 %v3856_v3, %v3839_v25  ;;  %5117 = vset.pattern.permute.xlu2 %v5201_v19  ;;  %v4852_v3 = vld [vmem:[%s7602_s13 + $0x80] sm:$0xff] }
 0x741   : > { %v4075_v57 = vpop.permute.xlu2 %4074  ;;  %4145 = vperm.xlu2 %5117, %v7219_v54  }
 0x742   : > { %v3970_v62 = vadd.f32 %v3960_v47, %v3899_v41  ;;  %v4104_v27 = vmul.f32 %v4869_v7, %v4075_v57 }
 0x744   : > { %v7284_v9 = vadd.f32 %v4031_v58, %v3970_v62  ;;  %v4862_v62 = vld [vmem:[%s7602_s13 + $0xd0] sm:$0xff] }
 0x747   : > { %5118 = vset.pattern.permute.xlu1 %v5199_v28  ;;  %v3929_v32 = vpop.permute.xlu0 %3928  ;;  %v3841_v28 = vld [vmem:[%s7602_s13 + $0x18] sm:$0xff] }
 0x748   : > { %v4000_v20 = vpop.permute.xlu1 %3999  ;;  %v3961_v13 = vmul.f32 %v4848_v21, %v3929_v32  ;;  %4027 = vperm.xlu1 %5118, %v7249_v36   ;;  %v3901_v26 = vmul.f32 %v3866_v11, %v3841_v28  ;;  %v4872_v21 = vld [vmem:[%s7602_s13 + $0x120] sm:$0xff] }
 0x749   : > { %5119 = vset.pattern.permute.xlu2 %v5200_v30  ;;  %v4032_v12 = vmul.f32 %v4858_v50, %v4000_v20 }
 0x74a   : > { %v3971_v53 = vadd.f32 %v3961_v13, %v3900_v34  ;;  %v3871_v29 = vpop.permute.xlu2 %3870  ;;  %4098 = vperm.xlu2 %5119, %v7249_v36  }
 0x74b   : > { %v3902_v56 = vmul.f32 %v3871_v29, %v3842_v37 }
 0x74c   : > { %v7299_v40 = vadd.f32 %v4032_v12, %v3971_v53  ;;  %v4882_v12 = vld [vmem:[%s7602_s13 + $0x170] sm:$0xff] }
 0x74f   : > { %v3933_v49 = vpop.permute.xlu0 %3932 }
 0x750   : > { %v4004_v8 = vpop.permute.xlu1 %4003  ;;  %v3962_v46 = vmul.f32 %v4849_v44, %v3933_v49  ;;  %3991 = vperm.xlu1 %5118, %v7202_v5  }
 0x751   : > { %v4033_v39 = vmul.f32 %v4859_v52, %v4004_v8 }
 0x752   : > { %v3972_v54 = vadd.f32 %v3962_v46, %v3901_v26  ;;  %5120 = vset.pattern.permute.xlu2 %v5201_v19 }
 0x753   : > { %v4079_v14 = vpop.permute.xlu2 %4078  ;;  %4169 = vperm.xlu2 %5120, %v7249_v36  }
 0x754   : > { %v4043_v43 = vadd.f32 %v4033_v39, %v3972_v54 }
 0x756   : > { %v7316_v45 = vadd.f32 %v4104_v27, %v4043_v43 }
 0x758   : > { %5122 = vset.pattern.permute.xlu1 %v5200_v30 }
 0x759   : > { %v3937_v17 = vpop.permute.xlu1 %3936  ;;  %4062 = vperm.xlu1 %5122, %v7202_v5  }
 0x75a   : > { %v3963_v33 = vmul.f32 %v4850_v0, %v3937_v17  ;;  %v4853_v17 = vld [vmem:[%s7602_s13 + $0x88] sm:$0xff] }
 0x75b   : > { %5121 = vset.pattern.permute.xlu2 %v5200_v30  ;;  %v4105_v30 = vmul.f32 %v4870_v22, %v4079_v14 }
 0x75c   : > { %v3973_v23 = vadd.f32 %v3963_v33, %v3902_v56  ;;  %v4012_v35 = vpop.permute.xlu2 %4011  ;;  %4066 = vperm.xlu2 %5121, %v7206_v48   ;;  %v4855_v56 = vld [vmem:[%s7602_s13 + $0x98] sm:$0xff] }
 0x75e   : > { %v3876_v2 = vpop.permute.xlu0 %3875 }
 0x75f   : > { %v3903_v63 = vmul.f32 %v3876_v2, %v3843_v4  ;;  %v3846_v2 = vld [vmem:[%s7602_s13 + $0x40] sm:$0xff]  ;;  %v4863_v4 = vld [vmem:[%s7602_s13 + $0xd8] sm:$0xff] }
 0x761   : > { %5124 = vset.pattern.permute.xlu1 %v5201_v19 }
 0x762   : > { %v4008_v18 = vpop.permute.xlu1 %4007  ;;  %4133 = vperm.xlu1 %5124, %v7202_v5   ;;  %v4851_v5 = vld [vmem:[%s7602_s13 + $0x78] sm:$0xff] }
 0x763   : > { %v4034_v6 = vmul.f32 %v4860_v15, %v4008_v18  ;;  %v3847_v15 = vld [vmem:[%s7602_s13 + $0x48] sm:$0xff] }
 0x764   : > { %5123 = vset.pattern.permute.xlu2 %v5201_v19  ;;  %v4861_v19 = vld [vmem:[%s7602_s13 + $0xc8] sm:$0xff] }
 0x765   : > { %v4044_v59 = vadd.f32 %v4034_v6, %v3973_v23  ;;  %4137 = vperm.xlu2 %5123, %v7206_v48   ;;  %v4083_v16 = vpop.permute.xlu2 %4082  ;;  %v4035_v24 = vmul.f32 %v4861_v19, %v4012_v35  ;;  %v3845_v23 = vld [vmem:[%s7602_s13 + $0x38] sm:$0xff] }
 0x766   : > { %v4106_v11 = vmul.f32 %v4871_v31, %v4083_v16  ;;  %v4865_v16 = vld [vmem:[%s7602_s13 + $0xe8] sm:$0xff]  ;;  %v4875_v31 = vld [vmem:[%s7602_s13 + $0x138] sm:$0xff] }
 0x767   : > { %v7338_v36 = vpop.permute.xlu0 %4153  ;;  %v7340_v55 = vadd.f32 %v4105_v30, %v4044_v59  ;;  %v4854_v30 = vld [vmem:[%s7602_s13 + $0x90] sm:$0xff]  ;;  %v4864_v59 = vld [vmem:[%s7602_s13 + $0xe0] sm:$0xff] }
 0x76b   : > { %v3941_v61 = vpop.permute.xlu1 %3940 }
 0x76c   : > { %v3964_v48 = vmul.f32 %v4851_v5, %v3941_v61  ;;  %v4873_v5 = vld [vmem:[%s7602_s13 + $0x128] sm:$0xff] }
 0x76e   : > { %v3974_v51 = vadd.f32 %v3964_v48, %v3903_v63  ;;  %v4016_v25 = vpop.permute.xlu2 %4015  ;;  %v4874_v63 = vld [vmem:[%s7602_s13 + $0x130] sm:$0xff] }
 0x76f   : > { %v4036_v50 = vmul.f32 %v4862_v62, %v4016_v25  ;;  %v4230_v62 = vld [vmem:[%s7604_s15 + $0x60] sm:$0xff] }
 0x770   : > { %v4045_v10 = vadd.f32 %v4035_v24, %v3974_v51  ;;  %v3881_v1 = vpop.permute.xlu0 %3880  ;;  %v4232_v51 = vld [vmem:[%s7604_s15 + $0x70] sm:$0xff] }
 0x771   : > { %v3904_v57 = vmul.f32 %v3881_v1, %v3844_v38  ;;  %4239 = vmatpush.msra.mxu1 %v4232_v51 }
 0x772   : > { %v7360_v47 = vadd.f32 %v4106_v11, %v4045_v10  ;;  %v4231_v11 = vld [vmem:[%s7604_s15 + $0x68] sm:$0xff] }
 0x773   : > { %v3945_v41 = vpop.permute.xlu1 %3944  ;;  %4240 = vmatpush.msra.mxu1 %v4231_v11 }
 0x774   : > { %v3965_v58 = vmul.f32 %v4852_v3, %v3945_v41 }
 0x775   : > { %4241 = vmatpush.msra.mxu1 %v4230_v62 }
 0x776   : > { %v3975_v42 = vadd.f32 %v3965_v58, %v3904_v57  ;;  %v4884_v57 = vld [vmem:[%s7602_s13 + $0x180] sm:$0xff]  ;;  %v4885_v58 = vld [vmem:[%s7602_s13 + $0x188] sm:$0xff] }
 0x777   : > { %v3886_v34 = vpop.permute.xlu2 %3885 }
 0x778   : > { %v4046_v20 = vadd.f32 %v4036_v50, %v3975_v42  ;;  %v3905_v6 = vmul.f32 %v3886_v34, %v3845_v23  ;;  %v4226_v23 = vld [vmem:[%s7604_s15 + $0x40] sm:$0xff] }
 0x779   : > { %v4087_v32 = vpop.permute.xlu0 %4086 }
 0x77a   : > { %v4107_v13 = vmul.f32 %v4872_v21, %v4087_v32 }
 0x77c   : > { %v4117_v53 = vadd.f32 %v4107_v13, %v4046_v20  ;;  %v4158_v29 = vpop.permute.xlu1 %4157  ;;  %v4229_v20 = vld [vmem:[%s7604_s15 + $0x58] sm:$0xff] }
 0x77d   : > { %v4178_v28 = vmul.f32 %v4882_v12, %v4158_v29  ;;  %4242 = vmatpush.msra.mxu1 %v4229_v20  ;;  %v4266_v20 = vld [vmem:[%s7606_s17 + $0x38] sm:$0xff] }
 0x77f   : > { %v7371_v44 = vadd.f32 %v4178_v28, %v4117_v53  ;;  %v4883_v28 = vld [vmem:[%s7602_s13 + $0x178] sm:$0xff] }
 0x780   : > { %v4020_v52 = vpop.permute.xlu2 %4019 }
 0x781   : > { %v4037_v3 = vmul.f32 %v4863_v4, %v4020_v52  ;;  %v4877_v4 = vld [vmem:[%s7602_s13 + $0x148] sm:$0xff] }
 0x782   : > { %v3949_v54 = vpop.permute.xlu0 %3948 }
 0x783   : > { %v3966_v35 = vmul.f32 %v4853_v17, %v3949_v54 }
 0x784   : > { %v7373_v49 = vpop.permute.xlu1 %4161 }
 0x785   : > { %v3976_v48 = vadd.f32 %v3966_v35, %v3905_v6  ;;  %v4867_v6 = vld [vmem:[%s7602_s13 + $0xf8] sm:$0xff] }
 0x787   : > { %v4047_v34 = vadd.f32 %v4037_v3, %v3976_v48  ;;  %v4222_v48 = vld [vmem:[%s7604_s15 + $0x20] sm:$0xff] }
 0x789   : > { %v3953_v8 = vpop.permute.xlu2 %3952 }
 0x78a   : > { %v3967_v10 = vmul.f32 %v4854_v30, %v3953_v8  ;;  %v4228_v8 = vld [vmem:[%s7604_s15 + $0x50] sm:$0xff] }
 0x78b   : > { %v4091_v43 = vpop.permute.xlu0 %4090  ;;  %4243 = vmatpush.msra.mxu1 %v4228_v8  ;;  %v4224_v30 = vld [vmem:[%s7604_s15 + $0x30] sm:$0xff] }
 0x78c   : > { %v4108_v41 = vmul.f32 %v4873_v5, %v4091_v43  ;;  %v4881_v43 = vld [vmem:[%s7602_s13 + $0x168] sm:$0xff] }
 0x78d   : > { %v3891_v26 = vpop.permute.xlu1 %3890 }
 0x78e   : > { %v3906_v19 = vmul.f32 %v3891_v26, %v3846_v2  ;;  %v4225_v2 = vld [vmem:[%s7604_s15 + $0x38] sm:$0xff] }
 0x790   : > { %v3977_v42 = vadd.f32 %v3967_v10, %v3906_v19  ;;  %v4223_v19 = vld [vmem:[%s7604_s15 + $0x28] sm:$0xff] }
 0x792   : > { %v3896_v7 = vpop.permute.xlu2 %3895 }
 0x793   : > { %v3907_v61 = vmul.f32 %v3896_v7, %v3847_v15  ;;  %v4177_v15 = vmul.f32 %v4881_v43, %v7338_v36  ;;  %v4878_v36 = vld [vmem:[%s7602_s13 + $0x150] sm:$0xff] }
 0x794   : > { %v3957_v33 = vpop.permute.xlu0 %3956 }
 0x795   : > { %v3968_v18 = vmul.f32 %v4855_v56, %v3957_v33  ;;  %v4880_v56 = vld [vmem:[%s7602_s13 + $0x160] sm:$0xff] }
 0x796   : > { %v4024_v46 = vpop.permute.xlu1 %4023  ;;  %v4868_v33 = vld [vmem:[%s7602_s13 + $0x100] sm:$0xff] }
 0x797   : > { %v3978_v25 = vadd.f32 %v3968_v18, %v3907_v61  ;;  %v4038_v1 = vmul.f32 %v4864_v59, %v4024_v46  ;;  %v4118_v46 = vadd.f32 %v4108_v41, %v4047_v34  ;;  %v4267_v34 = vld [vmem:[%s7606_s17 + $0x40] sm:$0xff] }
 0x799   : > { %v4048_v13 = vadd.f32 %v4038_v1, %v3977_v42  ;;  %v4220_v42 = vld [vmem:[%s7604_s15 + $0x10] sm:$0xff] }
 0x79b   : > { %v7375_v14 = vpop.permute.xlu2 %4145 }
 0x79d   : > { %v4150_v52 = vpop.permute.xlu0 %4149 }
 0x79f   : > { %v4095_v39 = vpop.permute.xlu1 %4094 }
 0x7a0   : > { %v4109_v21 = vmul.f32 %v4874_v63, %v4095_v39  ;;  %v4856_v63 = vld [vmem:[%s7602_s13 + $0xa0] sm:$0xff] }
 0x7a2   : > { %v4119_v7 = vadd.f32 %v4109_v21, %v4048_v13  ;;  %v4219_v21 = vld [vmem:[%s7604_s15 + $0x8] sm:$0xff]  ;;  %v4265_v13 = vld [vmem:[%s7606_s17 + $0x30] sm:$0xff] }
 0x7a4   : > { %v4099_v37 = vpop.permute.xlu2 %4098 }
 0x7a5   : > { %v4110_v50 = vmul.f32 %v4875_v31, %v4099_v37  ;;  %v4179_v37 = vmul.f32 %v4883_v28, %v7373_v49  ;;  %v4879_v49 = vld [vmem:[%s7602_s13 + $0x158] sm:$0xff]  ;;  %v4192_v28 = vld [vmem:[%s7603_s14] sm:$0x1] }
 0x7a6   : > { %v4175_v59 = vmul.f32 %v4879_v49, %v7375_v14 }
 0x7a7   : > { %v4189_v35 = vadd.f32 %v4179_v37, %v4118_v46  ;;  %v4261_v46 = vld [vmem:[%s7606_s17 + $0x10] sm:$0xff] }
 0x7a8   : > { %v4166_v27 = vpop.permute.xlu1 %4165  ;;  %v4185_v31 = vadd.f32 %v4175_v59, %v7316_v45 }
 0x7a9   : > { %v4180_v12 = vmul.f32 %v4884_v57, %v4166_v27  ;;  %v4227_v27 = vld [vmem:[%s7604_s15 + $0x48] sm:$0xff] }
 0x7aa   : > { %4244 = vmatpush.msra.mxu1 %v4227_v27 }
 0x7ab   : > { %v4190_v17 = vadd.f32 %v4180_v12, %v4119_v7  ;;  %v4264_v12 = vld [vmem:[%s7606_s17 + $0x28] sm:$0xff] }
 0x7ac   : > { %4245 = vmatpush.msra.mxu1 %v4226_v23  ;;  %v4260_v7 = vld [vmem:[%s7606_s17 + $0x8] sm:$0xff] }
 0x7ad   : > { %v4170_v22 = vpop.permute.xlu2 %4169 }
 0x7ae   : > { %v4181_v53 = vmul.f32 %v4885_v58, %v4170_v22  ;;  %v4176_v22 = vmul.f32 %v4880_v56, %v4150_v52  ;;  %4246 = vmatpush.msra.mxu1 %v4225_v2 }
 0x7b0   : > { %v4186_v14 = vadd.f32 %v4176_v22, %v7340_v55  ;;  %4247 = vmatpush.msra.mxu1 %v4224_v30  ;;  %v4221_v55 = vld [vmem:[%s7604_s15 + $0x18] sm:$0xff] }
 0x7b1   : > { %v7377_v0 = vpop.permute.xlu1 %4070 }
 0x7b2   : > { %v4103_v18 = vmul.f32 %v4868_v33, %v7377_v0  ;;  %v4142_v0 = vpop.permute.xlu0 %4141  ;;  %4248 = vmatpush.msra.mxu1 %v4223_v19 }
 0x7b4   : > { %4249 = vmatpush.msra.mxu1 %v4222_v48 }
 0x7b6   : > { %v4067_v26 = vpop.permute.xlu2 %4066  ;;  %4250 = vmatpush.msra.mxu1 %v4221_v55 }
 0x7b8   : > { %4251 = vmatpush.msra.mxu1 %v4220_v42 }
 0x7ba   : > { %v4028_v24 = vpop.permute.xlu1 %4027  ;;  %4252 = vmatpush.msra.mxu1 %v4219_v21 }
 0x7bb   : > { %v4039_v38 = vmul.f32 %v4865_v16, %v4028_v24  ;;  %v4187_v16 = vadd.f32 %v4177_v15, %v7360_v47  ;;  %v4102_v47 = vmul.f32 %v4867_v6, %v4067_v26  ;;  %v4174_v24 = vmul.f32 %v4878_v36, %v4142_v0 }
 0x7bd   : > { %v4049_v32 = vadd.f32 %v4039_v38, %v3978_v25  ;;  %v4112_v11 = vadd.f32 %v4102_v47, %v7284_v9  ;;  %v4876_v38 = vld [vmem:[%s7602_s13 + $0x140] sm:$0xff]  ;;  %v5202_v9 = vmov 1.0  }
 0x7bf   : > { %v4120_v29 = vadd.f32 %v4110_v50, %v4049_v32  ;;  %v4138_v5 = vpop.permute.xlu2 %4137  ;;  %v4269_v50 = vld [vmem:[%s7606_s17 + $0x50] sm:$0xf]  ;;  %v4268_v32 = vld [vmem:[%s7606_s17 + $0x48] sm:$0xff] }
 0x7c0   : > { %v4173_v51 = vmul.f32 %v4877_v4, %v4138_v5  ;;  %4888 = vmatpush.msk.msra.mxu2 %vm2093_vm2, %v4269_v50 }
 0x7c1   : > { %v4191_v39 = vadd.f32 %v4181_v53, %v4120_v29  ;;  %v4263_v53 = vld [vmem:[%s7606_s17 + $0x20] sm:$0xff]  ;;  %v4262_v29 = vld [vmem:[%s7606_s17 + $0x18] sm:$0xff] }
 0x7c2   : > { %v3992_v54 = vpop.permute.xlu1 %3991  ;;  %v4183_v1 = vadd.f32 %v4173_v51, %v4112_v11  ;;  %4283 = vmatpush.msra.mxu2 %v4268_v32 }
 0x7c3   : > { %4203 = vmatpush.msra.mxu0 %v4191_v39  ;;  %v4030_v10 = vmul.f32 %v4856_v63, %v3992_v54  ;;  %v4259_v39 = vld [vmem:[%s7606_s17] sm:$0xff] }
 0x7c4   : > { %4284 = vmatpush.msra.mxu2 %v4267_v34  ;;  %v4233_v54 = vld [vmem:[%s7605_s16] sm:$0x1] }
 0x7c5   : > { %4204 = vmatpush.msra.mxu0 %v4190_v17  ;;  %v4040_v3 = vadd.f32 %v4030_v10, %v7269_v60  ;;  %v4218_v60 = vld [vmem:[%s7604_s15] sm:$0xff] }
 0x7c6   : > { %4253 = vmatpush.msra.mxu1 %v4218_v60  ;;  %4285 = vmatpush.msra.mxu2 %v4266_v20  ;;  %v4270_v17 = vld [vmem:[%s7607_s18] sm:$0x1] }
 0x7c7   : > { %4205 = vmatpush.msra.mxu0 %v4189_v35 }
 0x7c8   : > { %4286 = vmatpush.msra.mxu2 %v4265_v13 }
 0x7c9   : > { %4206 = vmatpush.msra.mxu0 %v7371_v44  ;;  %v4113_v44 = vadd.f32 %v4103_v18, %v7299_v40  ;;  %v4866_v40 = vld [vmem:[%s7602_s13 + $0xf0] sm:$0xff] }
 0x7ca   : > { %4287 = vmatpush.msra.mxu2 %v4264_v12 }
 0x7cb   : > { %v4063_v61 = vpop.permute.xlu1 %4062  ;;  %4207 = vmatpush.msra.mxu0 %v4187_v16  ;;  %v4184_v25 = vadd.f32 %v4174_v24, %v4113_v44 }
 0x7cc   : > { %v4101_v45 = vmul.f32 %v4866_v40, %v4063_v61  ;;  %4288 = vmatpush.msra.mxu2 %v4263_v53 }
 0x7cd   : > { %4208 = vmatpush.msra.mxu0 %v4186_v14 }
 0x7ce   : > { %v4111_v57 = vadd.f32 %v4101_v45, %v4040_v3  ;;  %4289 = vmatpush.msra.mxu2 %v4262_v29 }
 0x7cf   : > { %4209 = vmatpush.msra.mxu0 %v4185_v31 }
 0x7d0   : > { %4290 = vmatpush.msra.mxu2 %v4261_v46 }
 0x7d1   : > { %4210 = vmatpush.msra.mxu0 %v4184_v25 }
 0x7d2   : > { %4291 = vmatpush.msra.mxu2 %v4260_v7 }
 0x7d3   : > { %4211 = vmatpush.msra.mxu0 %v4183_v1 }
 0x7d4   : > { %v4134_v41 = vpop.permute.xlu1 %4133  ;;  %4292 = vmatpush.msra.mxu2 %v4259_v39 }
 0x7d5   : > { %v4172_v58 = vmul.f32 %v4876_v38, %v4134_v41 }
 0x7d7   : > { %v4182_v62 = vadd.f32 %v4172_v58, %v4111_v57 }
 0x7d9   : > { %4212 = vmatpush.msra.mxu0 %v4182_v62 }
 0x7da   : > { %4886 = vmatmul.msk.f32.vlgmr.msra.gmra.mxu0 %vm4193_vm7, %v5202_v9 }
 0x857   : > { %v4214_v52 = vpop.f32.mrf.mxu0 }
 0x858   : > { %v4215_v26 = vadd.f32 %v4214_v52, %v4192_v28 }
 0x85a   : > { %v4217_v8 = vmax.f32 %v4215_v26, 0.0 }
 0x85c   : > { %4887 = vmatmul.msk.f32.vlgmr.msra.gmra.mxu1 %vm4234_vm8, %v4217_v8 }
 0x8d9   : > { %v4255_v27 = vpop.f32.mrf.mxu1 }
 0x8da   : > { %v4256_v43 = vadd.f32 %v4255_v27, %v4233_v54 }
 0x8dc   : > { %v4258_v37 = vmax.f32 %v4256_v43, 0.0 }
 0x8de   : > { %4889 = vmatmul.msk.f32.vlgmr.msra.gmra.mxu2 %vm2255_vm4, %v4258_v37 }
 0x961   : > { %v4294_v56 = vpop.f32.mrf.mxu2 }
 0x962   : > { %v4295_v33 = vadd.f32 %v4294_v56, %v4270_v17 }
 0x964   : > { %v4298_v23 = vsel %vm4297_vm9, %v4295_v33, -inf }
 0x965   : > { %4299 = vmax.xlane.f32.xlu2 %v4298_v23 }
 0x9d8   : > { %v4300_v35 = vpop.xlane.xlu2 %4299 }
 0x9d9   : > { %v4301_v49 = vsub.f32 %v4295_v33, %v4300_v35 }
 0x9db   : > { %v4302_v2 = vmul.f32 1.442695, %v4301_v49 }
 0x9dd   : > { %5125 = vpow2.f32 %v4302_v2 }
 0x9e3   : > { %v5126_v15 = vpop.eup %5125 }
 0x9e4   : > { %v4304_v22 = vsel %vm4297_vm9, %v5126_v15, 0.0 }
 0x9e5   : > { %4305 = vadd.xlane.f32.xlu0 %v4304_v22 }
 0xa58   : > { %v4306_v18 = vpop.xlane.xlu0 %4305 }
 0xa59   : > { %5127 = vrcp.f32 %v4306_v18 }
 0xa5f   : > { %v5128_v6 = vpop.eup %5127 }
 0xa60   : > { %v4308_v30 = vmul.f32 %v5128_v6, %v5126_v15 }
 0xa62   : > { %4309 = vst.msk [vmem:[%s594_s28] sm:$0x1] %vm4297_vm9, %v4308_v30 }
 0xa63   : > { %5156 = shalt.err (!%p5153_p3)
}
 0xa64   : > { %4893 = dma.vmem_to_hbm [thread:$0]  (%p5341_p5), %s4322_s20, 16, %s4324_s2, %s4311_s22  }
 0xa65 PF: > { %s7795_s25 = sld [smem:[#allocation5_spill]]  ;;  %p4899_p4 = scmp.ge.s32.totalorder %s5191_s21, 2 }
 0xa67   : > { %p4896_p7 = pnand %p4899_p4, %p5345_p6 }
 0xa69   : > { %p4897_p8 = pneg %p4896_p7 }
 0xa6b   : > { %s4335_s5 = sand.u32 1, %s7795_s25  }
 0xa6c   : > { %s4336_s4 = scalar_lea.sflag [#allocation3], %s4335_s5 }
 0xa6d   : > { %5174 = dma.done.wait (%p4897_p8), %s4336_s4, 16  }
 0xa6e   : > { %5176 = vsyncadd (%p4897_p8), %s4336_s4, 4294967280  ;;  %s7797_s21 = sld [smem:[#allocation7_spill]]  ;;  %s7800_s0 = smov %s5183_s30 }
 0xa6f   : > { %s7798_s29 = sld [smem:[#allocation6_spill]] }
 0xa70   : > { %s7799_s20 = sld [smem:[#allocation8_spill]] }
 0xa74   : > { %p29_p9 = scmp.ge.s32.totalorder %s7797_s21, 4  }
 0xa75   : > { %s7801_s30 = smov %s7798_s29 }
 0xa76   :  { %31 = sbr.rel (!%p29_p9) target bundleno = 10 (0xa), region = 143 }
 0xa7b   :  { %4341 = vsyncpa [#allocation3], 1 }
 0xa7c   :  { %4343 = vsyncpa [#allocation3 + $0x1], 1 }

</bundles_post_ra>
